<compile_context>
chip_gen: v5e
topology: v5e:2x2
jax: 0.10.0
libtpu: 0.0.40
codegen_flags: <defaults>
</compile_context>

<pallas_src>
import jax
import jax.numpy as jnp
from jax import lax
from jax.experimental import pallas as pl
from jax.experimental.pallas import tpu as pltpu

BN_EPS = 1e-5
CORR_DIV = 1024.0     # hard-coded in the module: c.div_(1024)
LAMBDA = 0.0039       # hard-coded in the module
LOSS_SCALE = 1.0 / 32.0


def barlow_kernel(x_ref, w0_ref, w1_ref, g1_ref, b1_ref,
                  w2_ref, g2_ref, b2_ref, w3_ref, loss_ref):
    two_n = x_ref.shape[0]          # stacked rows: x1 on top of x2
    n = two_n // 2

    x = x_ref[...]                  # bf16 [2N, F]
    w0 = w0_ref[...]                # bf16 weights (halved HBM->VMEM bytes)
    w1 = w1_ref[...]
    w2 = w2_ref[...]
    w3 = w3_ref[...]
    g1 = g1_ref[...]                # f32 (1, D) BN affine params
    b1 = b1_ref[...]
    g2 = g2_ref[...]
    b2 = b2_ref[...]

    def bn_affine(h, gamma, beta):
        # BatchNorm1d (training stats, biased var) as a fused scale/shift:
        # one FMA per element after the per-feature scale/shift vectors.
        mu = jnp.mean(h, axis=0, keepdims=True)
        var = jnp.mean(h * h, axis=0, keepdims=True) - mu * mu
        scale = gamma * lax.rsqrt(var + BN_EPS)
        shift = beta - mu * scale
        return h * scale + shift

    def bn_noaffine(h):
        mu = jnp.mean(h, axis=0, keepdims=True)
        var = jnp.mean(h * h, axis=0, keepdims=True) - mu * mu
        scale = lax.rsqrt(var + BN_EPS)
        return h * scale - mu * scale

    def bn_relu_pair(h, gamma, beta):
        # BN statistics are per-branch: split the stacked rows, normalize each
        # half in f32, ReLU, restack, and hand back a bf16 MXU operand.
        h1 = jnp.maximum(bn_affine(h[:n, :], gamma, beta), 0.0)
        h2 = jnp.maximum(bn_affine(h[n:, :], gamma, beta), 0.0)
        return jnp.concatenate([h1, h2], axis=0).astype(jnp.bfloat16)

    # stand-in backbone: flatten (done outside) + bias-free linear, both views
    # in a single M=2N MXU pass per weight matrix.
    f = jnp.dot(x, w0, preferred_element_type=jnp.float32)        # f32 [2N, D]
    # projector layer 1: Linear -> BN -> ReLU
    h = bn_relu_pair(jnp.dot(f.astype(jnp.bfloat16), w1,
                             preferred_element_type=jnp.float32), g1, b1)
    # projector layer 2: Linear -> BN -> ReLU
    h = bn_relu_pair(jnp.dot(h, w2, preferred_element_type=jnp.float32), g2, b2)
    # projector layer 3: Linear (no bias)
    z = jnp.dot(h, w3, preferred_element_type=jnp.float32)        # f32 [2N, D]

    zn1 = bn_noaffine(z[:n, :])     # f32 [N, D]
    zn2 = bn_noaffine(z[n:, :])     # f32 [N, D]

    # cross-correlation: contract the batch axis of both operands directly
    # (no explicit .T / XLU transpose); keep the small [D, D] matmul in f32.
    c = lax.dot_general(zn1, zn2, (((0,), (0,)), ((), ())),
                        preferred_element_type=jnp.float32) * (1.0 / CORR_DIV)

    # diagonal of c extracted as a cheap [N, D] -> [1, D] VPU reduction
    # instead of iota masks + masked DxD reductions.
    diag = jnp.sum(zn1 * zn2, axis=0, keepdims=True) * (1.0 / CORR_DIV)

    on_diag = jnp.sum((diag - 1.0) ** 2, keepdims=True)                 # (1,1)
    off_diag = (jnp.sum(c * c, keepdims=True)
                - jnp.sum(diag * diag, keepdims=True))                  # (1,1)

    loss_ref[...] = (on_diag + LAMBDA * off_diag) * LOSS_SCALE


def barlow_twins_loss(y1, y2, params):
    """y1, y2: NCHW images. Returns scalar Barlow Twins loss."""
    n = y1.shape[0]
    x1 = y1.reshape(n, -1)
    x2 = y2.reshape(n, -1)
    # stack both views so each weight matrix is used by exactly one matmul
    x = jnp.concatenate([x1, x2], axis=0).astype(jnp.bfloat16)     # [2N, F]

    w0, w1, g1, b1, w2, g2, b2, w3 = params
    w0b = w0.astype(jnp.bfloat16)
    w1b = w1.astype(jnp.bfloat16)
    w2b = w2.astype(jnp.bfloat16)
    w3b = w3.astype(jnp.bfloat16)
    feat_in, d = w0.shape

    # advisory cost estimate for XLA scheduling around the fused call
    flops = int(2 * (2 * n) * (feat_in * d + 3 * d * d) + 2 * n * d * d)
    weight_bytes = (feat_in * d + 3 * d * d) * 2
    bytes_accessed = int(2 * n * feat_in * 2 + weight_bytes + 4 * d * 4 + 4)
    cost = pl.CostEstimate(flops=flops, transcendentals=int(6 * d),
                           bytes_accessed=bytes_accessed)

    # scoped-VMEM limit sized to the actual resident set (2x + headroom),
    # capped at v7x's 64 MiB physical VMEM.
    resident = (2 * n * feat_in * 2          # stacked bf16 input
                + weight_bytes               # bf16 weights
                + 4 * d * 4                  # BN affine params
                + 8 * (2 * n) * d * 4        # f32 activation copies (generous)
                + d * d * 4)                 # correlation matrix
    vmem_limit = int(min(2 * resident + (8 << 20), 64 << 20))

    vmem = pl.BlockSpec(memory_space=pltpu.MemorySpace.VMEM)
    out = pl.pallas_call(
        barlow_kernel,
        out_shape=jax.ShapeDtypeStruct((1, 1), jnp.float32),
        in_specs=[vmem] * 9,
        out_specs=vmem,
        compiler_params=pltpu.CompilerParams(vmem_limit_bytes=vmem_limit),
        cost_estimate=cost,
    )(x, w0b, w1b, g1, b1, w2b, g2, b2, w3b)
    return out[0, 0]


def reference_loss(y1, y2, params):
    """Pure-JAX f32 reference (PyTorch semantics) for a correctness check."""
    n = y1.shape[0]
    x1 = y1.reshape(n, -1).astype(jnp.float32)
    x2 = y2.reshape(n, -1).astype(jnp.float32)
    w0, w1, g1, b1, w2, g2, b2, w3 = params

    def bn(x, gamma, beta):
        mu = jnp.mean(x, axis=0, keepdims=True)
        var = jnp.mean((x - mu) ** 2, axis=0, keepdims=True)
        return gamma * (x - mu) * lax.rsqrt(var + BN_EPS) + beta

    def bn_na(x):
        mu = jnp.mean(x, axis=0, keepdims=True)
        var = jnp.mean((x - mu) ** 2, axis=0, keepdims=True)
        return (x - mu) * lax.rsqrt(var + BN_EPS)

    def branch(x):
        f = x @ w0
        h = jnp.maximum(bn(f @ w1, g1, b1), 0.0)
        h = jnp.maximum(bn(h @ w2, g2, b2), 0.0)
        return h @ w3

    z1, z2 = branch(x1), branch(x2)
    c = bn_na(z1).T @ bn_na(z2) / CORR_DIV
    diag = jnp.diagonal(c)
    on = jnp.sum((diag - 1.0) ** 2) * LOSS_SCALE
    off = (jnp.sum(c ** 2) - jnp.sum(diag ** 2)) * LOSS_SCALE
    return on + LAMBDA * off


def init_params(key, feat_in, dim):
    """Deterministic parameter init (shapes follow the module, scaled down)."""
    ks = jax.random.split(key, 8)
    scale0 = 1.0 / jnp.sqrt(feat_in)
    scale = 1.0 / jnp.sqrt(dim)
    w0 = jax.random.normal(ks[0], (feat_in, dim), jnp.float32) * scale0
    w1 = jax.random.normal(ks[1], (dim, dim), jnp.float32) * scale
    w2 = jax.random.normal(ks[2], (dim, dim), jnp.float32) * scale
    w3 = jax.random.normal(ks[3], (dim, dim), jnp.float32) * scale
    g1 = 1.0 + 0.1 * jax.random.normal(ks[4], (1, dim), jnp.float32)
    b1 = 0.1 * jax.random.normal(ks[5], (1, dim), jnp.float32)
    g2 = 1.0 + 0.1 * jax.random.normal(ks[6], (1, dim), jnp.float32)
    b2 = 0.1 * jax.random.normal(ks[7], (1, dim), jnp.float32)
    return (w0, w1, g1, b1, w2, g2, b2, w3)


if __name__ == "__main__":
    # Small shapes consistent with the module's forward:
    #   images NCHW -> backbone features [N, D] -> projector [N, D] -> loss.
    # (The original uses D=2048; we scale to D=256 for a small demo.)
    N, C, H, W = 8, 4, 16, 16
    D = 256
    FEAT_IN = C * H * W

    key = jax.random.PRNGKey(0)
    k_y1, k_y2, k_p = jax.random.split(key, 3)
    y1 = jax.random.normal(k_y1, (N, C, H, W), jnp.float32)
    y2 = jax.random.normal(k_y2, (N, C, H, W), jnp.float32)
    params = init_params(k_p, FEAT_IN, D)

    loss = barlow_twins_loss(y1, y2, params)
    jax.block_until_ready(loss)

    ref = reference_loss(y1, y2, params)
    jax.block_until_ready(ref)
    assert jnp.allclose(loss, ref, rtol=5e-2, atol=1e-3), (loss, ref)

    print("KERNEL_OK")
</pallas_src>

<mosaic_0001>
module attributes {stable_mosaic.version = 11 : i64} {
  func.func @barlow_kernel(%arg0: memref<16x1024xbf16, #tpu.memory_space<vmem>>, %arg1: memref<1024x256xbf16, #tpu.memory_space<vmem>>, %arg2: memref<256x256xbf16, #tpu.memory_space<vmem>>, %arg3: memref<1x256xf32, #tpu.memory_space<vmem>>, %arg4: memref<1x256xf32, #tpu.memory_space<vmem>>, %arg5: memref<256x256xbf16, #tpu.memory_space<vmem>>, %arg6: memref<1x256xf32, #tpu.memory_space<vmem>>, %arg7: memref<1x256xf32, #tpu.memory_space<vmem>>, %arg8: memref<256x256xbf16, #tpu.memory_space<vmem>>, %arg9: memref<1x1xf32, #tpu.memory_space<vmem>>) attributes {dimension_semantics = [], scalar_prefetch = 0 : i64, scratch_operands = 0 : i64, tpu.core_type = #tpu.core_type<tc>} {
    %c0 = arith.constant 0 : index
    %c0_0 = arith.constant 0 : index
    %0 = vector.load %arg0[%c0, %c0_0] : memref<16x1024xbf16, #tpu.memory_space<vmem>>, vector<16x1024xbf16>
    %c0_1 = arith.constant 0 : index
    %c0_2 = arith.constant 0 : index
    %1 = vector.load %arg1[%c0_1, %c0_2] : memref<1024x256xbf16, #tpu.memory_space<vmem>>, vector<1024x256xbf16>
    %c0_3 = arith.constant 0 : index
    %c0_4 = arith.constant 0 : index
    %2 = vector.load %arg2[%c0_3, %c0_4] : memref<256x256xbf16, #tpu.memory_space<vmem>>, vector<256x256xbf16>
    %c0_5 = arith.constant 0 : index
    %c0_6 = arith.constant 0 : index
    %3 = vector.load %arg5[%c0_5, %c0_6] : memref<256x256xbf16, #tpu.memory_space<vmem>>, vector<256x256xbf16>
    %c0_7 = arith.constant 0 : index
    %c0_8 = arith.constant 0 : index
    %4 = vector.load %arg8[%c0_7, %c0_8] : memref<256x256xbf16, #tpu.memory_space<vmem>>, vector<256x256xbf16>
    %c0_9 = arith.constant 0 : index
    %c0_10 = arith.constant 0 : index
    %5 = vector.load %arg3[%c0_9, %c0_10] : memref<1x256xf32, #tpu.memory_space<vmem>>, vector<1x256xf32>
    %c0_11 = arith.constant 0 : index
    %c0_12 = arith.constant 0 : index
    %6 = vector.load %arg4[%c0_11, %c0_12] : memref<1x256xf32, #tpu.memory_space<vmem>>, vector<1x256xf32>
    %c0_13 = arith.constant 0 : index
    %c0_14 = arith.constant 0 : index
    %7 = vector.load %arg6[%c0_13, %c0_14] : memref<1x256xf32, #tpu.memory_space<vmem>>, vector<1x256xf32>
    %c0_15 = arith.constant 0 : index
    %c0_16 = arith.constant 0 : index
    %8 = vector.load %arg7[%c0_15, %c0_16] : memref<1x256xf32, #tpu.memory_space<vmem>>, vector<1x256xf32>
    %cst = arith.constant dense<0.000000e+00> : vector<16x256xf32>
    %9 = tpu.matmul %0, %1, %cst {dimension_numbers = #tpu.dot_dimension_numbers<[1], [0], [0], [1], [0, 0, 1, 1], [], []>} : vector<16x1024xbf16>, vector<1024x256xbf16>, vector<16x256xf32> -> vector<16x256xf32>
    %10 = arith.truncf %9 : vector<16x256xf32> to vector<16x256xbf16>
    %cst_17 = arith.constant dense<0.000000e+00> : vector<16x256xf32>
    %11 = tpu.matmul %10, %2, %cst_17 {dimension_numbers = #tpu.dot_dimension_numbers<[1], [0], [0], [1], [0, 0, 1, 1], [], []>} : vector<16x256xbf16>, vector<256x256xbf16>, vector<16x256xf32> -> vector<16x256xf32>
    %12 = vector.extract_strided_slice %11 {offsets = [0, 0], sizes = [8, 256], strides = [1, 1]} : vector<16x256xf32> to vector<8x256xf32>
    %cst_18 = arith.constant dense<0.000000e+00> : vector<256xf32>
    %13 = vector.multi_reduction <add>, %12, %cst_18 [0] : vector<8x256xf32> to vector<256xf32>
    %14 = vector.shape_cast %13 : vector<256xf32> to vector<1x256xf32>
    %cst_19 = arith.constant 8.000000e+00 : f32
    %15 = vector.broadcast %cst_19 : f32 to vector<1x256xf32>
    %16 = arith.divf %14, %15 : vector<1x256xf32>
    %17 = arith.mulf %12, %12 : vector<8x256xf32>
    %cst_20 = arith.constant dense<0.000000e+00> : vector<256xf32>
    %18 = vector.multi_reduction <add>, %17, %cst_20 [0] : vector<8x256xf32> to vector<256xf32>
    %19 = vector.shape_cast %18 : vector<256xf32> to vector<1x256xf32>
    %cst_21 = arith.constant 8.000000e+00 : f32
    %20 = vector.broadcast %cst_21 : f32 to vector<1x256xf32>
    %21 = arith.divf %19, %20 : vector<1x256xf32>
    %22 = arith.mulf %16, %16 : vector<1x256xf32>
    %23 = arith.subf %21, %22 : vector<1x256xf32>
    %cst_22 = arith.constant 9.99999974E-6 : f32
    %24 = vector.broadcast %cst_22 : f32 to vector<1x256xf32>
    %25 = arith.addf %23, %24 : vector<1x256xf32>
    %26 = math.rsqrt %25 : vector<1x256xf32>
    %27 = arith.mulf %5, %26 : vector<1x256xf32>
    %28 = arith.mulf %16, %27 : vector<1x256xf32>
    %29 = arith.subf %6, %28 : vector<1x256xf32>
    %30 = vector.broadcast %27 : vector<1x256xf32> to vector<8x256xf32>
    %31 = arith.mulf %12, %30 : vector<8x256xf32>
    %32 = vector.broadcast %29 : vector<1x256xf32> to vector<8x256xf32>
    %33 = arith.addf %31, %32 : vector<8x256xf32>
    %cst_23 = arith.constant 0.000000e+00 : f32
    %34 = vector.broadcast %cst_23 : f32 to vector<8x256xf32>
    %35 = arith.maximumf %33, %34 : vector<8x256xf32>
    %36 = vector.extract_strided_slice %11 {offsets = [8, 0], sizes = [8, 256], strides = [1, 1]} : vector<16x256xf32> to vector<8x256xf32>
    %cst_24 = arith.constant dense<0.000000e+00> : vector<256xf32>
    %37 = vector.multi_reduction <add>, %36, %cst_24 [0] : vector<8x256xf32> to vector<256xf32>
    %38 = vector.shape_cast %37 : vector<256xf32> to vector<1x256xf32>
    %cst_25 = arith.constant 8.000000e+00 : f32
    %39 = vector.broadcast %cst_25 : f32 to vector<1x256xf32>
    %40 = arith.divf %38, %39 : vector<1x256xf32>
    %41 = arith.mulf %36, %36 : vector<8x256xf32>
    %cst_26 = arith.constant dense<0.000000e+00> : vector<256xf32>
    %42 = vector.multi_reduction <add>, %41, %cst_26 [0] : vector<8x256xf32> to vector<256xf32>
    %43 = vector.shape_cast %42 : vector<256xf32> to vector<1x256xf32>
    %cst_27 = arith.constant 8.000000e+00 : f32
    %44 = vector.broadcast %cst_27 : f32 to vector<1x256xf32>
    %45 = arith.divf %43, %44 : vector<1x256xf32>
    %46 = arith.mulf %40, %40 : vector<1x256xf32>
    %47 = arith.subf %45, %46 : vector<1x256xf32>
    %cst_28 = arith.constant 9.99999974E-6 : f32
    %48 = vector.broadcast %cst_28 : f32 to vector<1x256xf32>
    %49 = arith.addf %47, %48 : vector<1x256xf32>
    %50 = math.rsqrt %49 : vector<1x256xf32>
    %51 = arith.mulf %5, %50 : vector<1x256xf32>
    %52 = arith.mulf %40, %51 : vector<1x256xf32>
    %53 = arith.subf %6, %52 : vector<1x256xf32>
    %54 = vector.broadcast %51 : vector<1x256xf32> to vector<8x256xf32>
    %55 = arith.mulf %36, %54 : vector<8x256xf32>
    %56 = vector.broadcast %53 : vector<1x256xf32> to vector<8x256xf32>
    %57 = arith.addf %55, %56 : vector<8x256xf32>
    %cst_29 = arith.constant 0.000000e+00 : f32
    %58 = vector.broadcast %cst_29 : f32 to vector<8x256xf32>
    %59 = arith.maximumf %57, %58 : vector<8x256xf32>
    %60 = tpu.concatenate %35, %59 in 0 : vector<8x256xf32>, vector<8x256xf32> -> vector<16x256xf32>
    %61 = arith.truncf %60 : vector<16x256xf32> to vector<16x256xbf16>
    %cst_30 = arith.constant dense<0.000000e+00> : vector<16x256xf32>
    %62 = tpu.matmul %61, %3, %cst_30 {dimension_numbers = #tpu.dot_dimension_numbers<[1], [0], [0], [1], [0, 0, 1, 1], [], []>} : vector<16x256xbf16>, vector<256x256xbf16>, vector<16x256xf32> -> vector<16x256xf32>
    %63 = vector.extract_strided_slice %62 {offsets = [0, 0], sizes = [8, 256], strides = [1, 1]} : vector<16x256xf32> to vector<8x256xf32>
    %cst_31 = arith.constant dense<0.000000e+00> : vector<256xf32>
    %64 = vector.multi_reduction <add>, %63, %cst_31 [0] : vector<8x256xf32> to vector<256xf32>
    %65 = vector.shape_cast %64 : vector<256xf32> to vector<1x256xf32>
    %cst_32 = arith.constant 8.000000e+00 : f32
    %66 = vector.broadcast %cst_32 : f32 to vector<1x256xf32>
    %67 = arith.divf %65, %66 : vector<1x256xf32>
    %68 = arith.mulf %63, %63 : vector<8x256xf32>
    %cst_33 = arith.constant dense<0.000000e+00> : vector<256xf32>
    %69 = vector.multi_reduction <add>, %68, %cst_33 [0] : vector<8x256xf32> to vector<256xf32>
    %70 = vector.shape_cast %69 : vector<256xf32> to vector<1x256xf32>
    %cst_34 = arith.constant 8.000000e+00 : f32
    %71 = vector.broadcast %cst_34 : f32 to vector<1x256xf32>
    %72 = arith.divf %70, %71 : vector<1x256xf32>
    %73 = arith.mulf %67, %67 : vector<1x256xf32>
    %74 = arith.subf %72, %73 : vector<1x256xf32>
    %cst_35 = arith.constant 9.99999974E-6 : f32
    %75 = vector.broadcast %cst_35 : f32 to vector<1x256xf32>
    %76 = arith.addf %74, %75 : vector<1x256xf32>
    %77 = math.rsqrt %76 : vector<1x256xf32>
    %78 = arith.mulf %7, %77 : vector<1x256xf32>
    %79 = arith.mulf %67, %78 : vector<1x256xf32>
    %80 = arith.subf %8, %79 : vector<1x256xf32>
    %81 = vector.broadcast %78 : vector<1x256xf32> to vector<8x256xf32>
    %82 = arith.mulf %63, %81 : vector<8x256xf32>
    %83 = vector.broadcast %80 : vector<1x256xf32> to vector<8x256xf32>
    %84 = arith.addf %82, %83 : vector<8x256xf32>
    %cst_36 = arith.constant 0.000000e+00 : f32
    %85 = vector.broadcast %cst_36 : f32 to vector<8x256xf32>
    %86 = arith.maximumf %84, %85 : vector<8x256xf32>
    %87 = vector.extract_strided_slice %62 {offsets = [8, 0], sizes = [8, 256], strides = [1, 1]} : vector<16x256xf32> to vector<8x256xf32>
    %cst_37 = arith.constant dense<0.000000e+00> : vector<256xf32>
    %88 = vector.multi_reduction <add>, %87, %cst_37 [0] : vector<8x256xf32> to vector<256xf32>
    %89 = vector.shape_cast %88 : vector<256xf32> to vector<1x256xf32>
    %cst_38 = arith.constant 8.000000e+00 : f32
    %90 = vector.broadcast %cst_38 : f32 to vector<1x256xf32>
    %91 = arith.divf %89, %90 : vector<1x256xf32>
    %92 = arith.mulf %87, %87 : vector<8x256xf32>
    %cst_39 = arith.constant dense<0.000000e+00> : vector<256xf32>
    %93 = vector.multi_reduction <add>, %92, %cst_39 [0] : vector<8x256xf32> to vector<256xf32>
    %94 = vector.shape_cast %93 : vector<256xf32> to vector<1x256xf32>
    %cst_40 = arith.constant 8.000000e+00 : f32
    %95 = vector.broadcast %cst_40 : f32 to vector<1x256xf32>
    %96 = arith.divf %94, %95 : vector<1x256xf32>
    %97 = arith.mulf %91, %91 : vector<1x256xf32>
    %98 = arith.subf %96, %97 : vector<1x256xf32>
    %cst_41 = arith.constant 9.99999974E-6 : f32
    %99 = vector.broadcast %cst_41 : f32 to vector<1x256xf32>
    %100 = arith.addf %98, %99 : vector<1x256xf32>
    %101 = math.rsqrt %100 : vector<1x256xf32>
    %102 = arith.mulf %7, %101 : vector<1x256xf32>
    %103 = arith.mulf %91, %102 : vector<1x256xf32>
    %104 = arith.subf %8, %103 : vector<1x256xf32>
    %105 = vector.broadcast %102 : vector<1x256xf32> to vector<8x256xf32>
    %106 = arith.mulf %87, %105 : vector<8x256xf32>
    %107 = vector.broadcast %104 : vector<1x256xf32> to vector<8x256xf32>
    %108 = arith.addf %106, %107 : vector<8x256xf32>
    %cst_42 = arith.constant 0.000000e+00 : f32
    %109 = vector.broadcast %cst_42 : f32 to vector<8x256xf32>
    %110 = arith.maximumf %108, %109 : vector<8x256xf32>
    %111 = tpu.concatenate %86, %110 in 0 : vector<8x256xf32>, vector<8x256xf32> -> vector<16x256xf32>
    %112 = arith.truncf %111 : vector<16x256xf32> to vector<16x256xbf16>
    %cst_43 = arith.constant dense<0.000000e+00> : vector<16x256xf32>
    %113 = tpu.matmul %112, %4, %cst_43 {dimension_numbers = #tpu.dot_dimension_numbers<[1], [0], [0], [1], [0, 0, 1, 1], [], []>} : vector<16x256xbf16>, vector<256x256xbf16>, vector<16x256xf32> -> vector<16x256xf32>
    %114 = vector.extract_strided_slice %113 {offsets = [0, 0], sizes = [8, 256], strides = [1, 1]} : vector<16x256xf32> to vector<8x256xf32>
    %cst_44 = arith.constant dense<0.000000e+00> : vector<256xf32>
    %115 = vector.multi_reduction <add>, %114, %cst_44 [0] : vector<8x256xf32> to vector<256xf32>
    %116 = vector.shape_cast %115 : vector<256xf32> to vector<1x256xf32>
    %cst_45 = arith.constant 8.000000e+00 : f32
    %117 = vector.broadcast %cst_45 : f32 to vector<1x256xf32>
    %118 = arith.divf %116, %117 : vector<1x256xf32>
    %119 = arith.mulf %114, %114 : vector<8x256xf32>
    %cst_46 = arith.constant dense<0.000000e+00> : vector<256xf32>
    %120 = vector.multi_reduction <add>, %119, %cst_46 [0] : vector<8x256xf32> to vector<256xf32>
    %121 = vector.shape_cast %120 : vector<256xf32> to vector<1x256xf32>
    %cst_47 = arith.constant 8.000000e+00 : f32
    %122 = vector.broadcast %cst_47 : f32 to vector<1x256xf32>
    %123 = arith.divf %121, %122 : vector<1x256xf32>
    %124 = arith.mulf %118, %118 : vector<1x256xf32>
    %125 = arith.subf %123, %124 : vector<1x256xf32>
    %cst_48 = arith.constant 9.99999974E-6 : f32
    %126 = vector.broadcast %cst_48 : f32 to vector<1x256xf32>
    %127 = arith.addf %125, %126 : vector<1x256xf32>
    %128 = math.rsqrt %127 : vector<1x256xf32>
    %129 = vector.broadcast %128 : vector<1x256xf32> to vector<8x256xf32>
    %130 = arith.mulf %114, %129 : vector<8x256xf32>
    %131 = arith.mulf %118, %128 : vector<1x256xf32>
    %132 = vector.broadcast %131 : vector<1x256xf32> to vector<8x256xf32>
    %133 = arith.subf %130, %132 : vector<8x256xf32>
    %134 = vector.extract_strided_slice %113 {offsets = [8, 0], sizes = [8, 256], strides = [1, 1]} : vector<16x256xf32> to vector<8x256xf32>
    %cst_49 = arith.constant dense<0.000000e+00> : vector<256xf32>
    %135 = vector.multi_reduction <add>, %134, %cst_49 [0] : vector<8x256xf32> to vector<256xf32>
    %136 = vector.shape_cast %135 : vector<256xf32> to vector<1x256xf32>
    %cst_50 = arith.constant 8.000000e+00 : f32
    %137 = vector.broadcast %cst_50 : f32 to vector<1x256xf32>
    %138 = arith.divf %136, %137 : vector<1x256xf32>
    %139 = arith.mulf %134, %134 : vector<8x256xf32>
    %cst_51 = arith.constant dense<0.000000e+00> : vector<256xf32>
    %140 = vector.multi_reduction <add>, %139, %cst_51 [0] : vector<8x256xf32> to vector<256xf32>
    %141 = vector.shape_cast %140 : vector<256xf32> to vector<1x256xf32>
    %cst_52 = arith.constant 8.000000e+00 : f32
    %142 = vector.broadcast %cst_52 : f32 to vector<1x256xf32>
    %143 = arith.divf %141, %142 : vector<1x256xf32>
    %144 = arith.mulf %138, %138 : vector<1x256xf32>
    %145 = arith.subf %143, %144 : vector<1x256xf32>
    %cst_53 = arith.constant 9.99999974E-6 : f32
    %146 = vector.broadcast %cst_53 : f32 to vector<1x256xf32>
    %147 = arith.addf %145, %146 : vector<1x256xf32>
    %148 = math.rsqrt %147 : vector<1x256xf32>
    %149 = vector.broadcast %148 : vector<1x256xf32> to vector<8x256xf32>
    %150 = arith.mulf %134, %149 : vector<8x256xf32>
    %151 = arith.mulf %138, %148 : vector<1x256xf32>
    %152 = vector.broadcast %151 : vector<1x256xf32> to vector<8x256xf32>
    %153 = arith.subf %150, %152 : vector<8x256xf32>
    %cst_54 = arith.constant dense<0.000000e+00> : vector<256x256xf32>
    %154 = tpu.matmul %133, %153, %cst_54 {dimension_numbers = #tpu.dot_dimension_numbers<[0], [0], [1], [1], [0, 1, 1, 1], [], []>} : vector<8x256xf32>, vector<8x256xf32>, vector<256x256xf32> -> vector<256x256xf32>
    %cst_55 = arith.constant 9.765625E-4 : f32
    %155 = vector.broadcast %cst_55 : f32 to vector<256x256xf32>
    %156 = arith.mulf %154, %155 : vector<256x256xf32>
    %157 = arith.mulf %133, %153 : vector<8x256xf32>
    %cst_56 = arith.constant dense<0.000000e+00> : vector<256xf32>
    %158 = vector.multi_reduction <add>, %157, %cst_56 [0] : vector<8x256xf32> to vector<256xf32>
    %159 = vector.shape_cast %158 : vector<256xf32> to vector<1x256xf32>
    %cst_57 = arith.constant 9.765625E-4 : f32
    %160 = vector.broadcast %cst_57 : f32 to vector<1x256xf32>
    %161 = arith.mulf %159, %160 : vector<1x256xf32>
    %cst_58 = arith.constant 1.000000e+00 : f32
    %162 = vector.broadcast %cst_58 : f32 to vector<1x256xf32>
    %163 = arith.subf %161, %162 : vector<1x256xf32>
    %164 = arith.mulf %163, %163 : vector<1x256xf32>
    %165 = vector.shape_cast %164 : vector<1x256xf32> to vector<1x1x256xf32>
    %cst_59 = arith.constant dense<0.000000e+00> : vector<1xf32>
    %166 = vector.multi_reduction <add>, %165, %cst_59 [1, 2] : vector<1x1x256xf32> to vector<1xf32>
    %167 = vector.shape_cast %166 : vector<1xf32> to vector<1x1x1xf32>
    %168 = vector.extract %167[0, 0, 0] : f32 from vector<1x1x1xf32>
    %169 = vector.broadcast %168 : f32 to vector<1x1xf32>
    %170 = arith.mulf %156, %156 : vector<256x256xf32>
    %171 = vector.shape_cast %170 : vector<256x256xf32> to vector<1x256x256xf32>
    %cst_60 = arith.constant dense<0.000000e+00> : vector<1xf32>
    %172 = vector.multi_reduction <add>, %171, %cst_60 [1, 2] : vector<1x256x256xf32> to vector<1xf32>
    %173 = vector.shape_cast %172 : vector<1xf32> to vector<1x1x1xf32>
    %174 = vector.extract %173[0, 0, 0] : f32 from vector<1x1x1xf32>
    %175 = vector.broadcast %174 : f32 to vector<1x1xf32>
    %176 = arith.mulf %161, %161 : vector<1x256xf32>
    %177 = vector.shape_cast %176 : vector<1x256xf32> to vector<1x1x256xf32>
    %cst_61 = arith.constant dense<0.000000e+00> : vector<1xf32>
    %178 = vector.multi_reduction <add>, %177, %cst_61 [1, 2] : vector<1x1x256xf32> to vector<1xf32>
    %179 = vector.shape_cast %178 : vector<1xf32> to vector<1x1x1xf32>
    %180 = vector.extract %179[0, 0, 0] : f32 from vector<1x1x1xf32>
    %181 = vector.broadcast %180 : f32 to vector<1x1xf32>
    %182 = arith.subf %175, %181 : vector<1x1xf32>
    %cst_62 = arith.constant 3.900000e-03 : f32
    %183 = vector.broadcast %cst_62 : f32 to vector<1x1xf32>
    %184 = arith.mulf %183, %182 : vector<1x1xf32>
    %185 = arith.addf %169, %184 : vector<1x1xf32>
    %cst_63 = arith.constant 3.125000e-02 : f32
    %186 = vector.broadcast %cst_63 : f32 to vector<1x1xf32>
    %187 = arith.mulf %185, %186 : vector<1x1xf32>
    %c0_64 = arith.constant 0 : index
    %c0_65 = arith.constant 0 : index
    %188 = vector.load %arg9[%c0_64, %c0_65] : memref<1x1xf32, #tpu.memory_space<vmem>>, vector<1x1xf32>
    tpu.vector_store %arg9[%c0_64, %c0_65], %187 {strides = array<i32>} : memref<1x1xf32, #tpu.memory_space<vmem>>, vector<1x1xf32>,
    return
  }
}

</mosaic_0001>

<bundles_post_ra>
// kernel: tpu_custom_call.1
= control target key start
LH: loop header
LB: loop body
LE: loop exit
PB: predicated region body
PF: predicated region fallthrough
CT: control target
= control target key end

     0   :  { %14 = vsyncpa [#allocation3], 0  ;;  %s4977_s0 = inlined_call_operand.hbm [shape: bf16[16,1024], index: 0, kind: input, shape index: {}]   ;;  %s4978_s1 = inlined_call_operand.hbm [shape: bf16[1024,256], index: 1, kind: input, shape index: {}]   ;;  %s4979_s2 = inlined_call_operand.hbm [shape: bf16[256,256], index: 2, kind: input, shape index: {}]   ;;  %s4980_s3 = inlined_call_operand.vmem [shape: f32[1,256], index: 3, kind: input, shape index: {}]   ;;  %s4981_s4 = inlined_call_operand.hbm [shape: f32[1,256], index: 4, kind: input, shape index: {}]   ;;  %s4982_s5 = inlined_call_operand.hbm [shape: bf16[256,256], index: 5, kind: input, shape index: {}]   ;;  %s4983_s6 = inlined_call_operand.vmem [shape: f32[1,256], index: 6, kind: input, shape index: {}]   ;;  %s4984_s7 = inlined_call_operand.vmem [shape: f32[1,256], index: 7, kind: input, shape index: {}]   ;;  %s4985_s8 = inlined_call_operand.hbm [shape: bf16[256,256], index: 8, kind: input, shape index: {}]   ;;  %s4986_s9 = inlined_call_operand.hbm [shape: f32[1,1], index: 9, kind: output, shape index: {}]  }
   0x1   :  { %15 = vsyncpa [#allocation6], 0 }
   0x2   :  { %16 = vsyncpa [#allocation9], 0 }
   0x3   :  { %17 = vsyncpa [#allocation12], 0  ;;  %s36_s11 = sshll.u32 %s4978_s1, 4  ;;  %s37_s11 = int_to_ptr.hbm [resolvable:$true] %s36_s11 }
   0x4   :  { %18 = vsyncpa [#allocation4], 0  ;;  %s4508_s12 = smov [#allocation5]   ;;  %s65_s16 = sshll.u32 %s4981_s4, 4  ;;  %s66_s16 = int_to_ptr.hbm [resolvable:$true] %s65_s16 }
   0x5   :  { %s38_s13 = sshll.u32 %s4508_s12, 4  ;;  %s4509_s17 = smov 128   ;;  %s39_s13 = int_to_ptr.vmem [resolvable:$true] %s38_s13 }
   0x6   :  { %s4510_s18 = smov 8   ;;  %s4511_s19 = smov [#allocation8]  }
   0x7   :  { %44 = dma.hbm_to_vmem [thread:$0]  %s37_s11, 16384, %s39_s13, [#allocation6], %s4509_s17, %s4509_s17, %s4510_s18  }
   0x8   :  { %s67_s20 = sshll.u32 %s4511_s19, 4  ;;  %s23_s22 = sshll.u32 %s4977_s0, 4  ;;  %s68_s20 = int_to_ptr.vmem [resolvable:$true] %s67_s20  ;;  %s24_s22 = int_to_ptr.hbm [resolvable:$true] %s23_s22 }
   0x9   :  { %70 = dma.hbm_to_vmem [thread:$0]  %s66_s16, 32, %s68_s20, [#allocation9]  }
   0xa   :  { %s4512_s23 = smov [#allocation2]   ;;  %s49_s26 = sshll.u32 %s4979_s2, 4  ;;  %s50_s26 = int_to_ptr.hbm [resolvable:$true] %s49_s26 }
   0xb   :  { %s25_s24 = sshll.u32 %s4512_s23, 4  ;;  %s4513_s27 = smov 512   ;;  %s26_s24 = int_to_ptr.vmem [resolvable:$true] %s25_s24 }
   0xc   :  { %s4514_s28 = smov 32   ;;  %s4515_s29 = smov [#allocation7]  }
   0xd   :  { %31 = dma.hbm_to_vmem [thread:$0]  %s24_s22, 1024, %s26_s24, [#allocation3], %s4513_s27, %s4513_s27, %s4514_s28  }
   0xe   :  { %s51_s30 = sshll.u32 %s4515_s29, 4  ;;  %s75_s0 = sshll.u32 %s4982_s5, 4  ;;  %s52_s30 = int_to_ptr.vmem [resolvable:$true] %s51_s30  ;;  %s76_s0 = int_to_ptr.hbm [resolvable:$true] %s75_s0 }
   0xf   :  { %57 = dma.hbm_to_vmem [thread:$0]  %s50_s26, 4096, %s52_s30, [#allocation6], %s4509_s17, %s4509_s17, %s4510_s18  }
  0x10   :  { %s92_s2 = sshll.u32 %s4985_s8, 4  ;;  %s4516_s14 = smov [#allocation10]   ;;  %s93_s2 = int_to_ptr.hbm [resolvable:$true] %s92_s2 }
  0x11   :  { %s77_s15 = sshll.u32 %s4516_s14, 4  ;;  %s4517_s16 = smov [#allocation11]   ;;  %s78_s15 = int_to_ptr.vmem [resolvable:$true] %s77_s15 }
  0x12   :  { %83 = dma.hbm_to_vmem [thread:$0]  %s76_s0, 4096, %s78_s15, [#allocation9], %s4509_s17, %s4509_s17, %s4510_s18  }
  0x13   :  { %s94_s5 = sshll.u32 %s4517_s16, 4  ;;  %s95_s5 = int_to_ptr.vmem [resolvable:$true] %s94_s5 }
  0x14   :  { %100 = dma.hbm_to_vmem [thread:$0]  %s93_s2, 4096, %s95_s5, [#allocation12], %s4509_s17, %s4509_s17, %s4510_s18  }
  0x15   :  { %4498 = dma.done.wait [#allocation3], 1024  }
  0x16   :  { %4499 = vsyncadd [#allocation3], 4294966272 }
  0x17   :  { %4500 = dma.done.wait [#allocation6], 20480  }
  0x18   :  { %4501 = vsyncadd [#allocation6], 4294946816 }
  0x19   :  { %4502 = dma.done.wait [#allocation9], 4128  }
  0x1a   :  { %4503 = vsyncadd [#allocation9], 4294963168 }
  0x1b   :  { %4504 = dma.done.wait [#allocation12], 4096  }
  0x1c   :  { %4505 = vsyncadd [#allocation12], 4294963200  ;;  %v3147_v0 = vld [vmem:[#allocation5 + $0x70] sm:$0xf]  ;;  %v4074_v1 = vld [vmem:[#allocation5 + $0x74] sm:$0xf0] }
  0x1d   :  { %v3211_v2 = vld [vmem:[#allocation5 + $0xf0] sm:$0xf]  ;;  %v3148_v3 = vor.u32 %v4074_v1, %v3147_v0  ;;  %v4090_v4 = vld [vmem:[#allocation5 + $0xf4] sm:$0xf0]  ;;  %v3139_v11 = vld [vmem:[#allocation5 + $0x60] sm:$0xf] }
  0x1e   :  { %v3275_v5 = vld [vmem:[#allocation5 + $0x170] sm:$0xf]  ;;  %v4106_v6 = vld [vmem:[#allocation5 + $0x174] sm:$0xf0]  ;;  %v3212_v7 = vor.u32 %v4090_v4, %v3211_v2  ;;  %v4072_v13 = vld [vmem:[#allocation5 + $0x64] sm:$0xf0] }
  0x1f   :  { %v3276_v8 = vor.u32 %v4106_v6, %v3275_v5  ;;  %v3339_v9 = vld [vmem:[#allocation5 + $0x1f0] sm:$0xf]  ;;  %v4122_v10 = vld [vmem:[#allocation5 + $0x1f4] sm:$0xf0]  ;;  %1041 = vmatpush.bf16.msra.mxu0 %v3148_v3  ;;  %v3203_v14 = vld [vmem:[#allocation5 + $0xe0] sm:$0xf]  ;;  %v3140_v16 = vor.u32 %v4072_v13, %v3139_v11 }
  0x20   :  { %v3340_v12 = vor.u32 %v4122_v10, %v3339_v9  ;;  %v4088_v15 = vld [vmem:[#allocation5 + $0xe4] sm:$0xf0]  ;;  %1055 = vmatpush.bf16.msra.mxu1 %v3212_v7  ;;  %v3267_v18 = vld [vmem:[#allocation5 + $0x160] sm:$0xf]  ;;  %v3131_v23 = vld [vmem:[#allocation5 + $0x50] sm:$0xf] }
  0x21   :  { %1069 = vmatpush.bf16.msra.mxu2 %v3276_v8  ;;  %v3204_v17 = vor.u32 %v4088_v15, %v3203_v14  ;;  %v4104_v19 = vld [vmem:[#allocation5 + $0x164] sm:$0xf0]  ;;  %v3331_v20 = vld [vmem:[#allocation5 + $0x1e0] sm:$0xf]  ;;  %v4070_v24 = vld [vmem:[#allocation5 + $0x54] sm:$0xf0] }
  0x22   :  { %1083 = vmatpush.bf16.msra.mxu3 %v3340_v12  ;;  %v3268_v21 = vor.u32 %v4104_v19, %v3267_v18  ;;  %v4120_v22 = vld [vmem:[#allocation5 + $0x1e4] sm:$0xf0]  ;;  %v3195_v26 = vld [vmem:[#allocation5 + $0xd0] sm:$0xf]  ;;  %v4086_v27 = vld [vmem:[#allocation5 + $0xd4] sm:$0xf0]  ;;  %v3132_v29 = vor.u32 %v4070_v24, %v3131_v23 }
  0x23   :  { %v3332_v25 = vor.u32 %v4120_v22, %v3331_v20  ;;  %v3259_v28 = vld [vmem:[#allocation5 + $0x150] sm:$0xf]  ;;  %1042 = vmatpush.bf16.msra.mxu0 %v3140_v16  ;;  %v4102_v30 = vld [vmem:[#allocation5 + $0x154] sm:$0xf0]  ;;  %v3196_v33 = vor.u32 %v4086_v27, %v3195_v26  ;;  %v3123_v35 = vld [vmem:[#allocation5 + $0x40] sm:$0xf] }
  0x24   :  { %v3323_v31 = vld [vmem:[#allocation5 + $0x1d0] sm:$0xf]  ;;  %v4118_v32 = vld [vmem:[#allocation5 + $0x1d4] sm:$0xf0]  ;;  %1056 = vmatpush.bf16.msra.mxu1 %v3204_v17  ;;  %v3260_v34 = vor.u32 %v4102_v30, %v3259_v28  ;;  %v4068_v36 = vld [vmem:[#allocation5 + $0x44] sm:$0xf0] }
  0x25   :  { %1070 = vmatpush.bf16.msra.mxu2 %v3268_v21  ;;  %v3187_v37 = vld [vmem:[#allocation5 + $0xc0] sm:$0xf]  ;;  %v3324_v38 = vor.u32 %v4118_v32, %v3323_v31  ;;  %v4084_v39 = vld [vmem:[#allocation5 + $0xc4] sm:$0xf0]  ;;  %v3124_v44 = vor.u32 %v4068_v36, %v3123_v35  ;;  %v3115_v47 = vld [vmem:[#allocation5 + $0x30] sm:$0xf] }
  0x26   :  { %1084 = vmatpush.bf16.msra.mxu3 %v3332_v25  ;;  %v3251_v40 = vld [vmem:[#allocation5 + $0x140] sm:$0xf]  ;;  %v4100_v41 = vld [vmem:[#allocation5 + $0x144] sm:$0xf0]  ;;  %v3188_v45 = vor.u32 %v4084_v39, %v3187_v37  ;;  %v4066_v48 = vld [vmem:[#allocation5 + $0x34] sm:$0xf0] }
  0x27   :  { %v3315_v42 = vld [vmem:[#allocation5 + $0x1c0] sm:$0xf]  ;;  %v4116_v43 = vld [vmem:[#allocation5 + $0x1c4] sm:$0xf0]  ;;  %1043 = vmatpush.bf16.msra.mxu0 %v3132_v29  ;;  %v3252_v46 = vor.u32 %v4100_v41, %v3251_v40  ;;  %v3179_v49 = vld [vmem:[#allocation5 + $0xb0] sm:$0xf]  ;;  %v3116_v56 = vor.u32 %v4066_v48, %v3115_v47 }
  0x28   :  { %1057 = vmatpush.bf16.msra.mxu1 %v3196_v33  ;;  %v3316_v50 = vor.u32 %v4116_v43, %v3315_v42  ;;  %v4082_v51 = vld [vmem:[#allocation5 + $0xb4] sm:$0xf0]  ;;  %v3243_v52 = vld [vmem:[#allocation5 + $0x130] sm:$0xf]  ;;  %v3107_v59 = vld [vmem:[#allocation5 + $0x20] sm:$0xf] }
  0x29   :  { %1071 = vmatpush.bf16.msra.mxu2 %v3260_v34  ;;  %v4098_v53 = vld [vmem:[#allocation5 + $0x134] sm:$0xf0]  ;;  %v3307_v54 = vld [vmem:[#allocation5 + $0x1b0] sm:$0xf]  ;;  %v3180_v57 = vor.u32 %v4082_v51, %v3179_v49  ;;  %v4064_v60 = vld [vmem:[#allocation5 + $0x24] sm:$0xf0] }
  0x2a   :  { %1085 = vmatpush.bf16.msra.mxu3 %v3324_v38  ;;  %v4114_v55 = vld [vmem:[#allocation5 + $0x1b4] sm:$0xf0]  ;;  %v3244_v58 = vor.u32 %v4098_v53, %v3243_v52  ;;  %v3171_v61 = vld [vmem:[#allocation5 + $0xa0] sm:$0xf]  ;;  %v4080_v63 = vld [vmem:[#allocation5 + $0xa4] sm:$0xf0]  ;;  %v3108_v4 = vor.u32 %v4064_v60, %v3107_v59 }
  0x2b   :  { %1044 = vmatpush.bf16.msra.mxu0 %v3124_v44  ;;  %v3308_v62 = vor.u32 %v4114_v55, %v3307_v54  ;;  %v3235_v0 = vld [vmem:[#allocation5 + $0x120] sm:$0xf]  ;;  %v4096_v1 = vld [vmem:[#allocation5 + $0x124] sm:$0xf0]  ;;  %v3172_v5 = vor.u32 %v4080_v63, %v3171_v61  ;;  %v3099_v7 = vld [vmem:[#allocation5 + $0x10] sm:$0xf] }
  0x2c   :  { %1058 = vmatpush.bf16.msra.mxu1 %v3188_v45  ;;  %v3299_v2 = vld [vmem:[#allocation5 + $0x1a0] sm:$0xf]  ;;  %v4112_v3 = vld [vmem:[#allocation5 + $0x1a4] sm:$0xf0]  ;;  %v3236_v6 = vor.u32 %v4096_v1, %v3235_v0  ;;  %v4062_v8 = vld [vmem:[#allocation5 + $0x14] sm:$0xf0] }
  0x2d   :  { %1072 = vmatpush.bf16.msra.mxu2 %v3252_v46  ;;  %v3163_v9 = vld [vmem:[#allocation5 + $0x90] sm:$0xf]  ;;  %v3300_v10 = vor.u32 %v4112_v3, %v3299_v2  ;;  %v4078_v11 = vld [vmem:[#allocation5 + $0x94] sm:$0xf0]  ;;  %v3100_v16 = vor.u32 %v4062_v8, %v3099_v7  ;;  %v3091_v17 = vld [vmem:[#allocation5] sm:$0xf] }
  0x2e   :  { %1086 = vmatpush.bf16.msra.mxu3 %v3316_v50  ;;  %v3227_v12 = vld [vmem:[#allocation5 + $0x110] sm:$0xf]  ;;  %v4094_v13 = vld [vmem:[#allocation5 + $0x114] sm:$0xf0]  ;;  %v4060_v18 = vld [vmem:[#allocation5 + $0x4] sm:$0xf0]  ;;  %v3164_v19 = vor.u32 %v4078_v11, %v3163_v9 }
  0x2f   :  { %1045 = vmatpush.bf16.msra.mxu0 %v3116_v56  ;;  %v3291_v14 = vld [vmem:[#allocation5 + $0x190] sm:$0xf]  ;;  %v4110_v15 = vld [vmem:[#allocation5 + $0x194] sm:$0xf0]  ;;  %v3228_v20 = vor.u32 %v4094_v13, %v3227_v12  ;;  %v3155_v21 = vld [vmem:[#allocation5 + $0x80] sm:$0xf]  ;;  %v3092_v31 = vor.u32 %v4060_v18, %v3091_v17 }
  0x30   :  { %1059 = vmatpush.bf16.msra.mxu1 %v3180_v57  ;;  %v4076_v22 = vld [vmem:[#allocation5 + $0x84] sm:$0xf0]  ;;  %v3219_v23 = vld [vmem:[#allocation5 + $0x100] sm:$0xf]  ;;  %v3292_v24 = vor.u32 %v4110_v15, %v3291_v14  ;;  %v3403_v28 = vld [vmem:[#allocation5 + $0x270] sm:$0xf] }
  0x31   :  { %1073 = vmatpush.bf16.msra.mxu2 %v3244_v58  ;;  %v4092_v25 = vld [vmem:[#allocation5 + $0x104] sm:$0xf0]  ;;  %v3283_v26 = vld [vmem:[#allocation5 + $0x180] sm:$0xf]  ;;  %v4138_v29 = vld [vmem:[#allocation5 + $0x274] sm:$0xf0]  ;;  %v3156_v35 = vor.u32 %v4076_v22, %v3155_v21 }
  0x32   :  { %1087 = vmatpush.bf16.msra.mxu3 %v3308_v62  ;;  %v4108_v27 = vld [vmem:[#allocation5 + $0x184] sm:$0xf0]  ;;  %v3467_v30 = vld [vmem:[#allocation5 + $0x2f0] sm:$0xf]  ;;  %v4154_v32 = vld [vmem:[#allocation5 + $0x2f4] sm:$0xf0]  ;;  %v3220_v36 = vor.u32 %v4092_v25, %v3219_v23  ;;  %v3404_v40 = vor.u32 %v4138_v29, %v3403_v28 }
  0x33   :  { %1046 = vmatpush.bf16.msra.mxu0 %v3108_v4  ;;  %v3531_v33 = vld [vmem:[#allocation5 + $0x370] sm:$0xf]  ;;  %v4170_v34 = vld [vmem:[#allocation5 + $0x374] sm:$0xf0]  ;;  %v3284_v39 = vor.u32 %v4108_v27, %v3283_v26  ;;  %v3395_v41 = vld [vmem:[#allocation5 + $0x260] sm:$0xf]  ;;  %v3468_v43 = vor.u32 %v4154_v32, %v3467_v30 }
  0x34   :  { %1060 = vmatpush.bf16.msra.mxu1 %v3172_v5  ;;  %v3595_v37 = vld [vmem:[#allocation5 + $0x3f0] sm:$0xf]  ;;  %v4186_v38 = vld [vmem:[#allocation5 + $0x3f4] sm:$0xf0]  ;;  %v4136_v42 = vld [vmem:[#allocation5 + $0x264] sm:$0xf0]  ;;  %v3532_v44 = vor.u32 %v4170_v34, %v3531_v33 }
  0x35   :  { %1074 = vmatpush.bf16.msra.mxu2 %v3236_v6  ;;  %v3459_v45 = vld [vmem:[#allocation5 + $0x2e0] sm:$0xf]  ;;  %v4152_v46 = vld [vmem:[#allocation5 + $0x2e4] sm:$0xf0]  ;;  %v3596_v48 = vor.u32 %v4186_v38, %v3595_v37  ;;  %v3396_v55 = vor.u32 %v4136_v42, %v3395_v41  ;;  %v3387_v56 = vld [vmem:[#allocation5 + $0x250] sm:$0xf] }
  0x36   :  { %1088 = vmatpush.bf16.msra.mxu3 %v3300_v10  ;;  %v3523_v47 = vld [vmem:[#allocation5 + $0x360] sm:$0xf]  ;;  %v4168_v49 = vld [vmem:[#allocation5 + $0x364] sm:$0xf0]  ;;  %v4134_v57 = vld [vmem:[#allocation5 + $0x254] sm:$0xf0]  ;;  %v3460_v60 = vor.u32 %v4152_v46, %v3459_v45 }
  0x37   :  { %1047 = vmatpush.bf16.msra.mxu0 %v3100_v16  ;;  %v3587_v50 = vld [vmem:[#allocation5 + $0x3e0] sm:$0xf]  ;;  %v4184_v51 = vld [vmem:[#allocation5 + $0x3e4] sm:$0xf0]  ;;  %v3524_v61 = vor.u32 %v4168_v49, %v3523_v47  ;;  %v3451_v62 = vld [vmem:[#allocation5 + $0x2d0] sm:$0xf]  ;;  %v3388_v9 = vor.u32 %v4134_v57, %v3387_v56 }
  0x38   :  { %1061 = vmatpush.bf16.msra.mxu1 %v3164_v19  ;;  %v3059_v52 = vld [vmem:[#allocation2] sm:$0xf]  ;;  %v3067_v54 = vld [vmem:[#allocation2 + $0x8] sm:$0xf]  ;;  %v4150_v63 = vld [vmem:[#allocation5 + $0x2d4] sm:$0xf0]  ;;  %v3588_v2 = vor.u32 %v4184_v51, %v3587_v50 }
  0x39   :  { %1075 = vmatpush.bf16.msra.mxu2 %v3228_v20  ;;  %v4055_v53 = vld [vmem:[#allocation2 + $0x1c] sm:$0xf0]  ;;  %v4056_v59 = vld [vmem:[#allocation2 + $0x24] sm:$0xf0]  ;;  %v3515_v0 = vld [vmem:[#allocation5 + $0x350] sm:$0xf]  ;;  %v3452_v12 = vor.u32 %v4150_v63, %v3451_v62 }
  0x3a   :  { %1089 = vmatpush.bf16.msra.mxu3 %v3292_v24  ;;  %v4600_v58 = vor.u32 %v4055_v53, %v3059_v52  ;;  %v4602_v1 = vor.u32 %v4056_v59, %v3067_v54  ;;  %v4166_v3 = vld [vmem:[#allocation5 + $0x354] sm:$0xf0]  ;;  %v3579_v4 = vld [vmem:[#allocation5 + $0x3d0] sm:$0xf]  ;;  %v4051_v6 = vld [vmem:[#allocation2 + $0x4] sm:$0xf] }
  0x3b   :  { %1048 = vmatpush.bf16.msra.mxu0 %v3092_v31  ;;  %v4182_v5 = vld [vmem:[#allocation5 + $0x3d4] sm:$0xf0]  ;;  %v3061_v7 = vld [vmem:[#allocation2 + $0x20] sm:$0xf0]  ;;  %v4052_v8 = vld [vmem:[#allocation2 + $0xc] sm:$0xf]  ;;  %v3516_v13 = vor.u32 %v4166_v3, %v3515_v0 }
  0x3c   :  { %1062 = vmatpush.bf16.msra.mxu1 %v3156_v35  ;;  %v4606_v10 = vor.u32 %v4051_v6, %v3061_v7  ;;  %v3069_v11 = vld [vmem:[#allocation2 + $0x28] sm:$0xf0]  ;;  %v3379_v14 = vld [vmem:[#allocation5 + $0x240] sm:$0xf]  ;;  %v4132_v15 = vld [vmem:[#allocation5 + $0x244] sm:$0xf0]  ;;  %v3580_v18 = vor.u32 %v4182_v5, %v3579_v4 }
  0x3d   :  { %1076 = vmatpush.bf16.msra.mxu2 %v3220_v36  ;;  %v3443_v16 = vld [vmem:[#allocation5 + $0x2c0] sm:$0xf]  ;;  %v4608_v17 = vor.u32 %v4052_v8, %v3069_v11  ;;  %v4148_v19 = vld [vmem:[#allocation5 + $0x2c4] sm:$0xf0]  ;;  %v3380_v24 = vor.u32 %v4132_v15, %v3379_v14  ;;  %v3371_v27 = vld [vmem:[#allocation5 + $0x230] sm:$0xf] }
  0x3e   :  { %1090 = vmatpush.bf16.msra.mxu3 %v3284_v39  ;;  %1049 = vmatmul.bf16.vlgmr.msra.gmra.mxu0 %v4600_v58  ;;  %v3507_v20 = vld [vmem:[#allocation5 + $0x340] sm:$0xf]  ;;  %v4164_v21 = vld [vmem:[#allocation5 + $0x344] sm:$0xf0]  ;;  %v3444_v25 = vor.u32 %v4148_v19, %v3443_v16  ;;  %v4130_v28 = vld [vmem:[#allocation5 + $0x234] sm:$0xf0] }
  0x3f   :  { %1097 = vmatpush.bf16.msrb.mxu0 %v3404_v40  ;;  %1063 = vmatmul.bf16.vlgmr.msra.gmra.mxu1 %v4606_v10  ;;  %v3571_v22 = vld [vmem:[#allocation5 + $0x3c0] sm:$0xf]  ;;  %v4180_v23 = vld [vmem:[#allocation5 + $0x3c4] sm:$0xf0]  ;;  %v3508_v26 = vor.u32 %v4164_v21, %v3507_v20  ;;  %v3435_v29 = vld [vmem:[#allocation5 + $0x2b0] sm:$0xf]  ;;  %v3372_v36 = vor.u32 %v4130_v28, %v3371_v27 }
  0x40   :  { %1111 = vmatpush.bf16.msrb.mxu1 %v3468_v43  ;;  %1077 = vmatmul.bf16.vlgmr.msra.gmra.mxu2 %v4602_v1  ;;  %v3572_v30 = vor.u32 %v4180_v23, %v3571_v22  ;;  %v4146_v31 = vld [vmem:[#allocation5 + $0x2b4] sm:$0xf0]  ;;  %v3499_v32 = vld [vmem:[#allocation5 + $0x330] sm:$0xf]  ;;  %v3363_v39 = vld [vmem:[#allocation5 + $0x220] sm:$0xf] }
  0x41   :  { %1125 = vmatpush.bf16.msrb.mxu2 %v3532_v44  ;;  %1091 = vmatmul.bf16.vlgmr.msra.gmra.mxu3 %v4608_v17  ;;  %v4162_v33 = vld [vmem:[#allocation5 + $0x334] sm:$0xf0]  ;;  %v3563_v34 = vld [vmem:[#allocation5 + $0x3b0] sm:$0xf]  ;;  %v3436_v37 = vor.u32 %v4146_v31, %v3435_v29  ;;  %v4128_v40 = vld [vmem:[#allocation5 + $0x224] sm:$0xf0] }
  0x42   :  { %1139 = vmatpush.bf16.msrb.mxu3 %v3596_v48  ;;  %v4178_v35 = vld [vmem:[#allocation5 + $0x3b4] sm:$0xf0]  ;;  %v3500_v38 = vor.u32 %v4162_v33, %v3499_v32  ;;  %v3427_v41 = vld [vmem:[#allocation5 + $0x2a0] sm:$0xf]  ;;  %v4144_v43 = vld [vmem:[#allocation5 + $0x2a4] sm:$0xf0]  ;;  %v3364_v48 = vor.u32 %v4128_v40, %v3363_v39 }
  0x43   :  { %1098 = vmatpush.bf16.msrb.mxu0 %v3396_v55  ;;  %v3564_v42 = vor.u32 %v4178_v35, %v3563_v34  ;;  %v3491_v44 = vld [vmem:[#allocation5 + $0x320] sm:$0xf]  ;;  %v4160_v45 = vld [vmem:[#allocation5 + $0x324] sm:$0xf0]  ;;  %v3355_v49 = vld [vmem:[#allocation5 + $0x210] sm:$0xf]  ;;  %v3428_v50 = vor.u32 %v4144_v43, %v3427_v41 }
  0x44   :  { %1112 = vmatpush.bf16.msrb.mxu1 %v3460_v60  ;;  %v3555_v46 = vld [vmem:[#allocation5 + $0x3a0] sm:$0xf]  ;;  %v4176_v47 = vld [vmem:[#allocation5 + $0x3a4] sm:$0xf0]  ;;  %v3492_v51 = vor.u32 %v4160_v45, %v3491_v44  ;;  %v4126_v52 = vld [vmem:[#allocation5 + $0x214] sm:$0xf0] }
  0x45   :  { %1126 = vmatpush.bf16.msrb.mxu2 %v3524_v61  ;;  %v3419_v53 = vld [vmem:[#allocation5 + $0x290] sm:$0xf]  ;;  %v4142_v54 = vld [vmem:[#allocation5 + $0x294] sm:$0xf0]  ;;  %v3556_v55 = vor.u32 %v4176_v47, %v3555_v46  ;;  %v3347_v61 = vld [vmem:[#allocation5 + $0x200] sm:$0xf]  ;;  %v3356_v63 = vor.u32 %v4126_v52, %v3355_v49 }
  0x46   :  { %1140 = vmatpush.bf16.msrb.mxu3 %v3588_v2  ;;  %v3483_v56 = vld [vmem:[#allocation5 + $0x310] sm:$0xf]  ;;  %v4158_v57 = vld [vmem:[#allocation5 + $0x314] sm:$0xf0]  ;;  %v4124_v62 = vld [vmem:[#allocation5 + $0x204] sm:$0xf0]  ;;  %v3420_v5 = vor.u32 %v4142_v54, %v3419_v53 }
  0x47   :  { %1099 = vmatpush.bf16.msrb.mxu0 %v3388_v9  ;;  %v3547_v59 = vld [vmem:[#allocation5 + $0x390] sm:$0xf]  ;;  %v4174_v60 = vld [vmem:[#allocation5 + $0x394] sm:$0xf0]  ;;  %v3411_v0 = vld [vmem:[#allocation5 + $0x280] sm:$0xf]  ;;  %v3484_v6 = vor.u32 %v4158_v57, %v3483_v56  ;;  %v3348_v19 = vor.u32 %v4124_v62, %v3347_v61 }
  0x48   :  { %1113 = vmatpush.bf16.msrb.mxu1 %v3452_v12  ;;  %v4140_v2 = vld [vmem:[#allocation5 + $0x284] sm:$0xf0]  ;;  %v3475_v3 = vld [vmem:[#allocation5 + $0x300] sm:$0xf]  ;;  %v4073_v9 = vld [vmem:[#allocation5 + $0x74] sm:$0xf]  ;;  %v3548_v11 = vor.u32 %v4174_v60, %v3547_v59 }
  0x49   :  { %1127 = vmatpush.bf16.msrb.mxu2 %v3516_v13  ;;  %v4156_v4 = vld [vmem:[#allocation5 + $0x304] sm:$0xf0]  ;;  %v3539_v7 = vld [vmem:[#allocation5 + $0x380] sm:$0xf]  ;;  %v3149_v12 = vld [vmem:[#allocation5 + $0x78] sm:$0xf0]  ;;  %v3412_v23 = vor.u32 %v4140_v2, %v3411_v0 }
  0x4a   :  { %1141 = vmatpush.bf16.msrb.mxu3 %v3580_v18  ;;  %v4172_v8 = vld [vmem:[#allocation5 + $0x384] sm:$0xf0]  ;;  %v4089_v13 = vld [vmem:[#allocation5 + $0xf4] sm:$0xf]  ;;  %v3213_v14 = vld [vmem:[#allocation5 + $0xf8] sm:$0xf0]  ;;  %v3152_v29 = vor.u32 %v4073_v9, %v3149_v12 }
  0x4b   :  { %1100 = vmatpush.bf16.msrb.mxu0 %v3380_v24  ;;  %v4105_v15 = vld [vmem:[#allocation5 + $0x174] sm:$0xf]  ;;  %v3277_v16 = vld [vmem:[#allocation5 + $0x178] sm:$0xf0]  ;;  %v3075_v21 = vld [vmem:[#allocation2 + $0x10] sm:$0xf]  ;;  %v3476_v24 = vor.u32 %v4156_v4, %v3475_v3  ;;  %v3540_v28 = vor.u32 %v4172_v8, %v3539_v7  ;;  %v3216_v33 = vor.u32 %v4089_v13, %v3213_v14 }
  0x4c   :  { %1114 = vmatpush.bf16.msrb.mxu1 %v3444_v25  ;;  %v4121_v18 = vld [vmem:[#allocation5 + $0x1f4] sm:$0xf]  ;;  %v3341_v20 = vld [vmem:[#allocation5 + $0x1f8] sm:$0xf0]  ;;  %v4057_v22 = vld [vmem:[#allocation2 + $0x2c] sm:$0xf0]  ;;  %v3280_v34 = vor.u32 %v4105_v15, %v3277_v16 }
  0x4d   :  { %1128 = vmatpush.bf16.msrb.mxu2 %v3508_v26  ;;  %v3083_v25 = vld [vmem:[#allocation2 + $0x18] sm:$0xf]  ;;  %v4053_v27 = vld [vmem:[#allocation2 + $0x14] sm:$0xf]  ;;  %v4054_v31 = vld [vmem:[#allocation2 + $0x1c] sm:$0xf]  ;;  %v4612_v39 = vor.u32 %v4057_v22, %v3075_v21 }
  0x4e   :  { %1142 = vmatpush.bf16.msrb.mxu3 %v3572_v30  ;;  %v4058_v26 = vld [vmem:[#allocation2 + $0x34] sm:$0xf0]  ;;  %v3077_v30 = vld [vmem:[#allocation2 + $0x30] sm:$0xf0]  ;;  %v3085_v32 = vld [vmem:[#allocation2 + $0x38] sm:$0xf0] }
  0x4f   :  { %1101 = vmatpush.bf16.msrb.mxu0 %v3372_v36  ;;  %v4071_v35 = vld [vmem:[#allocation5 + $0x64] sm:$0xf]  ;;  %v3141_v36 = vld [vmem:[#allocation5 + $0x68] sm:$0xf0]  ;;  %v4614_v43 = vor.u32 %v4058_v26, %v3083_v25  ;;  %v4616_v44 = vor.u32 %v4053_v27, %v3077_v30  ;;  %v4618_v47 = vor.u32 %v4054_v31, %v3085_v32  ;;  %v3133_v52 = vld [vmem:[#allocation5 + $0x58] sm:$0xf0] }
  0x50   :  { %1115 = vmatpush.bf16.msrb.mxu1 %v3436_v37  ;;  %v4087_v37 = vld [vmem:[#allocation5 + $0xe4] sm:$0xf]  ;;  %v3205_v40 = vld [vmem:[#allocation5 + $0xe8] sm:$0xf0]  ;;  %v4085_v53 = vld [vmem:[#allocation5 + $0xd4] sm:$0xf] }
  0x51   :  { %1129 = vmatpush.bf16.msrb.mxu2 %v3500_v38  ;;  %v3344_v38 = vor.u32 %v4121_v18, %v3341_v20  ;;  %v4103_v41 = vld [vmem:[#allocation5 + $0x164] sm:$0xf]  ;;  %v3333_v46 = vld [vmem:[#allocation5 + $0x1e8] sm:$0xf0]  ;;  %v3208_v49 = vor.u32 %v4087_v37, %v3205_v40  ;;  %v4101_v56 = vld [vmem:[#allocation5 + $0x154] sm:$0xf] }
  0x52   :  { %1143 = vmatpush.bf16.msrb.mxu3 %v3564_v42  ;;  %v3269_v42 = vld [vmem:[#allocation5 + $0x168] sm:$0xf0]  ;;  %v4119_v45 = vld [vmem:[#allocation5 + $0x1e4] sm:$0xf]  ;;  %v3261_v57 = vld [vmem:[#allocation5 + $0x158] sm:$0xf0] }
  0x53   :  { %1102 = vmatpush.bf16.msrb.mxu0 %v3364_v48  ;;  %v3144_v48 = vor.u32 %v4071_v35, %v3141_v36  ;;  %v3336_v54 = vor.u32 %v4119_v45, %v3333_v46  ;;  %v4117_v59 = vld [vmem:[#allocation5 + $0x1d4] sm:$0xf]  ;;  %v3325_v60 = vld [vmem:[#allocation5 + $0x1d8] sm:$0xf0]  ;;  %v4067_v0 = vld [vmem:[#allocation5 + $0x44] sm:$0xf] }
  0x54   :  { %1116 = vmatpush.bf16.msrb.mxu1 %v3428_v50  ;;  %v3272_v50 = vor.u32 %v4103_v41, %v3269_v42  ;;  %v3125_v2 = vld [vmem:[#allocation5 + $0x48] sm:$0xf0]  ;;  %v4083_v3 = vld [vmem:[#allocation5 + $0xc4] sm:$0xf]  ;;  %v3328_v4 = vor.u32 %v4117_v59, %v3325_v60  ;;  %v4065_v14 = vld [vmem:[#allocation5 + $0x34] sm:$0xf] }
  0x55   :  { %1130 = vmatpush.bf16.msrb.mxu2 %v3492_v51  ;;  %v4069_v51 = vld [vmem:[#allocation5 + $0x54] sm:$0xf]  ;;  %v3253_v7 = vld [vmem:[#allocation5 + $0x148] sm:$0xf0]  ;;  %v4115_v8 = vld [vmem:[#allocation5 + $0x1c4] sm:$0xf] }
  0x56   :  { %1144 = vmatpush.bf16.msrb.mxu3 %v3556_v55  ;;  %v3197_v55 = vld [vmem:[#allocation5 + $0xd8] sm:$0xf0]  ;;  %v3136_v61 = vor.u32 %v4069_v51, %v3133_v52  ;;  %v3317_v9 = vld [vmem:[#allocation5 + $0x1c8] sm:$0xf0]  ;;  %v4081_v16 = vld [vmem:[#allocation5 + $0xb4] sm:$0xf] }
  0x57   :  { %1103 = vmatpush.bf16.msrb.mxu0 %v3356_v63  ;;  %v3200_v62 = vor.u32 %v4085_v53, %v3197_v55  ;;  %v3264_v63 = vor.u32 %v4101_v56, %v3261_v57  ;;  %v3117_v15 = vld [vmem:[#allocation5 + $0x38] sm:$0xf0]  ;;  %v3320_v18 = vor.u32 %v4115_v8, %v3317_v9  ;;  %v4097_v20 = vld [vmem:[#allocation5 + $0x134] sm:$0xf]  ;;  %v4063_v27 = vld [vmem:[#allocation5 + $0x24] sm:$0xf] }
  0x58   :  { %1117 = vmatpush.bf16.msrb.mxu1 %v3420_v5  ;;  %v3189_v5 = vld [vmem:[#allocation5 + $0xc8] sm:$0xf0]  ;;  %v3245_v21 = vld [vmem:[#allocation5 + $0x138] sm:$0xf0]  ;;  %v4113_v22 = vld [vmem:[#allocation5 + $0x1b4] sm:$0xf] }
  0x59   :  { %1131 = vmatpush.bf16.msrb.mxu2 %v3484_v6  ;;  %v4099_v6 = vld [vmem:[#allocation5 + $0x144] sm:$0xf]  ;;  %v3192_v12 = vor.u32 %v4083_v3, %v3189_v5  ;;  %v3248_v26 = vor.u32 %v4097_v20, %v3245_v21  ;;  %v3173_v31 = vld [vmem:[#allocation5 + $0xa8] sm:$0xf0]  ;;  %v4061_v40 = vld [vmem:[#allocation5 + $0x14] sm:$0xf] }
  0x5a   :  { %1145 = vmatpush.bf16.msrb.mxu3 %v3548_v11  ;;  %v3128_v11 = vor.u32 %v4067_v0, %v3125_v2  ;;  %v3256_v13 = vor.u32 %v4099_v6, %v3253_v7  ;;  %v4095_v32 = vld [vmem:[#allocation5 + $0x124] sm:$0xf]  ;;  %v3301_v35 = vld [vmem:[#allocation5 + $0x1a8] sm:$0xf0]  ;;  %v3101_v41 = vld [vmem:[#allocation5 + $0x18] sm:$0xf0] }
  0x5b   :  { %1104 = vmatpush.bf16.msrb.mxu0 %v3348_v19  ;;  %v3181_v19 = vld [vmem:[#allocation5 + $0xb8] sm:$0xf0]  ;;  %v4077_v42 = vld [vmem:[#allocation5 + $0x94] sm:$0xf]  ;;  %v3104_v52 = vor.u32 %v4061_v40, %v3101_v41  ;;  %v4059_v53 = vld [vmem:[#allocation5 + $0x4] sm:$0xf] }
  0x5c   :  { %1118 = vmatpush.bf16.msrb.mxu1 %v3412_v23  ;;  %v3309_v23 = vld [vmem:[#allocation5 + $0x1b8] sm:$0xf0]  ;;  %v3184_v25 = vor.u32 %v4081_v16, %v3181_v19  ;;  %v4075_v57 = vld [vmem:[#allocation5 + $0x84] sm:$0xf]  ;;  %v3157_v59 = vld [vmem:[#allocation5 + $0x88] sm:$0xf0] }
  0x5d   :  { %1132 = vmatpush.bf16.msrb.mxu2 %v3476_v24  ;;  %v3120_v24 = vor.u32 %v4065_v14, %v3117_v15  ;;  %v3312_v30 = vor.u32 %v4113_v22, %v3309_v23  ;;  %v3165_v46 = vld [vmem:[#allocation5 + $0x98] sm:$0xf0]  ;;  %v4091_v60 = vld [vmem:[#allocation5 + $0x104] sm:$0xf]  ;;  %v3285_v0 = vld [vmem:[#allocation5 + $0x188] sm:$0xf0]  ;;  %v3160_v9 = vor.u32 %v4075_v57, %v3157_v59 }
  0x5e   :  { %1146 = vmatpush.bf16.msrb.mxu3 %v3540_v28  ;;  %1105 = vmatmul.bf16.vlgmr.msrb.gmra.mxu0 %v4612_v39  ;;  %v3109_v28 = vld [vmem:[#allocation5 + $0x28] sm:$0xf0]  ;;  %v3293_v51 = vld [vmem:[#allocation5 + $0x198] sm:$0xf0]  ;;  %v3168_v55 = vor.u32 %v4077_v42, %v3165_v46  ;;  %v4137_v2 = vld [vmem:[#allocation5 + $0x274] sm:$0xf] }
  0x5f   :  { %1153 = vmatpush.bf16.msra.mxu0 %v3152_v29  ;;  %1119 = vmatmul.bf16.vlgmr.msrb.gmra.mxu1 %v4616_v44  ;;  %v4079_v29 = vld [vmem:[#allocation5 + $0xa4] sm:$0xf]  ;;  %v3112_v36 = vor.u32 %v4063_v27, %v3109_v28  ;;  %v3405_v3 = vld [vmem:[#allocation5 + $0x278] sm:$0xf0]  ;;  %v4169_v7 = vld [vmem:[#allocation5 + $0x374] sm:$0xf] }
  0x60   :  { %1167 = vmatpush.bf16.msra.mxu1 %v3216_v33  ;;  %1133 = vmatmul.bf16.vlgmr.msrb.gmra.mxu2 %v4614_v43  ;;  %v3237_v33 = vld [vmem:[#allocation5 + $0x128] sm:$0xf0]  ;;  %v3176_v37 = vor.u32 %v4079_v29, %v3173_v31  ;;  %v3469_v6 = vld [vmem:[#allocation5 + $0x2f8] sm:$0xf0]  ;;  %v3408_v15 = vor.u32 %v4137_v2, %v3405_v3  ;;  %v4135_v19 = vld [vmem:[#allocation5 + $0x264] sm:$0xf] }
  0x61   :  { %1181 = vmatpush.bf16.msra.mxu2 %v3280_v34  ;;  %1147 = vmatmul.bf16.vlgmr.msrb.gmra.mxu3 %v4618_v47  ;;  %v4111_v34 = vld [vmem:[#allocation5 + $0x1a4] sm:$0xf]  ;;  %v3533_v8 = vld [vmem:[#allocation5 + $0x378] sm:$0xf0]  ;;  %v3397_v20 = vld [vmem:[#allocation5 + $0x268] sm:$0xf0] }
  0x62   :  { %1195 = vmatpush.bf16.msra.mxu3 %v3344_v38  ;;  %v3240_v38 = vor.u32 %v4095_v32, %v3237_v33  ;;  %v3304_v45 = vor.u32 %v4111_v34, %v3301_v35  ;;  %v4151_v21 = vld [vmem:[#allocation5 + $0x2e4] sm:$0xf]  ;;  %v3461_v23 = vld [vmem:[#allocation5 + $0x2e8] sm:$0xf0]  ;;  %v3400_v28 = vor.u32 %v4135_v19, %v3397_v20  ;;  %v4133_v31 = vld [vmem:[#allocation5 + $0x254] sm:$0xf] }
  0x63   :  { %1154 = vmatpush.bf16.msra.mxu0 %v3144_v48  ;;  %v4093_v48 = vld [vmem:[#allocation5 + $0x114] sm:$0xf]  ;;  %v3589_v27 = vld [vmem:[#allocation5 + $0x3e8] sm:$0xf0]  ;;  %v3464_v29 = vor.u32 %v4151_v21, %v3461_v23  ;;  %v3389_v32 = vld [vmem:[#allocation5 + $0x258] sm:$0xf0] }
  0x64   :  { %1168 = vmatpush.bf16.msra.mxu1 %v3208_v49  ;;  %v3229_v49 = vld [vmem:[#allocation5 + $0x118] sm:$0xf0]  ;;  %v4149_v33 = vld [vmem:[#allocation5 + $0x2d4] sm:$0xf]  ;;  %v3392_v41 = vor.u32 %v4133_v31, %v3389_v32  ;;  %v4131_v46 = vld [vmem:[#allocation5 + $0x244] sm:$0xf] }
  0x65   :  { %1182 = vmatpush.bf16.msra.mxu2 %v3272_v50  ;;  %v4109_v50 = vld [vmem:[#allocation5 + $0x194] sm:$0xf]  ;;  %v3232_v56 = vor.u32 %v4093_v48, %v3229_v49  ;;  %v3453_v35 = vld [vmem:[#allocation5 + $0x2d8] sm:$0xf0]  ;;  %v3381_v48 = vld [vmem:[#allocation5 + $0x248] sm:$0xf0] }
  0x66   :  { %1196 = vmatpush.bf16.msra.mxu3 %v3336_v54  ;;  %v3093_v54 = vld [vmem:[#allocation5 + $0x8] sm:$0xf0]  ;;  %v3581_v40 = vld [vmem:[#allocation5 + $0x3d8] sm:$0xf0]  ;;  %v3456_v42 = vor.u32 %v4149_v33, %v3453_v35  ;;  %v4145_v57 = vld [vmem:[#allocation5 + $0x2b4] sm:$0xf] }
  0x67   :  { %1155 = vmatpush.bf16.msra.mxu0 %v3136_v61  ;;  %v3296_v61 = vor.u32 %v4109_v50, %v3293_v51  ;;  %v3096_v5 = vor.u32 %v4059_v53, %v3093_v54  ;;  %v3445_v50 = vld [vmem:[#allocation5 + $0x2c8] sm:$0xf0]  ;;  %v4163_v51 = vld [vmem:[#allocation5 + $0x344] sm:$0xf]  ;;  %v4125_v19 = vld [vmem:[#allocation5 + $0x214] sm:$0xf] }
  0x68   :  { %1169 = vmatpush.bf16.msra.mxu1 %v3200_v62  ;;  %v3221_v62 = vld [vmem:[#allocation5 + $0x108] sm:$0xf0]  ;;  %v3357_v20 = vld [vmem:[#allocation5 + $0x218] sm:$0xf0]  ;;  %v4141_v21 = vld [vmem:[#allocation5 + $0x294] sm:$0xf] }
  0x69   :  { %1183 = vmatpush.bf16.msra.mxu2 %v3264_v63  ;;  %v4107_v63 = vld [vmem:[#allocation5 + $0x184] sm:$0xf]  ;;  %v3573_v53 = vld [vmem:[#allocation5 + $0x3c8] sm:$0xf0]  ;;  %v3421_v23 = vld [vmem:[#allocation5 + $0x298] sm:$0xf0] }
  0x6a   :  { %1197 = vmatpush.bf16.msra.mxu3 %v3328_v4  ;;  %v4153_v4 = vld [vmem:[#allocation5 + $0x2f4] sm:$0xf]  ;;  %v3288_v14 = vor.u32 %v4107_v63, %v3285_v0  ;;  %v3565_v0 = vld [vmem:[#allocation5 + $0x3b8] sm:$0xf0]  ;;  %v4123_v31 = vld [vmem:[#allocation5 + $0x204] sm:$0xf] }
  0x6b   :  { %1156 = vmatpush.bf16.msra.mxu0 %v3128_v11  ;;  %v3224_v11 = vor.u32 %v4091_v60, %v3221_v62  ;;  %v3472_v16 = vor.u32 %v4153_v4, %v3469_v6  ;;  %v3437_v60 = vld [vmem:[#allocation5 + $0x2b8] sm:$0xf0]  ;;  %v4177_v63 = vld [vmem:[#allocation5 + $0x3b4] sm:$0xf]  ;;  %v3365_v6 = vld [vmem:[#allocation5 + $0x228] sm:$0xf0] }
  0x6c   :  { %1170 = vmatpush.bf16.msra.mxu1 %v3192_v12  ;;  %v4185_v12 = vld [vmem:[#allocation5 + $0x3f4] sm:$0xf]  ;;  %v3501_v62 = vld [vmem:[#allocation5 + $0x338] sm:$0xf0]  ;;  %v3440_v3 = vor.u32 %v4145_v57, %v3437_v60  ;;  %v3349_v32 = vld [vmem:[#allocation5 + $0x208] sm:$0xf0] }
  0x6d   :  { %1184 = vmatpush.bf16.msra.mxu2 %v3256_v13  ;;  %v3597_v13 = vld [vmem:[#allocation5 + $0x3f8] sm:$0xf0]  ;;  %v4139_v33 = vld [vmem:[#allocation5 + $0x284] sm:$0xf]  ;;  %v3413_v35 = vld [vmem:[#allocation5 + $0x288] sm:$0xf0] }
  0x6e   :  { %1198 = vmatpush.bf16.msra.mxu3 %v3320_v18  ;;  %v3536_v18 = vor.u32 %v4169_v7, %v3533_v8  ;;  %v3600_v22 = vor.u32 %v4185_v12, %v3597_v13  ;;  %v4143_v7 = vld [vmem:[#allocation5 + $0x2a4] sm:$0xf]  ;;  %v3568_v8 = vor.u32 %v4177_v63, %v3565_v0  ;;  %v3493_v12 = vld [vmem:[#allocation5 + $0x328] sm:$0xf0]  ;;  %v4196_v60 = vld [vmem:[#allocation7 + $0x44] sm:$0xf0] }
  0x6f   :  { %1157 = vmatpush.bf16.msra.mxu0 %v3120_v24  ;;  %v4167_v24 = vld [vmem:[#allocation5 + $0x364] sm:$0xf]  ;;  %v3637_v63 = vld [vmem:[#allocation7 + $0x48] sm:$0xf0]  ;;  %vm1549_vm5 = vcmask 1040384   ;;  %s4519_s1 = smov [#allocation13]  }
  0x70   :  { %1171 = vmatpush.bf16.msra.mxu1 %v3184_v25  ;;  %v3525_v25 = vld [vmem:[#allocation5 + $0x368] sm:$0xf0]  ;;  %v4175_v13 = vld [vmem:[#allocation5 + $0x3a4] sm:$0xf]  ;;  %s3042_s22 = sshll.u32 %s4519_s1, 4  ;;  %s3044_s4 = sshll.u32 %s4986_s9, 4  ;;  %s3043_s22 = int_to_ptr.vmem [resolvable:$true] %s3042_s22  ;;  %s3045_s4 = int_to_ptr.hbm [resolvable:$true] %s3044_s4 }
  0x71   :  { %1185 = vmatpush.bf16.msra.mxu2 %v3248_v26  ;;  %v4183_v26 = vld [vmem:[#allocation5 + $0x3e4] sm:$0xf] }
  0x72   :  { %1199 = vmatpush.bf16.msra.mxu3 %v3312_v30  ;;  %v3528_v30 = vor.u32 %v4167_v24, %v3525_v25  ;;  %v3592_v34 = vor.u32 %v4183_v26, %v3589_v27  ;;  %v4157_v24 = vld [vmem:[#allocation5 + $0x314] sm:$0xf]  ;;  %v3485_v25 = vld [vmem:[#allocation5 + $0x318] sm:$0xf0] }
  0x73   :  { %1158 = vmatpush.bf16.msra.mxu0 %v3112_v36  ;;  %v4165_v36 = vld [vmem:[#allocation5 + $0x354] sm:$0xf]  ;;  %v3549_v27 = vld [vmem:[#allocation5 + $0x398] sm:$0xf0] }
  0x74   :  { %1172 = vmatpush.bf16.msra.mxu1 %v3176_v37  ;;  %v3517_v37 = vld [vmem:[#allocation5 + $0x358] sm:$0xf0]  ;;  %v4173_v26 = vld [vmem:[#allocation5 + $0x394] sm:$0xf] }
  0x75   :  { %1186 = vmatpush.bf16.msra.mxu2 %v3240_v38  ;;  %v4181_v38 = vld [vmem:[#allocation5 + $0x3d4] sm:$0xf] }
  0x76   :  { %1200 = vmatpush.bf16.msra.mxu3 %v3304_v45  ;;  %v3520_v45 = vor.u32 %v4165_v36, %v3517_v37  ;;  %v3584_v49 = vor.u32 %v4181_v38, %v3581_v40  ;;  %v4155_v36 = vld [vmem:[#allocation5 + $0x304] sm:$0xf]  ;;  %v3477_v37 = vld [vmem:[#allocation5 + $0x308] sm:$0xf0] }
  0x77   :  { %1159 = vmatpush.bf16.msra.mxu0 %v3104_v52  ;;  %v4179_v52 = vld [vmem:[#allocation5 + $0x3c4] sm:$0xf]  ;;  %v3541_v40 = vld [vmem:[#allocation5 + $0x388] sm:$0xf0] }
  0x78   :  { %1173 = vmatpush.bf16.msra.mxu1 %v3168_v55  ;;  %v4129_v55 = vld [vmem:[#allocation5 + $0x234] sm:$0xf]  ;;  %v3576_v59 = vor.u32 %v4179_v52, %v3573_v53  ;;  %v4171_v38 = vld [vmem:[#allocation5 + $0x384] sm:$0xf]  ;;  %v3651_v52 = vld [vmem:[#allocation7 + $0x60] sm:$0xf] }
  0x79   :  { %1187 = vmatpush.bf16.msra.mxu2 %v3232_v56  ;;  %v3373_v56 = vld [vmem:[#allocation5 + $0x238] sm:$0xf0]  ;;  %v4200_v53 = vld [vmem:[#allocation7 + $0x64] sm:$0xf0] }
  0x7a   :  { %1201 = vmatpush.bf16.msra.mxu3 %v3296_v61  ;;  %v4161_v61 = vld [vmem:[#allocation5 + $0x334] sm:$0xf]  ;;  %v3376_v2 = vor.u32 %v4129_v55, %v3373_v56  ;;  %v4198_v55 = vld [vmem:[#allocation7 + $0x54] sm:$0xf0]  ;;  %v3645_v56 = vld [vmem:[#allocation7 + $0x58] sm:$0xf0] }
  0x7b   :  { %1160 = vmatpush.bf16.msra.mxu0 %v3096_v5  ;;  %v3504_v4 = vor.u32 %v4161_v61, %v3501_v62  ;;  %v4127_v5 = vld [vmem:[#allocation5 + $0x224] sm:$0xf] }
  0x7c   :  { %1174 = vmatpush.bf16.msra.mxu1 %v3160_v9  ;;  %v3429_v9 = vld [vmem:[#allocation5 + $0x2a8] sm:$0xf0]  ;;  %v4195_v61 = vld [vmem:[#allocation7 + $0x44] sm:$0xf] }
  0x7d   :  { %1188 = vmatpush.bf16.msra.mxu2 %v3224_v11  ;;  %v4159_v11 = vld [vmem:[#allocation5 + $0x324] sm:$0xf]  ;;  %v3640_v0 = vor.u32 %v4195_v61, %v3637_v63 }
  0x7e   :  { %1202 = vmatpush.bf16.msra.mxu3 %v3288_v14  ;;  %1161 = vmatmul.bf16.vlgmr.msra.gmra.mxu0 %v4600_v58  ;;  %v3384_v58 = vor.u32 %v4131_v46, %v3381_v48  ;;  %v3557_v14 = vld [vmem:[#allocation5 + $0x3a8] sm:$0xf0]  ;;  %v3544_v46 = vor.u32 %v4171_v38, %v3541_v40  ;;  %v3659_v48 = vld [vmem:[#allocation7 + $0x70] sm:$0xf]  ;;  %v4215_v61 = vld [vmem:[#allocation7 + $0xe4] sm:$0xf] }
  0x7f   :  { %1209 = vmatpush.bf16.msrb.mxu0 %v3408_v15  ;;  %1175 = vmatmul.bf16.vlgmr.msra.gmra.mxu1 %v4606_v10  ;;  %v3368_v15 = vor.u32 %v4127_v5, %v3365_v6  ;;  %v3629_v6 = vld [vmem:[#allocation7 + $0x38] sm:$0xf0] }
  0x80   :  { %1223 = vmatpush.bf16.msrb.mxu1 %v3472_v16  ;;  %1189 = vmatmul.bf16.vlgmr.msra.gmra.mxu2 %v4602_v1  ;;  %v4147_v1 = vld [vmem:[#allocation5 + $0x2c4] sm:$0xf]  ;;  %v3432_v16 = vor.u32 %v4143_v7, %v3429_v9  ;;  %v4192_v9 = vld [vmem:[#allocation7 + $0x24] sm:$0xf0] }
  0x81   :  { %1237 = vmatpush.bf16.msrb.mxu2 %v3536_v18  ;;  %1203 = vmatmul.bf16.vlgmr.msra.gmra.mxu3 %v4608_v17  ;;  %v3509_v17 = vld [vmem:[#allocation5 + $0x348] sm:$0xf0]  ;;  %v3448_v54 = vor.u32 %v4147_v1, %v3445_v50  ;;  %v3496_v18 = vor.u32 %v4159_v11, %v3493_v12  ;;  %v4202_v1 = vld [vmem:[#allocation7 + $0x74] sm:$0xf0]  ;;  %v4191_v11 = vld [vmem:[#allocation7 + $0x24] sm:$0xf] }
  0x82   :  { %1251 = vmatpush.bf16.msrb.mxu3 %v3600_v22  ;;  %v3512_v10 = vor.u32 %v4163_v51, %v3509_v17  ;;  %v3560_v22 = vor.u32 %v4175_v13, %v3557_v14  ;;  %v3660_v50 = vor.u32 %v4202_v1, %v3659_v48  ;;  %v3661_v51 = vld [vmem:[#allocation7 + $0x78] sm:$0xf0]  ;;  %v3621_v13 = vld [vmem:[#allocation7 + $0x28] sm:$0xf0] }
  0x83   :  { %1210 = vmatpush.bf16.msrb.mxu0 %v3400_v28  ;;  %v3360_v28 = vor.u32 %v4125_v19, %v3357_v20  ;;  %v4190_v19 = vld [vmem:[#allocation7 + $0x14] sm:$0xf0]  ;;  %v4189_v20 = vld [vmem:[#allocation7 + $0x14] sm:$0xf] }
  0x84   :  { %1224 = vmatpush.bf16.msrb.mxu1 %v3464_v29  ;;  %v3424_v29 = vor.u32 %v4141_v21, %v3421_v23 }
  0x85   :  { %1238 = vmatpush.bf16.msrb.mxu2 %v3528_v30  ;;  %v3488_v30 = vor.u32 %v4157_v24, %v3485_v25  ;;  %v3603_v24 = vld [vmem:[#allocation7] sm:$0xf]  ;;  %v4188_v25 = vld [vmem:[#allocation7 + $0x4] sm:$0xf0] }
  0x86   :  { %1252 = vmatpush.bf16.msrb.mxu3 %v3592_v34  ;;  %v3552_v34 = vor.u32 %v4173_v26, %v3549_v27  ;;  %v4187_v26 = vld [vmem:[#allocation7 + $0x4] sm:$0xf] }
  0x87   :  { %1211 = vmatpush.bf16.msrb.mxu0 %v3392_v41  ;;  %v3352_v41 = vor.u32 %v4123_v31, %v3349_v32 }
  0x88   :  { %1225 = vmatpush.bf16.msrb.mxu1 %v3456_v42  ;;  %v3416_v42 = vor.u32 %v4139_v33, %v3413_v35 }
  0x89   :  { %1239 = vmatpush.bf16.msrb.mxu2 %v3520_v45  ;;  %v3480_v45 = vor.u32 %v4155_v36, %v3477_v37 }
  0x8a   :  { %1253 = vmatpush.bf16.msrb.mxu3 %v3584_v49  ;;  %v4201_v49 = vld [vmem:[#allocation7 + $0x74] sm:$0xf] }
  0x8b   :  { %1212 = vmatpush.bf16.msrb.mxu0 %v3384_v58  ;;  %v3664_v17 = vor.u32 %v4201_v49, %v3661_v51  ;;  %v4199_v58 = vld [vmem:[#allocation7 + $0x64] sm:$0xf] }
  0x8c   :  { %1226 = vmatpush.bf16.msrb.mxu1 %v3448_v54  ;;  %v3652_v54 = vor.u32 %v4200_v53, %v3651_v52 }
  0x8d   :  { %1240 = vmatpush.bf16.msrb.mxu2 %v3512_v10  ;;  %v3653_v10 = vld [vmem:[#allocation7 + $0x68] sm:$0xf0] }
  0x8e   :  { %1254 = vmatpush.bf16.msrb.mxu3 %v3576_v59  ;;  %v3635_v59 = vld [vmem:[#allocation7 + $0x40] sm:$0xf] }
  0x8f   :  { %1213 = vmatpush.bf16.msrb.mxu0 %v3376_v2  ;;  %v3636_v62 = vor.u32 %v4196_v60, %v3635_v59  ;;  %v3627_v2 = vld [vmem:[#allocation7 + $0x30] sm:$0xf]  ;;  %v4216_v59 = vld [vmem:[#allocation7 + $0xe4] sm:$0xf0] }
  0x90   :  { %1227 = vmatpush.bf16.msrb.mxu1 %v3440_v3  ;;  %v4194_v3 = vld [vmem:[#allocation7 + $0x34] sm:$0xf0] }
  0x91   :  { %1241 = vmatpush.bf16.msrb.mxu2 %v3504_v4  ;;  %v4193_v4 = vld [vmem:[#allocation7 + $0x34] sm:$0xf]  ;;  %v3628_v5 = vor.u32 %v4194_v3, %v3627_v2 }
  0x92   :  { %1255 = vmatpush.bf16.msrb.mxu3 %v3568_v8  ;;  %v3632_v7 = vor.u32 %v4193_v4, %v3629_v6  ;;  %v3619_v8 = vld [vmem:[#allocation7 + $0x20] sm:$0xf]  ;;  %v3707_v4 = vld [vmem:[#allocation7 + $0xd0] sm:$0xf]  ;;  %v4214_v6 = vld [vmem:[#allocation7 + $0xd4] sm:$0xf0] }
  0x93   :  { %1214 = vmatpush.bf16.msrb.mxu0 %v3368_v15  ;;  %v3620_v12 = vor.u32 %v4192_v9, %v3619_v8  ;;  %v3624_v15 = vor.u32 %v4191_v11, %v3621_v13  ;;  %v3709_v8 = vld [vmem:[#allocation7 + $0xd8] sm:$0xf0]  ;;  %v3708_v9 = vor.u32 %v4214_v6, %v3707_v4  ;;  %v4212_v13 = vld [vmem:[#allocation7 + $0xc4] sm:$0xf0] }
  0x94   :  { %1228 = vmatpush.bf16.msrb.mxu1 %v3432_v16 }
  0x95   :  { %1242 = vmatpush.bf16.msrb.mxu2 %v3496_v18  ;;  %v3611_v18 = vld [vmem:[#allocation7 + $0x10] sm:$0xf] }
  0x96   :  { %1256 = vmatpush.bf16.msrb.mxu3 %v3560_v22  ;;  %v3612_v21 = vor.u32 %v4190_v19, %v3611_v18  ;;  %v3613_v22 = vld [vmem:[#allocation7 + $0x18] sm:$0xf0]  ;;  %v3691_v19 = vld [vmem:[#allocation7 + $0xb0] sm:$0xf] }
  0x97   :  { %1215 = vmatpush.bf16.msrb.mxu0 %v3360_v28  ;;  %v3616_v23 = vor.u32 %v4189_v20, %v3613_v22  ;;  %v3604_v28 = vor.u32 %v4188_v25, %v3603_v24  ;;  %v4210_v20 = vld [vmem:[#allocation7 + $0xb4] sm:$0xf0]  ;;  %v3683_v25 = vld [vmem:[#allocation7 + $0xa0] sm:$0xf] }
  0x98   :  { %1229 = vmatpush.bf16.msrb.mxu1 %v3424_v29  ;;  %v3605_v29 = vld [vmem:[#allocation7 + $0x8] sm:$0xf0]  ;;  %v3692_v22 = vor.u32 %v4210_v20, %v3691_v19 }
  0x99   :  { %1243 = vmatpush.bf16.msrb.mxu2 %v3488_v30  ;;  %v3608_v31 = vor.u32 %v4187_v26, %v3605_v29  ;;  %v4208_v26 = vld [vmem:[#allocation7 + $0xa4] sm:$0xf0]  ;;  %v3685_v29 = vld [vmem:[#allocation7 + $0xa8] sm:$0xf0] }
  0x9a   :  { %1257 = vmatpush.bf16.msrb.mxu3 %v3552_v34 }
  0x9b   :  { %1216 = vmatpush.bf16.msrb.mxu0 %v3352_v41 }
  0x9c   :  { %1230 = vmatpush.bf16.msrb.mxu1 %v3416_v42 }
  0x9d   :  { %1244 = vmatpush.bf16.msrb.mxu2 %v3480_v45 }
  0x9e   :  { %1258 = vmatpush.bf16.msrb.mxu3 %v3544_v46  ;;  %1217 = vmatmul.bf16.vlgmr.msrb.gmra.mxu0 %v4612_v39  ;;  %v3656_v39 = vor.u32 %v4199_v58, %v3653_v10  ;;  %v3723_v10 = vld [vmem:[#allocation7 + $0xf0] sm:$0xf] }
  0x9f   :  { %1231 = vmatmul.bf16.vlgmr.msrb.gmra.mxu1 %v4616_v44  ;;  %1427 = vmatpush.bf16.msra.mxu0 %v3660_v50  ;;  %v3643_v44 = vld [vmem:[#allocation7 + $0x50] sm:$0xf] }
  0xa0   :  { %1245 = vmatmul.bf16.vlgmr.msrb.gmra.mxu2 %v4614_v43  ;;  %v4197_v43 = vld [vmem:[#allocation7 + $0x54] sm:$0xf] }
  0xa1   :  { %1259 = vmatmul.bf16.vlgmr.msrb.gmra.mxu3 %v4618_v47  ;;  %1455 = vmatpush.bf16.msra.mxu2 %v3664_v17  ;;  %v3644_v47 = vor.u32 %v4198_v55, %v3643_v44  ;;  %v3648_v57 = vor.u32 %v4197_v43, %v3645_v56  ;;  %v4217_v44 = vld [vmem:[#allocation7 + $0xf4] sm:$0xf]  ;;  %v3725_v56 = vld [vmem:[#allocation7 + $0xf8] sm:$0xf0] }
  0xa2   :  { %v3728_v60 = vor.u32 %v4217_v44, %v3725_v56 }
  0xa3   :  { %1428 = vmatpush.bf16.msra.mxu0 %v3652_v54 }
  0xa4   :  { %1469 = vmatpush.bf16.msra.mxu3 %v3728_v60 }
  0xa5   :  { %1456 = vmatpush.bf16.msra.mxu2 %v3656_v39  ;;  %v4218_v39 = vld [vmem:[#allocation7 + $0xf4] sm:$0xf0] }
  0xa7   :  { %1429 = vmatpush.bf16.msra.mxu0 %v3644_v47  ;;  %v3724_v47 = vor.u32 %v4218_v39, %v3723_v10 }
  0xa9   :  { %1457 = vmatpush.bf16.msra.mxu2 %v3648_v57  ;;  %v3715_v57 = vld [vmem:[#allocation7 + $0xe0] sm:$0xf]  ;;  %1441 = vmatpush.bf16.msra.mxu1 %v3724_v47 }
  0xaa   :  { %v3716_v2 = vor.u32 %v4216_v59, %v3715_v57 }
  0xab   :  { %1430 = vmatpush.bf16.msra.mxu0 %v3636_v62  ;;  %v3717_v62 = vld [vmem:[#allocation7 + $0xe8] sm:$0xf0] }
  0xac   :  { %v3720_v3 = vor.u32 %v4215_v61, %v3717_v62 }
  0xad   :  { %1458 = vmatpush.bf16.msra.mxu2 %v3640_v0  ;;  %1442 = vmatpush.bf16.msra.mxu1 %v3716_v2 }
  0xae   :  { %1470 = vmatpush.bf16.msra.mxu3 %v3720_v3 }
  0xaf   :  { %1431 = vmatpush.bf16.msra.mxu0 %v3628_v5 }
  0xb1   :  { %1459 = vmatpush.bf16.msra.mxu2 %v3632_v7  ;;  %v4213_v7 = vld [vmem:[#allocation7 + $0xd4] sm:$0xf]  ;;  %1443 = vmatpush.bf16.msra.mxu1 %v3708_v9 }
  0xb2   :  { %v3712_v11 = vor.u32 %v4213_v7, %v3709_v8  ;;  %v4518_v8 = vmov 8.0  }
  0xb3   :  { %1432 = vmatpush.bf16.msra.mxu0 %v3620_v12  ;;  %v3699_v12 = vld [vmem:[#allocation7 + $0xc0] sm:$0xf]  ;;  %4304 = vrcp.f32 %v4518_v8 }
  0xb4   :  { %1471 = vmatpush.bf16.msra.mxu3 %v3712_v11 }
  0xb5   :  { %1460 = vmatpush.bf16.msra.mxu2 %v3624_v15  ;;  %v3700_v15 = vor.u32 %v4212_v13, %v3699_v12 }
  0xb7   :  { %1433 = vmatpush.bf16.msra.mxu0 %v3612_v21  ;;  %1444 = vmatpush.bf16.msra.mxu1 %v3700_v15  ;;  %v4209_v21 = vld [vmem:[#allocation7 + $0xb4] sm:$0xf] }
  0xb9   :  { %1461 = vmatpush.bf16.msra.mxu2 %v3616_v23  ;;  %v3693_v23 = vld [vmem:[#allocation7 + $0xb8] sm:$0xf0]  ;;  %v4305_v9 = vpop.eup %4304 }
  0xba   :  { %v3696_v24 = vor.u32 %v4209_v21, %v3693_v23  ;;  %v1496_v11 = vmul.f32 8.0, %v4305_v9  ;;  %vm1500_vm0 = vweird.f32 %v4305_v9 }
  0xbb   :  { %v1050_v14 = vpop.f32.mrf.mxu0  ;;  %1434 = vmatpush.bf16.msra.mxu0 %v3604_v28  ;;  %1445 = vmatpush.bf16.msra.mxu1 %v3692_v22  ;;  %v3684_v28 = vor.u32 %v4208_v26, %v3683_v25 }
  0xbc   :  { %v1064_v16 = vpop.f32.mrf.mxu1 }
  0xbd   :  { %1462 = vmatpush.bf16.msra.mxu2 %v3608_v31  ;;  %v1065_v34 = vadd.f32 %v1064_v16, %v1050_v14  ;;  %v4211_v14 = vld [vmem:[#allocation7 + $0xc4] sm:$0xf]  ;;  %v3701_v16 = vld [vmem:[#allocation7 + $0xc8] sm:$0xf0]  ;;  %v3675_v31 = vld [vmem:[#allocation7 + $0x90] sm:$0xf] }
  0xbe   :  { %v3704_v18 = vor.u32 %v4211_v14, %v3701_v16  ;;  %v1497_v14 = vsub.f32 1.0, %v1496_v11 }
  0xbf   :  { %1446 = vmatpush.bf16.msra.mxu1 %v3684_v28 }
  0xc0   :  { %1472 = vmatpush.bf16.msra.mxu3 %v3704_v18  ;;  %v1498_v19 = vmul.f32 %v4305_v9, %v1497_v14 }
  0xc3   :  { %v1078_v27 = vpop.f32.mrf.mxu2  ;;  %v1052_v32 = vpop.f32.mrf.mxu0 }
  0xc4   :  { %v1092_v30 = vpop.f32.mrf.mxu3  ;;  %v1066_v33 = vpop.f32.mrf.mxu1  ;;  %v1079_v36 = vadd.f32 %v1078_v27, %v1065_v34  ;;  %1473 = vmatpush.bf16.msra.mxu3 %v3696_v24  ;;  %v4207_v27 = vld [vmem:[#allocation7 + $0xa4] sm:$0xf] }
  0xc5   :  { %v1067_v38 = vadd.f32 %v1066_v33, %v1052_v32  ;;  %v4206_v32 = vld [vmem:[#allocation7 + $0x94] sm:$0xf0]  ;;  %v4205_v33 = vld [vmem:[#allocation7 + $0x94] sm:$0xf] }
  0xc6   :  { %v1093_v42 = vadd.f32 %v1092_v30, %v1079_v36  ;;  %v3688_v30 = vor.u32 %v4207_v27, %v3685_v29  ;;  %v3677_v36 = vld [vmem:[#allocation7 + $0x98] sm:$0xf0]  ;;  %v1499_v27 = vadd.f32 %v4305_v9, %v1498_v19  ;;  %v3779_v19 = vld [vmem:[#allocation10 + $0x60] sm:$0xf] }
  0xc8   :  { %1474 = vmatpush.bf16.msra.mxu3 %v3688_v30 }
  0xcb   :  { %v1080_v35 = vpop.f32.mrf.mxu2 }
  0xcc   :  { %v1094_v37 = vpop.f32.mrf.mxu3  ;;  %v1081_v45 = vadd.f32 %v1080_v35, %v1067_v38  ;;  %v3676_v35 = vor.u32 %v4206_v32, %v3675_v31 }
  0xce   :  { %v1095_v1 = vadd.f32 %v1094_v37, %v1081_v45  ;;  %v3680_v37 = vor.u32 %v4205_v33, %v3677_v36  ;;  %1447 = vmatpush.bf16.msra.mxu1 %v3676_v35 }
  0xd0   :  { %1475 = vmatpush.bf16.msra.mxu3 %v3680_v37 }
  0xdb   :  { %v1106_v40 = vpop.f32.mrf.mxu0 }
  0xdc   :  { %v1120_v41 = vpop.f32.mrf.mxu1  ;;  %v1107_v46 = vadd.f32 %v1106_v40, %v1093_v42  ;;  %v3667_v40 = vld [vmem:[#allocation7 + $0x80] sm:$0xf]  ;;  %v4203_v42 = vld [vmem:[#allocation7 + $0x84] sm:$0xf] }
  0xde   :  { %v1121_v51 = vadd.f32 %v1120_v41, %v1107_v46  ;;  %v4204_v41 = vld [vmem:[#allocation7 + $0x84] sm:$0xf0]  ;;  %v3669_v46 = vld [vmem:[#allocation7 + $0x88] sm:$0xf0] }
  0xdf   :  { %v3668_v45 = vor.u32 %v4204_v41, %v3667_v40  ;;  %v4646_v40 = vsel %vm1500_vm0, %v4305_v9, %v1499_v27 }
  0xe1   :  { %1448 = vmatpush.bf16.msra.mxu1 %v3668_v45 }
  0xe3   :  { %v1134_v48 = vpop.f32.mrf.mxu2  ;;  %v1108_v49 = vpop.f32.mrf.mxu0 }
  0xe4   :  { %v1148_v50 = vpop.f32.mrf.mxu3  ;;  %v1109_v17 = vadd.f32 %v1108_v49, %v1095_v1  ;;  %v1122_v52 = vpop.f32.mrf.mxu1  ;;  %v1135_v53 = vadd.f32 %v1134_v48, %v1121_v51  ;;  %v3672_v48 = vor.u32 %v4203_v42, %v3669_v46 }
  0xe6   :  { %v1123_v58 = vadd.f32 %v1122_v52, %v1109_v17  ;;  %v1149_v63 = vadd.f32 %v1148_v50, %v1135_v53  ;;  %1476 = vmatpush.bf16.msra.mxu3 %v3672_v48 }
  0xeb   :  { %v1136_v54 = vpop.f32.mrf.mxu2 }
  0xec   :  { %v1137_v55 = vadd.f32 %v1136_v54, %v1123_v58  ;;  %v1150_v43 = vpop.f32.mrf.mxu3 }
  0xee   :  { %v1151_v0 = vadd.f32 %v1150_v43, %v1137_v55 }
  0xf0   :  { %v1265_v5 = vpack.c.bf16 %v1151_v0, %v1149_v63 }
  0xf2   :  { %1435 = vmatmul.bf16.vlgmr.msra.gmra.mxu0 %v1265_v5  ;;  %1463 = vmatmul.bf16.vlgmr.msra.gmra.mxu2 %v1265_v5 }
  0xfb   :  { %v1162_v34 = vpop.f32.mrf.mxu0 }
  0xfc   :  { %v1176_v38 = vpop.f32.mrf.mxu1 }
  0xfd   :  { %v1177_v17 = vadd.f32 %v1176_v38, %v1162_v34 }
 0x103   :  { %v1190_v1 = vpop.f32.mrf.mxu2  ;;  %v1164_v50 = vpop.f32.mrf.mxu0 }
 0x104   :  { %v1204_v49 = vpop.f32.mrf.mxu3  ;;  %v1178_v51 = vpop.f32.mrf.mxu1  ;;  %v1191_v10 = vadd.f32 %v1190_v1, %v1177_v17 }
 0x105   :  { %v1179_v53 = vadd.f32 %v1178_v51, %v1164_v50  ;;  %v4234_v50 = vld [vmem:[#allocation10 + $0x74] sm:$0xf0] }
 0x106   :  { %v1205_v55 = vadd.f32 %v1204_v49, %v1191_v10  ;;  %v3787_v49 = vld [vmem:[#allocation10 + $0x70] sm:$0xf] }
 0x10b   :  { %v1192_v52 = vpop.f32.mrf.mxu2 }
 0x10c   :  { %v1206_v58 = vpop.f32.mrf.mxu3  ;;  %v1193_v44 = vadd.f32 %v1192_v52, %v1179_v53  ;;  %v3788_v53 = vor.u32 %v4234_v50, %v3787_v49 }
 0x10e   :  { %v1207_v47 = vadd.f32 %v1206_v58, %v1193_v44  ;;  %1825 = vmatpush.bf16.msrb.mxu0 %v3788_v53  ;;  %v4246_v53 = vld [vmem:[#allocation10 + $0xd4] sm:$0xf0] }
 0x11b   :  { %v1218_v54 = vpop.f32.mrf.mxu0 }
 0x11c   :  { %v1232_v39 = vpop.f32.mrf.mxu1  ;;  %v1219_v56 = vadd.f32 %v1218_v54, %v1205_v55 }
 0x11e   :  { %v1233_v61 = vadd.f32 %v1232_v39, %v1219_v56  ;;  %v3851_v56 = vld [vmem:[#allocation10 + $0xf0] sm:$0xf] }
 0x123   :  { %v1246_v43 = vpop.f32.mrf.mxu2  ;;  %v1220_v59 = vpop.f32.mrf.mxu0 }
 0x124   :  { %v1260_v57 = vpop.f32.mrf.mxu3  ;;  %v1221_v60 = vadd.f32 %v1220_v59, %v1207_v47  ;;  %v1234_v62 = vpop.f32.mrf.mxu1  ;;  %v1247_v63 = vadd.f32 %v1246_v43, %v1233_v61 }
 0x126   :  { %v1235_v0 = vadd.f32 %v1234_v62, %v1221_v60  ;;  %v1261_v5 = vadd.f32 %v1260_v57, %v1247_v63  ;;  %v4250_v57 = vld [vmem:[#allocation10 + $0xf4] sm:$0xf0] }
 0x127   :  { %v3852_v9 = vor.u32 %v4250_v57, %v3851_v56 }
 0x129   :  { %1839 = vmatpush.bf16.msrb.mxu1 %v3852_v9  ;;  %v4244_v9 = vld [vmem:[#allocation10 + $0xc4] sm:$0xf0] }
 0x12b   :  { %v1248_v2 = vpop.f32.mrf.mxu2 }
 0x12c   :  { %v1249_v3 = vadd.f32 %v1248_v2, %v1235_v0  ;;  %v1262_v4 = vpop.f32.mrf.mxu3 }
 0x12e   :  { %v1263_v6 = vadd.f32 %v1262_v4, %v1249_v3  ;;  %v4233_v4 = vld [vmem:[#allocation10 + $0x74] sm:$0xf] }
 0x130   :  { %v1266_v7 = vpack.c.bf16 %v1263_v6, %v1261_v5  ;;  %v3789_v5 = vld [vmem:[#allocation10 + $0x78] sm:$0xf0] }
 0x132   :  { %1449 = vmatmul.bf16.vlgmr.msra.gmra.mxu1 %v1266_v7  ;;  %1477 = vmatmul.bf16.vlgmr.msra.gmra.mxu3 %v1266_v7 }
 0x16f   :  { %v1436_v12 = vpop.f32.mrf.mxu0 }
 0x175   :  { %v1464_v20 = vpop.f32.mrf.mxu2 }
 0x177   :  { %v1438_v29 = vpop.f32.mrf.mxu0 }
 0x17d   :  { %v1466_v58 = vpop.f32.mrf.mxu2 }
 0x1af   :  { %v1450_v13 = vpop.f32.mrf.mxu1 }
 0x1b0   :  { %v4632_v15 = vadd.f32 %v1450_v13, %v1436_v12 }
 0x1b2   :  { %v1483_v16 = vrot.slane %v4632_v15, 4  ;;  %v1504_v18 = vmul.f32 %v4632_v15, %v4632_v15 }
 0x1b4   :  { %v1484_v21 = vadd.f32 %v1483_v16, %v4632_v15  ;;  %v1506_v22 = vrot.slane %v1504_v18, 4  ;;  %v4249_v16 = vld [vmem:[#allocation10 + $0xf4] sm:$0xf] }
 0x1b5   :  { %v1478_v23 = vpop.f32.mrf.mxu3 }
 0x1b6   :  { %v1485_v24 = vrot.slane %v1484_v21, 2  ;;  %v1507_v25 = vadd.f32 %v1506_v22, %v1504_v18  ;;  %v4638_v26 = vadd.f32 %v1478_v23, %v1464_v20  ;;  %v3853_v18 = vld [vmem:[#allocation10 + $0xf8] sm:$0xf0]  ;;  %v3792_v23 = vor.u32 %v4233_v4, %v3789_v5  ;;  %v3763_v4 = vld [vmem:[#allocation10 + $0x40] sm:$0xf] }
 0x1b7   :  { %v1452_v28 = vpop.f32.mrf.mxu1  ;;  %v3856_v50 = vor.u32 %v4249_v16, %v3853_v18  ;;  %v4228_v5 = vld [vmem:[#allocation10 + $0x44] sm:$0xf0]  ;;  %v3765_v16 = vld [vmem:[#allocation10 + $0x48] sm:$0xf0] }
 0x1b8   :  { %v1486_v30 = vadd.f32 %v1485_v24, %v1484_v21  ;;  %v1508_v31 = vrot.slane %v1507_v25, 2  ;;  %v1489_v32 = vrot.slane %v4638_v26, 4  ;;  %v1505_v33 = vmul.f32 %v4638_v26, %v4638_v26  ;;  %v4232_v24 = vld [vmem:[#allocation10 + $0x64] sm:$0xf0]  ;;  %1853 = vmatpush.bf16.msrb.mxu2 %v3792_v23  ;;  %v4243_v23 = vld [vmem:[#allocation10 + $0xc4] sm:$0xf] }
 0x1b9   :  { %v4643_v34 = vadd.f32 %v1452_v28, %v1438_v29  ;;  %1867 = vmatpush.bf16.msrb.mxu3 %v3856_v50 }
 0x1ba   :  { %v1487_v35 = vrot.slane %v1486_v30, 1  ;;  %v1509_v36 = vadd.f32 %v1508_v31, %v1507_v25  ;;  %v1490_v37 = vadd.f32 %v1489_v32, %v4638_v26  ;;  %v1512_v38 = vrot.slane %v1505_v33, 4  ;;  %v3843_v25 = vld [vmem:[#allocation10 + $0xe0] sm:$0xf]  ;;  %v4248_v31 = vld [vmem:[#allocation10 + $0xe4] sm:$0xf0] }
 0x1bb   :  { %v1577_v41 = vrot.slane %v4643_v34, 4  ;;  %v1591_v42 = vmul.f32 %v4643_v34, %v4643_v34  ;;  %v4231_v32 = vld [vmem:[#allocation10 + $0x64] sm:$0xf] }
 0x1bc   :  { %v1488_v45 = vadd.f32 %v1487_v35, %v1486_v30  ;;  %v1510_v46 = vrot.slane %v1509_v36, 1  ;;  %v1491_v48 = vrot.slane %v1490_v37, 2  ;;  %v1513_v1 = vadd.f32 %v1512_v38, %v1505_v33  ;;  %v3845_v38 = vld [vmem:[#allocation10 + $0xe8] sm:$0xf0] }
 0x1bd   :  { %v1578_v51 = vadd.f32 %v1577_v41, %v4643_v34  ;;  %v1593_v17 = vrot.slane %v1591_v42, 4  ;;  %v1480_v52 = vpop.f32.mrf.mxu3 }
 0x1be   :  { %v4653_v54 = vmul.f32 %v4646_v40, %v1488_v45  ;;  %v1511_v10 = vadd.f32 %v1510_v46, %v1509_v36  ;;  %v1492_v39 = vadd.f32 %v1491_v48, %v1490_v37  ;;  %v1514_v44 = vrot.slane %v1513_v1, 2  ;;  %v3781_v36 = vld [vmem:[#allocation10 + $0x68] sm:$0xf0]  ;;  %v4247_v37 = vld [vmem:[#allocation10 + $0xe4] sm:$0xf] }
 0x1bf   :  { %v1579_v55 = vrot.slane %v1578_v51, 2  ;;  %v1594_v43 = vadd.f32 %v1593_v17, %v1591_v42  ;;  %v4655_v47 = vadd.f32 %v1480_v52, %v1466_v58  ;;  %v3771_v48 = vld [vmem:[#allocation10 + $0x50] sm:$0xf]  ;;  %v3844_v17 = vor.u32 %v4248_v31, %v3843_v25 }
 0x1c0   :  { %v1518_v59 = vmul.f32 %v1511_v10, %v4646_v40  ;;  %v1520_v60 = vmul.f32 %v4653_v54, %v4653_v54  ;;  %v1493_v61 = vrot.slane %v1492_v39, 1  ;;  %v1515_v62 = vadd.f32 %v1514_v44, %v1513_v1  ;;  %v4230_v1 = vld [vmem:[#allocation10 + $0x54] sm:$0xf0]  ;;  %v3835_v52 = vld [vmem:[#allocation10 + $0xd0] sm:$0xf] }
 0x1c1   :  { %v1580_v63 = vadd.f32 %v1579_v55, %v1578_v51  ;;  %v1595_v0 = vrot.slane %v1594_v43, 2  ;;  %v1583_v2 = vrot.slane %v4655_v47, 4  ;;  %v1592_v3 = vmul.f32 %v4655_v47, %v4655_v47  ;;  %v4229_v55 = vld [vmem:[#allocation10 + $0x54] sm:$0xf]  ;;  %1840 = vmatpush.bf16.msrb.mxu1 %v3844_v17  ;;  %v3747_v17 = vld [vmem:[#allocation10 + $0x20] sm:$0xf] }
 0x1c2   :  { %v1522_v6 = vsub.f32 %v1518_v59, %v1520_v60  ;;  %v1494_v7 = vadd.f32 %v1493_v61, %v1492_v39  ;;  %v1516_v8 = vrot.slane %v1515_v62, 1  ;;  %v3780_v51 = vor.u32 %v4232_v24, %v3779_v19  ;;  %v4245_v61 = vld [vmem:[#allocation10 + $0xd4] sm:$0xf] }
 0x1c3   :  { %v1581_v11 = vrot.slane %v1580_v63, 1  ;;  %v1596_v12 = vadd.f32 %v1595_v0, %v1594_v43  ;;  %v1584_v13 = vadd.f32 %v1583_v2, %v4655_v47  ;;  %v1599_v14 = vrot.slane %v1592_v3, 4  ;;  %v3773_v43 = vld [vmem:[#allocation10 + $0x58] sm:$0xf0] }
 0x1c4   :  { %v4664_v20 = vadd.f32 1e-05, %v1522_v6  ;;  %v4667_v21 = vmul.f32 %v4646_v40, %v1494_v7  ;;  %v1517_v22 = vadd.f32 %v1516_v8, %v1515_v62  ;;  %1826 = vmatpush.bf16.msrb.mxu0 %v3780_v51  ;;  %v3784_v57 = vor.u32 %v4231_v32, %v3781_v36  ;;  %v3837_v62 = vld [vmem:[#allocation10 + $0xd8] sm:$0xf0]  ;;  %v3827_v8 = vld [vmem:[#allocation10 + $0xc0] sm:$0xf] }
 0x1c5   :  { %v1582_v27 = vadd.f32 %v1581_v11, %v1580_v63  ;;  %v1597_v28 = vrot.slane %v1596_v12, 1  ;;  %v1585_v29 = vrot.slane %v1584_v13, 2  ;;  %v1600_v30 = vadd.f32 %v1599_v14, %v1592_v3  ;;  %v4227_v14 = vld [vmem:[#allocation10 + $0x44] sm:$0xf]  ;;  %v4225_v36 = vld [vmem:[#allocation10 + $0x34] sm:$0xf] }
 0x1c6   :  { %4306 = vrsqrt.f32 %v4664_v20  ;;  %v1519_v33 = vmul.f32 %v1517_v22, %v4646_v40  ;;  %v1521_v35 = vmul.f32 %v4667_v21, %v4667_v21  ;;  %v3848_v59 = vor.u32 %v4247_v37, %v3845_v38  ;;  %1854 = vmatpush.bf16.msrb.mxu2 %v3784_v57  ;;  %v3757_v37 = vld [vmem:[#allocation10 + $0x38] sm:$0xf0]  ;;  %v3749_v57 = vld [vmem:[#allocation10 + $0x28] sm:$0xf0] }
 0x1c7   :  { %v4674_v41 = vmul.f32 %v1582_v27, %v4646_v40  ;;  %v1598_v42 = vadd.f32 %v1597_v28, %v1596_v12  ;;  %v1586_v45 = vadd.f32 %v1585_v29, %v1584_v13  ;;  %v1601_v46 = vrot.slane %v1600_v30, 2  ;;  %v3829_v28 = vld [vmem:[#allocation10 + $0xc8] sm:$0xf0]  ;;  %v3755_v29 = vld [vmem:[#allocation10 + $0x30] sm:$0xf] }
 0x1c8   :  { %v1523_v49 = vsub.f32 %v1519_v33, %v1521_v35  ;;  %v3772_v60 = vor.u32 %v4230_v1, %v3771_v48  ;;  %v3836_v3 = vor.u32 %v4246_v53, %v3835_v52  ;;  %v3776_v7 = vor.u32 %v4229_v55, %v3773_v43  ;;  %1868 = vmatpush.bf16.msrb.mxu3 %v3848_v59  ;;  %v3819_v33 = vld [vmem:[#allocation10 + $0xb0] sm:$0xf]  ;;  %v4242_v35 = vld [vmem:[#allocation10 + $0xb4] sm:$0xf0]  ;;  %v4241_v48 = vld [vmem:[#allocation10 + $0xb4] sm:$0xf] }
 0x1c9   :  { %v1605_v58 = vmul.f32 %v1598_v42, %v4646_v40  ;;  %v1607_v10 = vmul.f32 %v4674_v41, %v4674_v41  ;;  %v1587_v39 = vrot.slane %v1586_v45, 1  ;;  %v1602_v44 = vadd.f32 %v1601_v46, %v1600_v30  ;;  %v4226_v30 = vld [vmem:[#allocation10 + $0x34] sm:$0xf0]  ;;  %v3821_v1 = vld [vmem:[#allocation10 + $0xb8] sm:$0xf0] }
 0x1ca   :  { %v4679_v56 = vadd.f32 1e-05, %v1523_v49  ;;  %1827 = vmatpush.bf16.msrb.mxu0 %v3772_v60  ;;  %v3840_v19 = vor.u32 %v4245_v61, %v3837_v62  ;;  %v3764_v22 = vor.u32 %v4228_v5, %v3763_v4  ;;  %1841 = vmatpush.bf16.msrb.mxu1 %v3836_v3  ;;  %v3828_v27 = vor.u32 %v4244_v9, %v3827_v8  ;;  %v4224_v52 = vld [vmem:[#allocation10 + $0x24] sm:$0xf0]  ;;  %v4223_v43 = vld [vmem:[#allocation10 + $0x24] sm:$0xf] }
 0x1cb   :  { %v1609_v63 = vsub.f32 %v1605_v58, %v1607_v10  ;;  %v1588_v0 = vadd.f32 %v1587_v39, %v1586_v45  ;;  %v1603_v2 = vrot.slane %v1602_v44, 1  ;;  %1855 = vmatpush.bf16.msrb.mxu2 %v3776_v7  ;;  %v3768_v32 = vor.u32 %v4227_v14, %v3765_v16  ;;  %v3811_v10 = vld [vmem:[#allocation10 + $0xa0] sm:$0xf]  ;;  %v4240_v39 = vld [vmem:[#allocation10 + $0xa4] sm:$0xf0] }
 0x1cc   :  { %v4681_v6 = vpop.eup %4306  ;;  %4308 = vrsqrt.f32 %v4679_v56  ;;  %1869 = vmatpush.bf16.msrb.mxu3 %v3840_v19  ;;  %v3832_v45 = vor.u32 %v4243_v23, %v3829_v28  ;;  %v3756_v46 = vor.u32 %v4226_v30, %v3755_v29  ;;  %v3820_v51 = vor.u32 %v4242_v35, %v3819_v33  ;;  %v4239_v62 = vld [vmem:[#allocation10 + $0xa4] sm:$0xf]  ;;  %v3739_v4 = vld [vmem:[#allocation10 + $0x10] sm:$0xf]  ;;  %v4222_v5 = vld [vmem:[#allocation10 + $0x14] sm:$0xf0] }
 0x1cd   :  { %v1527_v11 = vmul.f32 %v4681_v6, %v4664_v20  ;;  %v4686_v12 = vadd.f32 1e-05, %v1609_v63  ;;  %v4689_v13 = vmul.f32 %v1588_v0, %v4646_v40  ;;  %v1604_v18 = vadd.f32 %v1603_v2, %v1602_v44  ;;  %v3813_v63 = vld [vmem:[#allocation10 + $0xa8] sm:$0xf0]  ;;  %v3803_v8 = vld [vmem:[#allocation10 + $0x90] sm:$0xf] }
 0x1ce   :  { %1828 = vmatpush.bf16.msrb.mxu0 %v3764_v22  ;;  %1842 = vmatpush.bf16.msrb.mxu1 %v3828_v27  ;;  %v3760_v58 = vor.u32 %v4225_v36, %v3757_v37  ;;  %v3824_v60 = vor.u32 %v4241_v48, %v3821_v1  ;;  %v3748_v61 = vor.u32 %v4224_v52, %v3747_v17  ;;  %v4238_v9 = vld [vmem:[#allocation10 + $0x94] sm:$0xf0]  ;;  %v4221_v16 = vld [vmem:[#allocation10 + $0x14] sm:$0xf]  ;;  %vm1542_vm2 = vweird.f32 %v4679_v56  ;;  %v3805_v28 = vld [vmem:[#allocation10 + $0x98] sm:$0xf0] }
 0x1cf   :  { %v1528_v24 = vmul.f32 %v4681_v6, %v1527_v11  ;;  %4310 = vrsqrt.f32 %v4686_v12  ;;  %v1608_v25 = vmul.f32 %v4689_v13, %v4689_v13  ;;  %v1606_v31 = vmul.f32 %v1604_v18, %v4646_v40  ;;  %1856 = vmatpush.bf16.msrb.mxu2 %v3768_v32  ;;  %v3741_v18 = vld [vmem:[#allocation10 + $0x18] sm:$0xf0]  ;;  %v4237_v23 = vld [vmem:[#allocation10 + $0x94] sm:$0xf]  ;;  %v3731_v29 = vld [vmem:[#allocation10] sm:$0xf] }
 0x1d0   :  { %1870 = vmatpush.bf16.msrb.mxu3 %v3832_v45  ;;  %v3812_v3 = vor.u32 %v4240_v39, %v3811_v10  ;;  %v3752_v7 = vor.u32 %v4223_v43, %v3749_v57  ;;  %v3816_v19 = vor.u32 %v4239_v62, %v3813_v63  ;;  %v3740_v22 = vor.u32 %v4222_v5, %v3739_v4  ;;  %v4220_v30 = vld [vmem:[#allocation10 + $0x4] sm:$0xf0]  ;;  %v3795_v33 = vld [vmem:[#allocation10 + $0x80] sm:$0xf]  ;;  %v4219_v45 = vld [vmem:[#allocation10 + $0x4] sm:$0xf] }
 0x1d1   :  { %v1610_v42 = vsub.f32 %v1606_v31, %v1608_v25  ;;  %v1529_v49 = vmul.f32 0.5, %v1528_v24  ;;  %vm1533_vm3 = vweird.f32 %v4681_v6  ;;  %v3804_v27 = vor.u32 %v4238_v9, %v3803_v8  ;;  %v4236_v35 = vld [vmem:[#allocation10 + $0x84] sm:$0xf0]  ;;  %v357_v48 = vld [vmem:[%s4980_s3] sm:$0x3] }
 0x1d2   :  { %v4696_v38 = vpop.eup %4308  ;;  %1829 = vmatpush.bf16.msrb.mxu0 %v3756_v46  ;;  %1843 = vmatpush.bf16.msrb.mxu1 %v3820_v51  ;;  %v3744_v32 = vor.u32 %v4221_v16, %v3741_v18  ;;  %vm1532_vm6 = vweird.f32 %v4664_v20  ;;  %v3733_v46 = vld [vmem:[#allocation10 + $0x8] sm:$0xf0]  ;;  %v3808_v1 = vor.u32 %v4237_v23, %v3805_v28  ;;  %v4235_v51 = vld [vmem:[#allocation10 + $0x84] sm:$0xf]  ;;  %vm1619_vm12 = vweird.f32 %v4686_v12 }
 0x1d3   :  { %v1537_v50 = vmul.f32 %v4696_v38, %v4679_v56  ;;  %v4700_v53 = vadd.f32 1e-05, %v1610_v42  ;;  %v1530_v0 = vsub.f32 1.5, %v1529_v49  ;;  %1857 = vmatpush.bf16.msrb.mxu2 %v3760_v58  ;;  %vm1543_vm1 = vweird.f32 %v4696_v38  ;;  %vm1534_vm7 = vmor %vm1532_vm6, %vm1533_vm3  ;;  %v3797_v17 = vld [vmem:[#allocation10 + $0x88] sm:$0xf0] }
 0x1d4   :  { %1871 = vmatpush.bf16.msrb.mxu3 %v3824_v60  ;;  %vm1544_vm4 = vmor %vm1542_vm2, %vm1543_vm1  ;;  %v3732_v49 = vor.u32 %v4220_v30, %v3731_v29  ;;  %v3736_v58 = vor.u32 %v4219_v45, %v3733_v46  ;;  %v3800_v43 = vor.u32 %v4235_v51, %v3797_v17 }
 0x1d5   :  { %v4702_v44 = vpop.eup %4310  ;;  %v1538_v55 = vmul.f32 %v4696_v38, %v1537_v50  ;;  %4312 = vrsqrt.f32 %v4700_v53  ;;  %v1531_v24 = vmul.f32 %v4681_v6, %v1530_v0  ;;  %v3796_v50 = vor.u32 %v4236_v35, %v3795_v33 }
 0x1d6   :  { %v1614_v59 = vmul.f32 %v4702_v44, %v4686_v12  ;;  %1830 = vmatpush.bf16.msrb.mxu0 %v3748_v61  ;;  %1844 = vmatpush.bf16.msrb.mxu1 %v3812_v3  ;;  %vm1620_vm9 = vweird.f32 %v4702_v44  ;;  %vm1629_vm10 = vweird.f32 %v4700_v53 }
 0x1d7   :  { %v1539_v2 = vmul.f32 0.5, %v1538_v55  ;;  %1858 = vmatpush.bf16.msrb.mxu2 %v3752_v7  ;;  %v1535_v20 = vsel %vm1534_vm7, %v4681_v6, %v1531_v24  ;;  %vm1621_vm13 = vmor %vm1619_vm12, %vm1620_vm9 }
 0x1d8   :  { %v1615_v14 = vmul.f32 %v4702_v44, %v1614_v59  ;;  %1872 = vmatpush.bf16.msrb.mxu3 %v3816_v19 }
 0x1d9   :  { %v1540_v11 = vsub.f32 1.5, %v1539_v2 }
 0x1da   :  { %v1616_v37 = vmul.f32 0.5, %v1615_v14  ;;  %1831 = vmatpush.bf16.msrb.mxu0 %v3740_v22  ;;  %1845 = vmatpush.bf16.msrb.mxu1 %v3804_v27 }
 0x1db   :  { %v1541_v25 = vmul.f32 %v4696_v38, %v1540_v11  ;;  %v4313_v31 = vpop.eup %4312  ;;  %1859 = vmatpush.bf16.msrb.mxu2 %v3744_v32 }
 0x1dc   :  { %v1624_v42 = vmul.f32 %v4313_v31, %v4700_v53  ;;  %v1617_v39 = vsub.f32 1.5, %v1616_v37  ;;  %1873 = vmatpush.bf16.msrb.mxu3 %v3808_v1  ;;  %vm1630_vm8 = vweird.f32 %v4313_v31 }
 0x1dd   :  { %v1545_v36 = vsel %vm1544_vm4, %v4696_v38, %v1541_v25  ;;  %vm1631_vm11 = vmor %vm1629_vm10, %vm1630_vm8 }
 0x1de   :  { %v1548_v56 = vrot.slane %v1545_v36, 7  ;;  %v1625_v38 = vmul.f32 %v4313_v31, %v1624_v42  ;;  %1832 = vmatpush.bf16.msrb.mxu0 %v3732_v49  ;;  %1846 = vmatpush.bf16.msrb.mxu1 %v3796_v50  ;;  %v1618_v61 = vmul.f32 %v4702_v44, %v1617_v39 }
 0x1df   :  { %1860 = vmatpush.bf16.msrb.mxu2 %v3736_v58 }
 0x1e0   :  { %v1550_v52 = vsel %vm1549_vm5, %v1535_v20, %v1548_v56  ;;  %v1626_v55 = vmul.f32 0.5, %v1625_v38  ;;  %1874 = vmatpush.bf16.msrb.mxu3 %v3800_v43  ;;  %v1622_v4 = vsel %vm1621_vm13, %v4702_v44, %v1618_v61 }
 0x1e1   :  { %v1552_v10 = vmul.f32 %v1550_v52, %v357_v48 }
 0x1e2   :  { %v1627_v59 = vsub.f32 1.5, %v1626_v55 }
 0x1e3   :  { %v1555_v57 = vperm.slane %v1552_v10, 1  ;;  %v1554_v6 = vperm.slane %v1552_v10, 0 }
 0x1e4   :  { %v1628_v62 = vmul.f32 %v4313_v31, %v1627_v59 }
 0x1e5   :  { %v1559_v60 = vmul.f32 %v1555_v57, %v4667_v21  ;;  %v1558_v3 = vmul.f32 %v1554_v6, %v4653_v54  ;;  %v358_v21 = vld [vmem:[#allocation8] sm:$0x3]  ;;  %v1567_v54 = vmul.f32 %v1555_v57, %v4638_v26  ;;  %v1566_v44 = vmul.f32 %v1554_v6, %v4632_v15 }
 0x1e6   :  { %v1632_v0 = vsel %vm1631_vm11, %v4313_v31, %v1628_v62 }
 0x1e7   :  { %v1562_v63 = vrot.slane %v1559_v60, 7  ;;  %v1635_v2 = vrot.slane %v1632_v0, 7  ;;  %v3915_v0 = vld [vmem:[#allocation11 + $0x70] sm:$0xf] }
 0x1e9   :  { %v1636_v5 = vsel %vm1549_vm5, %v1622_v4, %v1635_v2  ;;  %v1563_v7 = vsel %vm1549_vm5, %v1558_v3, %v1562_v63  ;;  %v4266_v2 = vld [vmem:[#allocation11 + $0x74] sm:$0xf0] }
 0x1ea   :  { %v1638_v8 = vmul.f32 %v1636_v5, %v357_v48  ;;  %v1565_v53 = vsub.f32 %v358_v21, %v1563_v7  ;;  %v3916_v5 = vor.u32 %v4266_v2, %v3915_v0  ;;  %v4282_v7 = vld [vmem:[#allocation11 + $0xf4] sm:$0xf0]  ;;  %v3963_v2 = vld [vmem:[#allocation11 + $0xd0] sm:$0xf] }
 0x1eb   :  { %v4262_v0 = vld [vmem:[#allocation11 + $0x54] sm:$0xf0] }
 0x1ec   :  { %v1641_v9 = vperm.slane %v1638_v8, 1  ;;  %v1640_v11 = vperm.slane %v1638_v8, 0  ;;  %v1569_v12 = vperm.slane %v1565_v53, 0  ;;  %v1570_v19 = vperm.slane %v1565_v53, 1  ;;  %2215 = vmatpush.bf16.msra.mxu0 %v3916_v5 }
 0x1ee   :  { %v1645_v14 = vmul.f32 %v1641_v9, %v4689_v13  ;;  %v1644_v18 = vmul.f32 %v1640_v11, %v4674_v41  ;;  %v1573_v24 = vadd.f32 %v1569_v12, %v1566_v44  ;;  %v1574_v25 = vadd.f32 %v1570_v19, %v1567_v54  ;;  %v4265_v44 = vld [vmem:[#allocation11 + $0x74] sm:$0xf] }
 0x1ef   :  { %v1653_v27 = vmul.f32 %v1641_v9, %v4655_v47  ;;  %v1652_v28 = vmul.f32 %v1640_v11, %v4643_v34 }
 0x1f0   :  { %v1648_v16 = vrot.slane %v1645_v14, 7  ;;  %v1575_v32 = vmax.f32 %v1573_v24, 0.0  ;;  %v1576_v33 = vmax.f32 %v1574_v25, 0.0 }
 0x1f2   :  { %v1649_v22 = vsel %vm1549_vm5, %v1644_v18, %v1648_v16 }
 0x1f3   :  { %v1651_v23 = vsub.f32 %v358_v21, %v1649_v22  ;;  %v3979_v21 = vld [vmem:[#allocation11 + $0xf0] sm:$0xf]  ;;  %v3917_v22 = vld [vmem:[#allocation11 + $0x78] sm:$0xf0] }
 0x1f4   :  { %v3980_v54 = vor.u32 %v4282_v7, %v3979_v21  ;;  %v4278_v7 = vld [vmem:[#allocation11 + $0xd4] sm:$0xf0] }
 0x1f5   :  { %v1655_v29 = vperm.slane %v1651_v23, 0  ;;  %v1656_v13 = vperm.slane %v1651_v23, 1 }
 0x1f6   :  { %2229 = vmatpush.bf16.msra.mxu1 %v3980_v54  ;;  %v3965_v54 = vld [vmem:[#allocation11 + $0xd8] sm:$0xf0] }
 0x1f7   :  { %v1659_v30 = vadd.f32 %v1655_v29, %v1652_v28  ;;  %v1660_v31 = vadd.f32 %v1656_v13, %v1653_v27 }
 0x1f9   :  { %v1661_v41 = vmax.f32 %v1659_v30, 0.0  ;;  %v1662_v35 = vmax.f32 %v1660_v31, 0.0  ;;  %v4281_v31 = vld [vmem:[#allocation11 + $0xf4] sm:$0xf] }
 0x1fb   :  { %v1663_v26 = vpack.c.bf16 %v1661_v41, %v1575_v32  ;;  %v1664_v36 = vpack.c.bf16 %v1662_v35, %v1576_v33  ;;  %v3981_v32 = vld [vmem:[#allocation11 + $0xf8] sm:$0xf0] }
 0x1fd   :  { %1833 = vmatmul.bf16.vlgmr.msrb.gmra.mxu0 %v1663_v26  ;;  %1847 = vmatmul.bf16.vlgmr.msrb.gmra.mxu1 %v1664_v36 }
 0x1fe   :  { %1861 = vmatmul.bf16.vlgmr.msrb.gmra.mxu2 %v1663_v26  ;;  %1875 = vmatmul.bf16.vlgmr.msrb.gmra.mxu3 %v1664_v36  ;;  %v3920_v26 = vor.u32 %v4265_v44, %v3917_v22 }
 0x200   :  { %2243 = vmatpush.bf16.msra.mxu2 %v3920_v26  ;;  %v4259_v26 = vld [vmem:[#allocation11 + $0x44] sm:$0xf] }
 0x27a   :  { %v1834_v15 = vpop.f32.mrf.mxu0  ;;  %v1848_v37 = vpop.f32.mrf.mxu1 }
 0x27b   :  { %v4744_v42 = vadd.f32 %v1848_v37, %v1834_v15 }
 0x27d   :  { %v1881_v34 = vrot.slane %v4744_v42, 4  ;;  %v1895_v47 = vmul.f32 %v4744_v42, %v4744_v42 }
 0x27f   :  { %v1882_v45 = vadd.f32 %v1881_v34, %v4744_v42  ;;  %v1897_v46 = vrot.slane %v1895_v47, 4 }
 0x281   :  { %v1883_v48 = vrot.slane %v1882_v45, 2  ;;  %v1898_v56 = vadd.f32 %v1897_v46, %v1895_v47  ;;  %v1862_v1 = vpop.f32.mrf.mxu2  ;;  %v1876_v49 = vpop.f32.mrf.mxu3  ;;  %v3907_v47 = vld [vmem:[#allocation11 + $0x60] sm:$0xf] }
 0x282   :  { %v4750_v20 = vadd.f32 %v1876_v49, %v1862_v1  ;;  %v1836_v38 = vpop.f32.mrf.mxu0  ;;  %v1850_v50 = vpop.f32.mrf.mxu1  ;;  %v3971_v46 = vld [vmem:[#allocation11 + $0xe0] sm:$0xf]  ;;  %v3984_v49 = vor.u32 %v4281_v31, %v3981_v32  ;;  %v4276_v31 = vld [vmem:[#allocation11 + $0xc4] sm:$0xf0] }
 0x283   :  { %v1884_v51 = vadd.f32 %v1883_v48, %v1882_v45  ;;  %v1899_v17 = vrot.slane %v1898_v56, 2  ;;  %v4752_v52 = vadd.f32 %v1850_v50, %v1836_v38  ;;  %v4264_v45 = vld [vmem:[#allocation11 + $0x64] sm:$0xf0] }
 0x284   :  { %v1887_v58 = vrot.slane %v4750_v20, 4  ;;  %v1896_v10 = vmul.f32 %v4750_v20, %v4750_v20  ;;  %v4280_v38 = vld [vmem:[#allocation11 + $0xe4] sm:$0xf0]  ;;  %2257 = vmatpush.bf16.msra.mxu3 %v3984_v49  ;;  %v3908_v5 = vor.u32 %v4264_v45, %v3907_v47 }
 0x285   :  { %v1885_v39 = vrot.slane %v1884_v51, 1  ;;  %v1900_v55 = vadd.f32 %v1899_v17, %v1898_v56  ;;  %v1967_v43 = vrot.slane %v4752_v52, 4  ;;  %v1981_v57 = vmul.f32 %v4752_v52, %v4752_v52 }
 0x286   :  { %v1888_v59 = vadd.f32 %v1887_v58, %v4750_v20  ;;  %v1903_v6 = vrot.slane %v1896_v10, 4  ;;  %v3972_v21 = vor.u32 %v4280_v38, %v3971_v46  ;;  %2216 = vmatpush.bf16.msra.mxu0 %v3908_v5 }
 0x287   :  { %v1886_v60 = vadd.f32 %v1885_v39, %v1884_v51  ;;  %v1901_v61 = vrot.slane %v1900_v55, 1  ;;  %v1968_v62 = vadd.f32 %v1967_v43, %v4752_v52  ;;  %v1983_v63 = vrot.slane %v1981_v57, 4  ;;  %v3909_v39 = vld [vmem:[#allocation11 + $0x68] sm:$0xf0] }
 0x288   :  { %v1889_v3 = vrot.slane %v1888_v59, 2  ;;  %v1904_v4 = vadd.f32 %v1903_v6, %v1896_v10  ;;  %v4263_v10 = vld [vmem:[#allocation11 + $0x64] sm:$0xf]  ;;  %v3899_v6 = vld [vmem:[#allocation11 + $0x50] sm:$0xf]  ;;  %2230 = vmatpush.bf16.msra.mxu1 %v3972_v21 }
 0x289   :  { %v4763_v8 = vmul.f32 %v1886_v60, %v4646_v40  ;;  %v1902_v9 = vadd.f32 %v1901_v61, %v1900_v55  ;;  %v1969_v53 = vrot.slane %v1968_v62, 2  ;;  %v1984_v11 = vadd.f32 %v1983_v63, %v1981_v57  ;;  %v1864_v14 = vpop.f32.mrf.mxu2  ;;  %v1878_v16 = vpop.f32.mrf.mxu3  ;;  %v4279_v57 = vld [vmem:[#allocation11 + $0xe4] sm:$0xf]  ;;  %v3939_v21 = vld [vmem:[#allocation11 + $0xa0] sm:$0xf] }
 0x28a   :  { %v1890_v12 = vadd.f32 %v1889_v3, %v1888_v59  ;;  %v1905_v18 = vrot.slane %v1904_v4, 2  ;;  %v4765_v19 = vadd.f32 %v1878_v16, %v1864_v14  ;;  %v3973_v59 = vld [vmem:[#allocation11 + $0xe8] sm:$0xf0] }
 0x28b   :  { %v1909_v23 = vmul.f32 %v1902_v9, %v4646_v40  ;;  %v1911_v24 = vmul.f32 %v4763_v8, %v4763_v8  ;;  %v1970_v25 = vadd.f32 %v1969_v53, %v1968_v62  ;;  %v1985_v27 = vrot.slane %v1984_v11, 2  ;;  %v4261_v9 = vld [vmem:[#allocation11 + $0x54] sm:$0xf]  ;;  %v3901_v53 = vld [vmem:[#allocation11 + $0x58] sm:$0xf0] }
 0x28c   :  { %v1891_v28 = vrot.slane %v1890_v12, 1  ;;  %v1906_v29 = vadd.f32 %v1905_v18, %v1904_v4  ;;  %v1973_v13 = vrot.slane %v4765_v19, 4  ;;  %v1982_v30 = vmul.f32 %v4765_v19, %v4765_v19  ;;  %v4277_v18 = vld [vmem:[#allocation11 + $0xd4] sm:$0xf] }
 0x28d   :  { %v1913_v41 = vsub.f32 %v1909_v23, %v1911_v24  ;;  %v1971_v33 = vrot.slane %v1970_v25, 1  ;;  %v1986_v35 = vadd.f32 %v1985_v27, %v1984_v11  ;;  %v3976_v22 = vor.u32 %v4279_v57, %v3973_v59  ;;  %v3891_v24 = vld [vmem:[#allocation11 + $0x40] sm:$0xf]  ;;  %v4257_v57 = vld [vmem:[#allocation11 + $0x34] sm:$0xf] }
 0x28e   :  { %v1892_v36 = vadd.f32 %v1891_v28, %v1890_v12  ;;  %v1907_v15 = vrot.slane %v1906_v29, 1  ;;  %v1974_v37 = vadd.f32 %v1973_v13, %v4765_v19  ;;  %v1989_v34 = vrot.slane %v1982_v30, 4  ;;  %v3955_v27 = vld [vmem:[#allocation11 + $0xc0] sm:$0xf]  ;;  %v3885_v59 = vld [vmem:[#allocation11 + $0x38] sm:$0xf0] }
 0x28f   :  { %v4774_v48 = vadd.f32 1e-05, %v1913_v41  ;;  %v1972_v56 = vadd.f32 %v1971_v33, %v1970_v25  ;;  %v1987_v1 = vrot.slane %v1986_v35, 1  ;;  %v3912_v12 = vor.u32 %v4263_v10, %v3909_v39  ;;  %v4260_v25 = vld [vmem:[#allocation11 + $0x44] sm:$0xf0]  ;;  %2258 = vmatpush.bf16.msra.mxu3 %v3976_v22 }
 0x290   :  { %v4777_v50 = vmul.f32 %v1892_v36, %v4646_v40  ;;  %v1908_v51 = vadd.f32 %v1907_v15, %v1906_v29  ;;  %v1975_v17 = vrot.slane %v1974_v37, 2  ;;  %v1990_v58 = vadd.f32 %v1989_v34, %v1982_v30  ;;  %v3893_v36 = vld [vmem:[#allocation11 + $0x48] sm:$0xf0] }
 0x291   :  { %4314 = vrsqrt.f32 %v4774_v48  ;;  %v4781_v55 = vmul.f32 %v1972_v56, %v4646_v40  ;;  %v1988_v43 = vadd.f32 %v1987_v1, %v1986_v35  ;;  %v3900_v23 = vor.u32 %v4262_v0, %v3899_v6  ;;  %2244 = vmatpush.bf16.msra.mxu2 %v3912_v12  ;;  %v3957_v34 = vld [vmem:[#allocation11 + $0xc8] sm:$0xf0]  ;;  %v3883_v56 = vld [vmem:[#allocation11 + $0x30] sm:$0xf]  ;;  %v4273_v6 = vld [vmem:[#allocation11 + $0xb4] sm:$0xf] }
 0x292   :  { %v1910_v60 = vmul.f32 %v1908_v51, %v4646_v40  ;;  %v1912_v61 = vmul.f32 %v4777_v50, %v4777_v50  ;;  %v1976_v62 = vadd.f32 %v1975_v17, %v1974_v37  ;;  %v1991_v63 = vrot.slane %v1990_v58, 2  ;;  %v4275_v37 = vld [vmem:[#allocation11 + $0xc4] sm:$0xf]  ;;  %v4258_v51 = vld [vmem:[#allocation11 + $0x34] sm:$0xf0] }
 0x293   :  { %v1995_v3 = vmul.f32 %v1988_v43, %v4646_v40  ;;  %v1997_v4 = vmul.f32 %v4781_v55, %v4781_v55  ;;  %v3964_v30 = vor.u32 %v4278_v7, %v3963_v2  ;;  %v3904_v33 = vor.u32 %v4261_v9, %v3901_v53  ;;  %2217 = vmatpush.bf16.msra.mxu0 %v3900_v23  ;;  %v3947_v17 = vld [vmem:[#allocation11 + $0xb0] sm:$0xf]  ;;  %v3875_v0 = vld [vmem:[#allocation11 + $0x20] sm:$0xf]  ;;  %v4256_v2 = vld [vmem:[#allocation11 + $0x24] sm:$0xf0] }
 0x294   :  { %v1914_v11 = vsub.f32 %v1910_v60, %v1912_v61  ;;  %v1977_v14 = vrot.slane %v1976_v62, 1  ;;  %v1992_v16 = vadd.f32 %v1991_v63, %v1990_v58  ;;  %v3968_v35 = vor.u32 %v4277_v18, %v3965_v54  ;;  %v4274_v58 = vld [vmem:[#allocation11 + $0xb4] sm:$0xf0]  ;;  %v3949_v60 = vld [vmem:[#allocation11 + $0xb8] sm:$0xf0] }
 0x295   :  { %v1999_v44 = vsub.f32 %v1995_v3, %v1997_v4  ;;  %2231 = vmatpush.bf16.msra.mxu1 %v3964_v30  ;;  %v3892_v46 = vor.u32 %v4260_v25, %v3891_v24  ;;  %2245 = vmatpush.bf16.msra.mxu2 %v3904_v33  ;;  %v3956_v49 = vor.u32 %v4276_v31, %v3955_v27  ;;  %v4272_v7 = vld [vmem:[#allocation11 + $0xa4] sm:$0xf0]  ;;  %v3877_v12 = vld [vmem:[#allocation11 + $0x28] sm:$0xf0]  ;;  %v4271_v54 = vld [vmem:[#allocation11 + $0xa4] sm:$0xf]  ;;  %vm1923_vm2 = vweird.f32 %v4774_v48 }
 0x296   :  { %v4789_v28 = vadd.f32 1e-05, %v1914_v11  ;;  %v1978_v29 = vadd.f32 %v1977_v14, %v1976_v62  ;;  %v1993_v13 = vrot.slane %v1992_v16, 1  ;;  %v3896_v38 = vor.u32 %v4259_v26, %v3893_v36  ;;  %2259 = vmatpush.bf16.msra.mxu3 %v3968_v35  ;;  %v3867_v25 = vld [vmem:[#allocation11 + $0x10] sm:$0xf] }
 0x297   :  { %v4791_v32 = vpop.eup %4314  ;;  %v4793_v41 = vadd.f32 1e-05, %v1999_v44  ;;  %v3960_v43 = vor.u32 %v4275_v37, %v3957_v34  ;;  %2218 = vmatpush.bf16.msra.mxu0 %v3892_v46  ;;  %v3884_v62 = vor.u32 %v4258_v51, %v3883_v56  ;;  %v3948_v63 = vor.u32 %v4274_v58, %v3947_v17  ;;  %v3941_v44 = vld [vmem:[#allocation11 + $0xa8] sm:$0xf0]  ;;  %v4270_v30 = vld [vmem:[#allocation11 + $0x94] sm:$0xf0] }
 0x298   :  { %v1918_v15 = vmul.f32 %v4791_v32, %v4774_v48  ;;  %4316 = vrsqrt.f32 %v4789_v28  ;;  %v4800_v47 = vmul.f32 %v1978_v29, %v4646_v40  ;;  %v1994_v45 = vadd.f32 %v1993_v13, %v1992_v16  ;;  %v4255_v16 = vld [vmem:[#allocation11 + $0x24] sm:$0xf]  ;;  %v4254_v29 = vld [vmem:[#allocation11 + $0x14] sm:$0xf0]  ;;  %v3931_v13 = vld [vmem:[#allocation11 + $0x90] sm:$0xf] }
 0x299   :  { %4318 = vrsqrt.f32 %v4793_v41  ;;  %2232 = vmatpush.bf16.msra.mxu1 %v3956_v49  ;;  %2246 = vmatpush.bf16.msra.mxu2 %v3896_v38  ;;  %v3888_v5 = vor.u32 %v4257_v57, %v3885_v59  ;;  %v3952_v14 = vor.u32 %v4273_v6, %v3949_v60  ;;  %v3876_v23 = vor.u32 %v4256_v2, %v3875_v0  ;;  %v4253_v26 = vld [vmem:[#allocation11 + $0x14] sm:$0xf]  ;;  %v3869_v36 = vld [vmem:[#allocation11 + $0x18] sm:$0xf0]  ;;  %v4252_v38 = vld [vmem:[#allocation11 + $0x4] sm:$0xf0] }
 0x29a   :  { %v1919_v1 = vmul.f32 %v4791_v32, %v1918_v15  ;;  %v1996_v10 = vmul.f32 %v1994_v45, %v4646_v40  ;;  %v1998_v39 = vmul.f32 %v4800_v47, %v4800_v47  ;;  %2260 = vmatpush.bf16.msra.mxu3 %v3960_v43  ;;  %v3940_v24 = vor.u32 %v4272_v7, %v3939_v21  ;;  %v4269_v37 = vld [vmem:[#allocation11 + $0x94] sm:$0xf]  ;;  %v3933_v34 = vld [vmem:[#allocation11 + $0x98] sm:$0xf0]  ;;  %v3923_v51 = vld [vmem:[#allocation11 + $0x80] sm:$0xf] }
 0x29b   :  { %2219 = vmatpush.bf16.msra.mxu0 %v3884_v62  ;;  %v3880_v27 = vor.u32 %v4255_v16, %v3877_v12  ;;  %v3944_v35 = vor.u32 %v4271_v54, %v3941_v44  ;;  %v3868_v46 = vor.u32 %v4254_v29, %v3867_v25  ;;  %v3932_v56 = vor.u32 %v4270_v30, %v3931_v13  ;;  %v4268_v17 = vld [vmem:[#allocation11 + $0x84] sm:$0xf0]  ;;  %v4251_v57 = vld [vmem:[#allocation11 + $0x4] sm:$0xf]  ;;  %v3861_v59 = vld [vmem:[#allocation11 + $0x8] sm:$0xf0] }
 0x29c   :  { %v2000_v61 = vsub.f32 %v1996_v10, %v1998_v39  ;;  %v1920_v4 = vmul.f32 0.5, %v1919_v1  ;;  %v3859_v1 = vld [vmem:[#allocation11] sm:$0xf]  ;;  %vm1924_vm15 = vweird.f32 %v4791_v32  ;;  %v3872_v49 = vor.u32 %v4253_v26, %v3869_v36  ;;  %v3925_v62 = vld [vmem:[#allocation11 + $0x88] sm:$0xf0] }
 0x29d   :  { %2233 = vmatpush.bf16.msra.mxu1 %v3948_v63  ;;  %2247 = vmatpush.bf16.msra.mxu2 %v3888_v5  ;;  %vm1933_vm0 = vweird.f32 %v4789_v28  ;;  %v3936_v43 = vor.u32 %v4269_v37, %v3933_v34  ;;  %v3860_v0 = vor.u32 %v4252_v38, %v3859_v1  ;;  %v359_v2 = vld [vmem:[%s4983_s6] sm:$0x3]  ;;  %vm1925_vm3 = vmor %vm1923_vm2, %vm1924_vm15  ;;  %v3864_v21 = vor.u32 %v4251_v57, %v3861_v59 }
 0x29e   :  { %v4806_v3 = vpop.eup %4316  ;;  %v4812_v11 = vadd.f32 1e-05, %v2000_v61  ;;  %v1921_v31 = vsub.f32 1.5, %v1920_v4  ;;  %2261 = vmatpush.bf16.msra.mxu3 %v3952_v14  ;;  %v4267_v61 = vld [vmem:[#allocation11 + $0x84] sm:$0xf]  ;;  %vm2009_vm9 = vweird.f32 %v4793_v41 }
 0x29f   :  { %v4808_v9 = vpop.eup %4318  ;;  %v1928_v53 = vmul.f32 %v4806_v3, %v4789_v28  ;;  %vm1934_vm14 = vweird.f32 %v4806_v3  ;;  %2220 = vmatpush.bf16.msra.mxu0 %v3876_v23  ;;  %v3924_v28 = vor.u32 %v4268_v17, %v3923_v51  ;;  %v3928_v48 = vor.u32 %v4267_v61, %v3925_v62  ;;  %v360_v30 = vld [vmem:[%s4984_s7] sm:$0x3] }
 0x2a0   :  { %v2004_v18 = vmul.f32 %v4808_v9, %v4793_v41  ;;  %4320 = vrsqrt.f32 %v4812_v11  ;;  %v1922_v10 = vmul.f32 %v4791_v32, %v1921_v31  ;;  %vm1935_vm1 = vmor %vm1933_vm0, %vm1934_vm14  ;;  %vm2010_vm6 = vweird.f32 %v4808_v9 }
 0x2a1   :  { %v1929_v22 = vmul.f32 %v4806_v3, %v1928_v53  ;;  %2234 = vmatpush.bf16.msra.mxu1 %v3940_v24  ;;  %2248 = vmatpush.bf16.msra.mxu2 %v3880_v27  ;;  %vm2019_vm7 = vweird.f32 %v4812_v11  ;;  %vm2011_vm10 = vmor %vm2009_vm9, %vm2010_vm6 }
 0x2a2   :  { %v2005_v15 = vmul.f32 %v4808_v9, %v2004_v18  ;;  %2262 = vmatpush.bf16.msra.mxu3 %v3944_v35  ;;  %v1926_v7 = vsel %vm1925_vm3, %v4791_v32, %v1922_v10 }
 0x2a3   :  { %v1930_v33 = vmul.f32 0.5, %v1929_v22  ;;  %2221 = vmatpush.bf16.msra.mxu0 %v3868_v46 }
 0x2a4   :  { %v2006_v6 = vmul.f32 0.5, %v2005_v15 }
 0x2a5   :  { %v1931_v45 = vsub.f32 1.5, %v1930_v33  ;;  %2235 = vmatpush.bf16.msra.mxu1 %v3932_v56  ;;  %2249 = vmatpush.bf16.msra.mxu2 %v3872_v49 }
 0x2a6   :  { %v4321_v58 = vpop.eup %4320  ;;  %2263 = vmatpush.bf16.msra.mxu3 %v3936_v43  ;;  %v2007_v53 = vsub.f32 1.5, %v2006_v6 }
 0x2a7   :  { %v1932_v39 = vmul.f32 %v4806_v3, %v1931_v45  ;;  %v2014_v60 = vmul.f32 %v4321_v58, %v4812_v11  ;;  %2222 = vmatpush.bf16.msra.mxu0 %v3860_v0  ;;  %vm2020_vm4 = vweird.f32 %v4321_v58 }
 0x2a8   :  { %v2008_v44 = vmul.f32 %v4808_v9, %v2007_v53  ;;  %vm2021_vm8 = vmor %vm2019_vm7, %vm2020_vm4 }
 0x2a9   :  { %v1936_v63 = vsel %vm1935_vm1, %v4806_v3, %v1932_v39  ;;  %v2015_v5 = vmul.f32 %v4321_v58, %v2014_v60  ;;  %2236 = vmatpush.bf16.msra.mxu1 %v3924_v28  ;;  %2250 = vmatpush.bf16.msra.mxu2 %v3864_v21 }
 0x2aa   :  { %v1939_v4 = vrot.slane %v1936_v63, 7  ;;  %2264 = vmatpush.bf16.msra.mxu3 %v3928_v48  ;;  %v2012_v29 = vsel %vm2011_vm10, %v4808_v9, %v2008_v44 }
 0x2ab   :  { %v2016_v14 = vmul.f32 0.5, %v2015_v5 }
 0x2ac   :  { %v1940_v3 = vsel %vm1549_vm5, %v1926_v7, %v1939_v4 }
 0x2ad   :  { %v1942_v16 = vmul.f32 %v1940_v3, %v359_v2  ;;  %v2017_v12 = vsub.f32 1.5, %v2016_v14 }
 0x2af   :  { %v1945_v18 = vperm.slane %v1942_v16, 1  ;;  %v1944_v54 = vperm.slane %v1942_v16, 0  ;;  %v2018_v32 = vmul.f32 %v4321_v58, %v2017_v12 }
 0x2b1   :  { %v1949_v22 = vmul.f32 %v1945_v18, %v4777_v50  ;;  %v2022_v23 = vsel %vm2021_vm8, %v4321_v58, %v2018_v32  ;;  %v1948_v27 = vmul.f32 %v1944_v54, %v4763_v8  ;;  %v1956_v9 = vmul.f32 %v1944_v54, %v4744_v42 }
 0x2b2   :  { %v2025_v25 = vrot.slane %v2022_v23, 7  ;;  %v1957_v34 = vmul.f32 %v1945_v18, %v4750_v20  ;;  %vm2459_vm8 = vcmask 64512  }
 0x2b3   :  { %v1952_v24 = vrot.slane %v1949_v22, 7 }
 0x2b4   :  { %v2026_v13 = vsel %vm1549_vm5, %v2012_v29, %v2025_v25 }
 0x2b5   :  { %v1953_v11 = vsel %vm1549_vm5, %v1948_v27, %v1952_v24  ;;  %v2028_v50 = vmul.f32 %v2026_v13, %v359_v2 }
 0x2b6   :  { %v1955_v33 = vsub.f32 %v360_v30, %v1953_v11 }
 0x2b7   :  { %v2031_v31 = vperm.slane %v2028_v50, 1  ;;  %v2030_v41 = vperm.slane %v2028_v50, 0 }
 0x2b8   :  { %v1959_v36 = vperm.slane %v1955_v33, 0  ;;  %v1960_v15 = vperm.slane %v1955_v33, 1 }
 0x2b9   :  { %v2035_v35 = vmul.f32 %v2031_v31, %v4800_v47  ;;  %v2034_v8 = vmul.f32 %v2030_v41, %v4781_v55  ;;  %v2043_v46 = vmul.f32 %v2031_v31, %v4765_v19  ;;  %v2042_v1 = vmul.f32 %v2030_v41, %v4752_v52 }
 0x2ba   :  { %v1963_v56 = vadd.f32 %v1959_v36, %v1956_v9  ;;  %v1964_v38 = vadd.f32 %v1960_v15, %v1957_v34 }
 0x2bb   :  { %v2038_v26 = vrot.slane %v2035_v35, 7 }
 0x2bc   :  { %v1965_v58 = vmax.f32 %v1963_v56, 0.0  ;;  %v1966_v10 = vmax.f32 %v1964_v38, 0.0 }
 0x2bd   :  { %v2039_v37 = vsel %vm1549_vm5, %v2034_v8, %v2038_v26 }
 0x2be   :  { %v2041_v45 = vsub.f32 %v360_v30, %v2039_v37 }
 0x2c0   :  { %v2045_v49 = vperm.slane %v2041_v45, 0  ;;  %v2046_v47 = vperm.slane %v2041_v45, 1 }
 0x2c2   :  { %v2049_v51 = vadd.f32 %v2045_v49, %v2042_v1  ;;  %v2050_v17 = vadd.f32 %v2046_v47, %v2043_v46 }
 0x2c4   :  { %v2051_v55 = vmax.f32 %v2049_v51, 0.0  ;;  %v2052_v39 = vmax.f32 %v2050_v17, 0.0 }
 0x2c6   :  { %v2053_v42 = vpack.c.bf16 %v2051_v55, %v1965_v58  ;;  %v2054_v43 = vpack.c.bf16 %v2052_v39, %v1966_v10 }
 0x2c8   :  { %2223 = vmatmul.bf16.vlgmr.msra.gmra.mxu0 %v2053_v42  ;;  %2237 = vmatmul.bf16.vlgmr.msra.gmra.mxu1 %v2054_v43 }
 0x2c9   :  { %2251 = vmatmul.bf16.vlgmr.msra.gmra.mxu2 %v2053_v42  ;;  %2265 = vmatmul.bf16.vlgmr.msra.gmra.mxu3 %v2054_v43 }
 0x345   :  { %v2224_v20 = vpop.f32.mrf.mxu0  ;;  %v2238_v19 = vpop.f32.mrf.mxu1 }
 0x346   :  { %v4855_v57 = vadd.f32 %v2238_v19, %v2224_v20 }
 0x348   :  { %v2271_v52 = vrot.slane %v4855_v57, 4  ;;  %v2285_v59 = vmul.f32 %v4855_v57, %v4855_v57 }
 0x34a   :  { %v2272_v6 = vadd.f32 %v2271_v52, %v4855_v57  ;;  %v2287_v60 = vrot.slane %v2285_v59, 4 }
 0x34c   :  { %v2273_v61 = vrot.slane %v2272_v6, 2  ;;  %v2288_v62 = vadd.f32 %v2287_v60, %v2285_v59  ;;  %v2252_v63 = vpop.f32.mrf.mxu2  ;;  %v2266_v0 = vpop.f32.mrf.mxu3 }
 0x34d   :  { %v4861_v28 = vadd.f32 %v2266_v0, %v2252_v63  ;;  %v2226_v2 = vpop.f32.mrf.mxu0  ;;  %v2240_v4 = vpop.f32.mrf.mxu1 }
 0x34e   :  { %v2289_v5 = vrot.slane %v2288_v62, 2  ;;  %v4863_v21 = vadd.f32 %v2240_v4, %v2226_v2  ;;  %v2274_v7 = vadd.f32 %v2273_v61, %v2272_v6 }
 0x34f   :  { %v2277_v48 = vrot.slane %v4861_v28, 4  ;;  %v2286_v3 = vmul.f32 %v4861_v28, %v4861_v28 }
 0x350   :  { %v2290_v53 = vadd.f32 %v2289_v5, %v2288_v62  ;;  %v2333_v14 = vrot.slane %v4863_v21, 4  ;;  %v2347_v16 = vmul.f32 %v4863_v21, %v4863_v21  ;;  %v2275_v12 = vrot.slane %v2274_v7, 1 }
 0x351   :  { %v2278_v18 = vadd.f32 %v2277_v48, %v4861_v28  ;;  %v2293_v54 = vrot.slane %v2286_v3, 4 }
 0x352   :  { %v2291_v44 = vrot.slane %v2290_v53, 1  ;;  %v2334_v32 = vadd.f32 %v2333_v14, %v4863_v21  ;;  %v2349_v22 = vrot.slane %v2347_v16, 4  ;;  %v2276_v23 = vadd.f32 %v2275_v12, %v2274_v7 }
 0x353   :  { %v2279_v24 = vrot.slane %v2278_v18, 2  ;;  %v2294_v25 = vadd.f32 %v2293_v54, %v2286_v3 }
 0x354   :  { %v2335_v27 = vrot.slane %v2334_v32, 2  ;;  %v2350_v29 = vadd.f32 %v2349_v22, %v2347_v16  ;;  %v2254_v13 = vpop.f32.mrf.mxu2  ;;  %v2268_v30 = vpop.f32.mrf.mxu3  ;;  %v4874_v11 = vmul.f32 %v2276_v23, %v4646_v40  ;;  %v2292_v50 = vadd.f32 %v2291_v44, %v2290_v53 }
 0x355   :  { %v2280_v31 = vadd.f32 %v2279_v24, %v2278_v18  ;;  %v2295_v33 = vrot.slane %v2294_v25, 2  ;;  %v4876_v41 = vadd.f32 %v2268_v30, %v2254_v13 }
 0x356   :  { %v2336_v35 = vadd.f32 %v2335_v27, %v2334_v32  ;;  %v2351_v26 = vrot.slane %v2350_v29, 2  ;;  %v2299_v36 = vmul.f32 %v2292_v50, %v4646_v40  ;;  %v2301_v8 = vmul.f32 %v4874_v11, %v4874_v11 }
 0x357   :  { %v2281_v15 = vrot.slane %v2280_v31, 1  ;;  %v2296_v9 = vadd.f32 %v2295_v33, %v2294_v25  ;;  %v2339_v37 = vrot.slane %v4876_v41, 4  ;;  %v2348_v34 = vmul.f32 %v4876_v41, %v4876_v41 }
 0x358   :  { %v2337_v45 = vrot.slane %v2336_v35, 1  ;;  %v2352_v46 = vadd.f32 %v2351_v26, %v2350_v29  ;;  %v2303_v56 = vsub.f32 %v2299_v36, %v2301_v8 }
 0x359   :  { %v2282_v1 = vadd.f32 %v2281_v15, %v2280_v31  ;;  %v2297_v49 = vrot.slane %v2296_v9, 1  ;;  %v2340_v38 = vadd.f32 %v2339_v37, %v4876_v41  ;;  %v2355_v47 = vrot.slane %v2348_v34, 4 }
 0x35a   :  { %v2338_v51 = vadd.f32 %v2337_v45, %v2336_v35  ;;  %v2353_v17 = vrot.slane %v2352_v46, 1  ;;  %v2305_v58 = vadd.f32 1e-05, %v2303_v56 }
 0x35b   :  { %v4886_v55 = vmul.f32 %v2282_v1, %v4646_v40  ;;  %v2298_v10 = vadd.f32 %v2297_v49, %v2296_v9  ;;  %v2341_v39 = vrot.slane %v2340_v38, 2  ;;  %v2356_v42 = vadd.f32 %v2355_v47, %v2348_v34 }
 0x35c   :  { %v4889_v43 = vmul.f32 %v2338_v51, %v4646_v40  ;;  %v2354_v20 = vadd.f32 %v2353_v17, %v2352_v46  ;;  %4322 = vrsqrt.f32 %v2305_v58  ;;  %vm2313_vm12 = vweird.f32 %v2305_v58 }
 0x35d   :  { %v2300_v19 = vmul.f32 %v2298_v10, %v4646_v40  ;;  %v2302_v52 = vmul.f32 %v4886_v55, %v4886_v55  ;;  %v2342_v59 = vadd.f32 %v2341_v39, %v2340_v38  ;;  %v2357_v6 = vrot.slane %v2356_v42, 2 }
 0x35e   :  { %v2361_v60 = vmul.f32 %v2354_v20, %v4646_v40  ;;  %v2363_v61 = vmul.f32 %v4889_v43, %v4889_v43 }
 0x35f   :  { %v2304_v62 = vsub.f32 %v2300_v19, %v2302_v52  ;;  %v2343_v63 = vrot.slane %v2342_v59, 1  ;;  %v2358_v0 = vadd.f32 %v2357_v6, %v2356_v42 }
 0x360   :  { %v2365_v2 = vsub.f32 %v2361_v60, %v2363_v61 }
 0x361   :  { %v2306_v4 = vadd.f32 1e-05, %v2304_v62  ;;  %v2344_v5 = vadd.f32 %v2343_v63, %v2342_v59  ;;  %v2359_v7 = vrot.slane %v2358_v0, 1 }
 0x362   :  { %v4323_v48 = vpop.eup %4322  ;;  %v2367_v3 = vadd.f32 1e-05, %v2365_v2 }
 0x363   :  { %4324 = vrsqrt.f32 %v2306_v4  ;;  %v2346_v53 = vmul.f32 %v2344_v5, %v4646_v40  ;;  %v2360_v14 = vadd.f32 %v2359_v7, %v2358_v0  ;;  %v2308_v16 = vmul.f32 %v4323_v48, %v2305_v58 }
 0x364   :  { %4326 = vrsqrt.f32 %v2367_v3  ;;  %vm2314_vm11 = vweird.f32 %v4323_v48  ;;  %vm2375_vm15 = vweird.f32 %v2367_v3  ;;  %vm2323_vm2 = vweird.f32 %v2306_v4 }
 0x365   :  { %v2362_v12 = vmul.f32 %v2360_v14, %v4646_v40  ;;  %v2364_v18 = vmul.f32 %v2346_v53, %v2346_v53  ;;  %v2309_v54 = vmul.f32 %v4323_v48, %v2308_v16  ;;  %vm2315_vm13 = vmor %vm2313_vm12, %vm2314_vm11 }
 0x367   :  { %v2366_v44 = vsub.f32 %v2362_v12, %v2364_v18  ;;  %v2310_v32 = vmul.f32 0.5, %v2309_v54 }
 0x369   :  { %v4325_v22 = vpop.eup %4324  ;;  %v2368_v23 = vadd.f32 1e-05, %v2366_v44  ;;  %v2311_v27 = vsub.f32 1.5, %v2310_v32 }
 0x36a   :  { %v4327_v24 = vpop.eup %4326  ;;  %v2318_v25 = vmul.f32 %v4325_v22, %v2306_v4  ;;  %vm2324_vm0 = vweird.f32 %v4325_v22 }
 0x36b   :  { %v2370_v29 = vmul.f32 %v4327_v24, %v2367_v3  ;;  %4328 = vrsqrt.f32 %v2368_v23  ;;  %v2312_v30 = vmul.f32 %v4323_v48, %v2311_v27  ;;  %vm2376_vm14 = vweird.f32 %v4327_v24  ;;  %vm2325_vm3 = vmor %vm2323_vm2, %vm2324_vm0 }
 0x36c   :  { %v2319_v13 = vmul.f32 %v4325_v22, %v2318_v25  ;;  %vm2377_vm1 = vmor %vm2375_vm15, %vm2376_vm14  ;;  %vm2385_vm6 = vweird.f32 %v2368_v23 }
 0x36d   :  { %v2371_v50 = vmul.f32 %v4327_v24, %v2370_v29  ;;  %v2316_v33 = vsel %vm2315_vm13, %v4323_v48, %v2312_v30 }
 0x36e   :  { %v2320_v31 = vmul.f32 0.5, %v2319_v13  ;;  %v2327_v35 = vmul.f32 %v2316_v33, %v4855_v57  ;;  %v2329_v26 = vmul.f32 %v2316_v33, %v4874_v11 }
 0x36f   :  { %v2372_v40 = vmul.f32 0.5, %v2371_v50 }
 0x370   :  { %v2321_v36 = vsub.f32 1.5, %v2320_v31  ;;  %v2331_v9 = vsub.f32 %v2327_v35, %v2329_v26 }
 0x371   :  { %v4329_v8 = vpop.eup %4328  ;;  %v2373_v15 = vsub.f32 1.5, %v2372_v40 }
 0x372   :  { %v2380_v37 = vmul.f32 %v4329_v8, %v2368_v23  ;;  %2395 = vxpose.xlu0.b32.start.end [1/1] (short) %v2331_v9, 128  ;;  %v2322_v45 = vmul.f32 %v4325_v22, %v2321_v36  ;;  %vm2386_vm4 = vweird.f32 %v4329_v8 }
 0x373   :  { %v2374_v34 = vmul.f32 %v4327_v24, %v2373_v15  ;;  %vm2387_vm7 = vmor %vm2385_vm6, %vm2386_vm4 }
 0x374   :  { %v2381_v46 = vmul.f32 %v4329_v8, %v2380_v37  ;;  %v2326_v49 = vsel %vm2325_vm3, %v4325_v22, %v2322_v45 }
 0x375   :  { %v2378_v56 = vsel %vm2377_vm1, %v4327_v24, %v2374_v34  ;;  %v2328_v58 = vmul.f32 %v2326_v49, %v4861_v28  ;;  %v2330_v10 = vmul.f32 %v2326_v49, %v4886_v55 }
 0x376   :  { %v2389_v1 = vmul.f32 %v2378_v56, %v4863_v21  ;;  %v2382_v57 = vmul.f32 0.5, %v2381_v46  ;;  %v2391_v11 = vmul.f32 %v2378_v56, %v4889_v43 }
 0x377   :  { %v2332_v19 = vsub.f32 %v2328_v58, %v2330_v10 }
 0x378   :  { %v2383_v38 = vsub.f32 1.5, %v2382_v57  ;;  %v2393_v47 = vsub.f32 %v2389_v1, %v2391_v11 }
 0x37a   :  { %v2384_v51 = vmul.f32 %v4329_v8, %v2383_v38  ;;  %v2846_v17 = vmul.f32 %v2393_v47, %v2331_v9  ;;  %2571 = vmatpush.msrb.mxu0 %v2393_v47  ;;  %4283 = vmatpush.msrb.mxu2 %v2393_v47 }
 0x37c   :  { %v2388_v39 = vsel %vm2387_vm7, %v4329_v8, %v2384_v51  ;;  %v2848_v21 = vrot.slane %v2846_v17, 4 }
 0x37d   :  { %v2390_v42 = vmul.f32 %v2388_v39, %v4876_v41  ;;  %v2392_v43 = vmul.f32 %v2388_v39, %v2346_v53 }
 0x37e   :  { %v2849_v20 = vadd.f32 %v2848_v21, %v2846_v17 }
 0x37f   :  { %v2394_v52 = vsub.f32 %v2390_v42, %v2392_v43 }
 0x380   :  { %v2850_v59 = vrot.slane %v2849_v20, 2 }
 0x381   :  { %2684 = vmatpush.msrb.mxu1 %v2394_v52  ;;  %4284 = vmatpush.msrb.mxu3 %v2394_v52  ;;  %v2847_v6 = vmul.f32 %v2394_v52, %v2332_v19 }
 0x382   :  { %v2851_v60 = vadd.f32 %v2850_v59, %v2849_v20 }
 0x383   :  { %v2854_v61 = vrot.slane %v2847_v6, 4 }
 0x384   :  { %v2852_v62 = vrot.slane %v2851_v60, 1 }
 0x385   :  { %v2855_v63 = vadd.f32 %v2854_v61, %v2847_v6 }
 0x386   :  { %v2853_v28 = vadd.f32 %v2852_v62, %v2851_v60 }
 0x387   :  { %v2856_v0 = vrot.slane %v2855_v63, 2 }
 0x388   :  { %v2860_v2 = vmul.f32 0.0009765625, %v2853_v28 }
 0x389   :  { %v2857_v55 = vadd.f32 %v2856_v0, %v2855_v63 }
 0x38a   :  { %v4049_v7 = vadd.f32 -1.0, %v2860_v2  ;;  %v3016_v48 = vmul.f32 %v2860_v2, %v2860_v2 }
 0x38b   :  { %v2858_v4 = vrot.slane %v2857_v55, 1 }
 0x38c   :  { %v2864_v14 = vmul.f32 %v4049_v7, %v4049_v7  ;;  %v3018_v16 = vsel %vm1549_vm5, %v3016_v48, 0.0 }
 0x38d   :  { %v2859_v5 = vadd.f32 %v2858_v4, %v2857_v55 }
 0x38e   :  { %v2866_v44 = vsel %vm1549_vm5, %v2864_v14, 0.0 }
 0x38f   :  { %v2861_v41 = vmul.f32 0.0009765625, %v2859_v5 }
 0x391   :  { %v3017_v3 = vmul.f32 %v2861_v41, %v2861_v41  ;;  %v4050_v53 = vadd.f32 -1.0, %v2861_v41 }
 0x393   :  { %v3019_v12 = vsel %vm1549_vm5, %v3017_v3, 0.0  ;;  %v2865_v18 = vmul.f32 %v4050_v53, %v4050_v53 }
 0x394   :  { %v3020_v54 = vadd.f32 %v3019_v12, %v3018_v16 }
 0x395   :  { %v2867_v32 = vsel %vm1549_vm5, %v2865_v18, 0.0  ;;  %vm3035_vm5 = vcmask 0  }
 0x396   :  { %3021 = vadd.xlane.f32.xlu2 %v3020_v54  ;;  %v2868_v22 = vadd.f32 %v2867_v32, %v2866_v44 }
 0x398   :  { %2869 = vadd.xlane.f32.xlu1 %v2868_v22 }
 0x3f2   :  { %2427 = vxpose.xlu0.b32.start.end [1/1] (short) %v2332_v19, 128 }
 0x40b   :  { %v2870_v23 = vpop.xlane.xlu1 %2869 }
 0x40c   :  { %v2871_v24 = vrot.slane %v2870_v23, 4 }
 0x40e   :  { %v2872_v25 = vadd.f32 %v2871_v24, %v2870_v23 }
 0x410   :  { %v2873_v27 = vrot.slane %v2872_v25, 2 }
 0x412   :  { %v2874_v29 = vadd.f32 %v2873_v27, %v2872_v25 }
 0x414   :  { %v2875_v13 = vrot.slane %v2874_v29, 1 }
 0x416   :  { %v2876_v30 = vadd.f32 %v2875_v13, %v2874_v29  ;;  %v2411_v50 = vpop.trf.xlu0 }
 0x417   :  { %3985 = vmatmul.msk.f32.vlgmr.msrb.gmra.mxu0 %vm2459_vm8, %v2411_v50  ;;  %4017 = vmatmul.msk.f32.vlgmr.msrb.gmra.mxu1 %vm2459_vm8, %v2411_v50 }
 0x418   :  { %4285 = vpush %v2876_v30 }
 0x41e   :  { %v2412_v31 = vpop.trf.xlu0 }
 0x41f   :  { %3986 = vmatmul.msk.f32.gmra.mxu0 %vm2459_vm8, %v2412_v31  ;;  %4018 = vmatmul.msk.f32.gmra.mxu1 %vm2459_vm8, %v2412_v31 }
 0x426   :  { %v2413_v33 = vpop.trf.xlu0 }
 0x427   :  { %3987 = vmatmul.msk.f32.gmra.mxu0 %vm2459_vm8, %v2413_v33  ;;  %4019 = vmatmul.msk.f32.gmra.mxu1 %vm2459_vm8, %v2413_v33 }
 0x42e   :  { %v2414_v40 = vpop.trf.xlu0 }
 0x42f   :  { %3988 = vmatmul.msk.f32.gmra.mxu0 %vm2459_vm8, %v2414_v40  ;;  %4020 = vmatmul.msk.f32.gmra.mxu1 %vm2459_vm8, %v2414_v40 }
 0x436   :  { %v2415_v35 = vpop.trf.xlu0 }
 0x437   :  { %3989 = vmatmul.msk.f32.gmra.mxu0 %vm2459_vm8, %v2415_v35  ;;  %4021 = vmatmul.msk.f32.gmra.mxu1 %vm2459_vm8, %v2415_v35 }
 0x43e   :  { %v2416_v26 = vpop.trf.xlu0 }
 0x43f   :  { %3990 = vmatmul.msk.f32.gmra.mxu0 %vm2459_vm8, %v2416_v26  ;;  %4022 = vmatmul.msk.f32.gmra.mxu1 %vm2459_vm8, %v2416_v26 }
 0x446   :  { %v2417_v36 = vpop.trf.xlu0 }
 0x447   :  { %3991 = vmatmul.msk.f32.gmra.mxu0 %vm2459_vm8, %v2417_v36  ;;  %4023 = vmatmul.msk.f32.gmra.mxu1 %vm2459_vm8, %v2417_v36 }
 0x449   :  { %s4286_s7 = spop %4285 }
 0x44e   :  { %v2418_v8 = vpop.trf.xlu0 }
 0x44f   :  { %3992 = vmatmul.msk.f32.gmra.mxu0 %vm2459_vm8, %v2418_v8  ;;  %4024 = vmatmul.msk.f32.gmra.mxu1 %vm2459_vm8, %v2418_v8 }
 0x456   :  { %v2419_v15 = vpop.trf.xlu0 }
 0x457   :  { %3993 = vmatmul.msk.f32.gmra.mxu0 %vm2459_vm8, %v2419_v15  ;;  %4025 = vmatmul.msk.f32.gmra.mxu1 %vm2459_vm8, %v2419_v15 }
 0x45e   :  { %v2420_v9 = vpop.trf.xlu0 }
 0x45f   :  { %3994 = vmatmul.msk.f32.gmra.mxu0 %vm2459_vm8, %v2420_v9  ;;  %4026 = vmatmul.msk.f32.gmra.mxu1 %vm2459_vm8, %v2420_v9 }
 0x466   :  { %v2421_v37 = vpop.trf.xlu0 }
 0x467   :  { %3995 = vmatmul.msk.f32.gmra.mxu0 %vm2459_vm8, %v2421_v37  ;;  %4027 = vmatmul.msk.f32.gmra.mxu1 %vm2459_vm8, %v2421_v37 }
 0x46e   :  { %v2422_v34 = vpop.trf.xlu0 }
 0x46f   :  { %3996 = vmatmul.msk.f32.gmra.mxu0 %vm2459_vm8, %v2422_v34  ;;  %4028 = vmatmul.msk.f32.gmra.mxu1 %vm2459_vm8, %v2422_v34 }
 0x476   :  { %v2423_v45 = vpop.trf.xlu0 }
 0x477   :  { %3997 = vmatmul.msk.f32.gmra.mxu0 %vm2459_vm8, %v2423_v45  ;;  %4029 = vmatmul.msk.f32.gmra.mxu1 %vm2459_vm8, %v2423_v45 }
 0x47e   :  { %v2424_v46 = vpop.trf.xlu0 }
 0x47f   :  { %3998 = vmatmul.msk.f32.gmra.mxu0 %vm2459_vm8, %v2424_v46  ;;  %4030 = vmatmul.msk.f32.gmra.mxu1 %vm2459_vm8, %v2424_v46 }
 0x486   :  { %v2425_v56 = vpop.trf.xlu0 }
 0x487   :  { %3999 = vmatmul.msk.f32.gmra.mxu0 %vm2459_vm8, %v2425_v56  ;;  %4031 = vmatmul.msk.f32.gmra.mxu1 %vm2459_vm8, %v2425_v56 }
 0x48e   :  { %v2426_v1 = vpop.trf.xlu0 }
 0x48f   :  { %4000 = vmatmul.msk.f32.gmra.mxu0 %vm2459_vm8, %v2426_v1  ;;  %4032 = vmatmul.msk.f32.gmra.mxu1 %vm2459_vm8, %v2426_v1 }
 0x494   :  { %v2573_v57 = vpop.f32.mrf.mxu0  ;;  %v2686_v49 = vpop.f32.mrf.mxu1 }
 0x495   :  { %v2782_v0 = vmul.f32 0.0009765625, %v2573_v57  ;;  %v2783_v55 = vmul.f32 0.0009765625, %v2686_v49 }
 0x496   :  { %v2443_v11 = vpop.trf.xlu0 }
 0x497   :  { %4001 = vmatmul.msk.f32.vlgmr.msrb.gmra.mxu2 %vm2459_vm8, %v2443_v11  ;;  %4033 = vmatmul.msk.f32.vlgmr.msrb.gmra.mxu3 %vm2459_vm8, %v2443_v11  ;;  %v2879_v5 = vmul.f32 %v2782_v0, %v2782_v0  ;;  %v2880_v7 = vmul.f32 %v2783_v55, %v2783_v55 }
 0x499   :  { %v2943_v3 = vadd.f32 %v2880_v7, %v2879_v5 }
 0x49c   :  { %v2576_v47 = vpop.f32.mrf.mxu0  ;;  %v2689_v51 = vpop.f32.mrf.mxu1 }
 0x49d   :  { %v2784_v2 = vmul.f32 0.0009765625, %v2576_v47  ;;  %v2785_v53 = vmul.f32 0.0009765625, %v2689_v51 }
 0x49e   :  { %v2444_v38 = vpop.trf.xlu0 }
 0x49f   :  { %4002 = vmatmul.msk.f32.gmra.mxu2 %vm2459_vm8, %v2444_v38  ;;  %4034 = vmatmul.msk.f32.gmra.mxu3 %vm2459_vm8, %v2444_v38  ;;  %v2881_v48 = vmul.f32 %v2784_v2, %v2784_v2  ;;  %v2882_v18 = vmul.f32 %v2785_v53, %v2785_v53 }
 0x4a1   :  { %v2944_v12 = vadd.f32 %v2943_v3, %v2881_v48 }
 0x4a3   :  { %v2945_v22 = vadd.f32 %v2944_v12, %v2882_v18 }
 0x4a4   :  { %v2579_v58 = vpop.f32.mrf.mxu0  ;;  %v2692_v39 = vpop.f32.mrf.mxu1 }
 0x4a5   :  { %v2786_v14 = vmul.f32 0.0009765625, %v2579_v58  ;;  %v2787_v23 = vmul.f32 0.0009765625, %v2692_v39 }
 0x4a6   :  { %v2445_v17 = vpop.trf.xlu0 }
 0x4a7   :  { %4003 = vmatmul.msk.f32.gmra.mxu2 %vm2459_vm8, %v2445_v17  ;;  %4035 = vmatmul.msk.f32.gmra.mxu3 %vm2459_vm8, %v2445_v17  ;;  %v2883_v54 = vmul.f32 %v2786_v14, %v2786_v14  ;;  %v2884_v27 = vmul.f32 %v2787_v23, %v2787_v23 }
 0x4a9   :  { %v2946_v25 = vadd.f32 %v2945_v22, %v2883_v54 }
 0x4ab   :  { %v2947_v30 = vadd.f32 %v2946_v25, %v2884_v27 }
 0x4ac   :  { %v2582_v21 = vpop.f32.mrf.mxu0  ;;  %v2695_v43 = vpop.f32.mrf.mxu1 }
 0x4ad   :  { %v2788_v24 = vmul.f32 0.0009765625, %v2582_v21  ;;  %v2789_v50 = vmul.f32 0.0009765625, %v2695_v43 }
 0x4ae   :  { %v2446_v10 = vpop.trf.xlu0 }
 0x4af   :  { %4004 = vmatmul.msk.f32.gmra.mxu2 %vm2459_vm8, %v2446_v10  ;;  %4036 = vmatmul.msk.f32.gmra.mxu3 %vm2459_vm8, %v2446_v10  ;;  %v2885_v29 = vmul.f32 %v2788_v24, %v2788_v24  ;;  %v2886_v26 = vmul.f32 %v2789_v50, %v2789_v50 }
 0x4b1   :  { %v2948_v40 = vadd.f32 %v2947_v30, %v2885_v29 }
 0x4b3   :  { %v2949_v8 = vadd.f32 %v2948_v40, %v2886_v26 }
 0x4b4   :  { %v2585_v20 = vpop.f32.mrf.mxu0  ;;  %v2698_v52 = vpop.f32.mrf.mxu1 }
 0x4b5   :  { %v2790_v31 = vmul.f32 0.0009765625, %v2585_v20  ;;  %v2791_v15 = vmul.f32 0.0009765625, %v2698_v52 }
 0x4b6   :  { %v2447_v42 = vpop.trf.xlu0 }
 0x4b7   :  { %4005 = vmatmul.msk.f32.gmra.mxu2 %vm2459_vm8, %v2447_v42  ;;  %4037 = vmatmul.msk.f32.gmra.mxu3 %vm2459_vm8, %v2447_v42  ;;  %v2887_v36 = vmul.f32 %v2790_v31, %v2790_v31  ;;  %v2888_v46 = vmul.f32 %v2791_v15, %v2791_v15 }
 0x4b9   :  { %v2950_v37 = vadd.f32 %v2949_v8, %v2887_v36 }
 0x4bb   :  { %v2951_v1 = vadd.f32 %v2950_v37, %v2888_v46 }
 0x4bc   :  { %v2588_v6 = vpop.f32.mrf.mxu0  ;;  %v2701_v60 = vpop.f32.mrf.mxu1 }
 0x4bd   :  { %v2792_v9 = vmul.f32 0.0009765625, %v2588_v6  ;;  %v2793_v57 = vmul.f32 0.0009765625, %v2701_v60 }
 0x4be   :  { %v2448_v19 = vpop.trf.xlu0 }
 0x4bf   :  { %4006 = vmatmul.msk.f32.gmra.mxu2 %vm2459_vm8, %v2448_v19  ;;  %4038 = vmatmul.msk.f32.gmra.mxu3 %vm2459_vm8, %v2448_v19  ;;  %v2889_v56 = vmul.f32 %v2792_v9, %v2792_v9  ;;  %v2890_v47 = vmul.f32 %v2793_v57, %v2793_v57 }
 0x4c1   :  { %v2952_v38 = vadd.f32 %v2951_v1, %v2889_v56 }
 0x4c3   :  { %v2953_v58 = vadd.f32 %v2952_v38, %v2890_v47 }
 0x4c4   :  { %v2591_v62 = vpop.f32.mrf.mxu0  ;;  %v2704_v28 = vpop.f32.mrf.mxu1 }
 0x4c5   :  { %v2794_v11 = vmul.f32 0.0009765625, %v2591_v62  ;;  %v2795_v10 = vmul.f32 0.0009765625, %v2704_v28 }
 0x4c6   :  { %v2449_v59 = vpop.trf.xlu0 }
 0x4c7   :  { %4007 = vmatmul.msk.f32.gmra.mxu2 %vm2459_vm8, %v2449_v59  ;;  %4039 = vmatmul.msk.f32.gmra.mxu3 %vm2459_vm8, %v2449_v59  ;;  %v2891_v51 = vmul.f32 %v2794_v11, %v2794_v11  ;;  %v2892_v43 = vmul.f32 %v2795_v10, %v2795_v10 }
 0x4c9   :  { %v2954_v42 = vadd.f32 %v2953_v58, %v2891_v51 }
 0x4cb   :  { %v2955_v52 = vadd.f32 %v2954_v42, %v2892_v43 }
 0x4cc   :  { %v2594_v4 = vpop.f32.mrf.mxu0  ;;  %v2707_v16 = vpop.f32.mrf.mxu1 }
 0x4cd   :  { %v2796_v39 = vmul.f32 0.0009765625, %v2594_v4  ;;  %v2797_v59 = vmul.f32 0.0009765625, %v2707_v16 }
 0x4ce   :  { %v2450_v61 = vpop.trf.xlu0 }
 0x4cf   :  { %4008 = vmatmul.msk.f32.gmra.mxu2 %vm2459_vm8, %v2450_v61  ;;  %4040 = vmatmul.msk.f32.gmra.mxu3 %vm2459_vm8, %v2450_v61  ;;  %v2893_v20 = vmul.f32 %v2796_v39, %v2796_v39  ;;  %v2894_v62 = vmul.f32 %v2797_v59, %v2797_v59 }
 0x4d1   :  { %v2956_v61 = vadd.f32 %v2955_v52, %v2893_v20 }
 0x4d3   :  { %v2957_v0 = vadd.f32 %v2956_v61, %v2894_v62 }
 0x4d4   :  { %v2597_v44 = vpop.f32.mrf.mxu0  ;;  %v2710_v13 = vpop.f32.mrf.mxu1 }
 0x4d5   :  { %v2798_v6 = vmul.f32 0.0009765625, %v2597_v44  ;;  %v2799_v55 = vmul.f32 0.0009765625, %v2710_v13 }
 0x4d6   :  { %v2451_v63 = vpop.trf.xlu0 }
 0x4d7   :  { %4009 = vmatmul.msk.f32.gmra.mxu2 %vm2459_vm8, %v2451_v63  ;;  %4041 = vmatmul.msk.f32.gmra.mxu3 %vm2459_vm8, %v2451_v63  ;;  %v2895_v63 = vmul.f32 %v2798_v6, %v2798_v6 }
 0x4d9   :  { %v2958_v4 = vadd.f32 %v2957_v0, %v2895_v63 }
 0x4dc   :  { %v2600_v35 = vpop.f32.mrf.mxu0  ;;  %v2713_v34 = vpop.f32.mrf.mxu1 }
 0x4dd   :  { %v2800_v2 = vmul.f32 0.0009765625, %v2600_v35  ;;  %v2801_v53 = vmul.f32 0.0009765625, %v2713_v34 }
 0x4de   :  { %v2452_v41 = vpop.trf.xlu0 }
 0x4df   :  { %4010 = vmatmul.msk.f32.gmra.mxu2 %vm2459_vm8, %v2452_v41  ;;  %4042 = vmatmul.msk.f32.gmra.mxu3 %vm2459_vm8, %v2452_v41  ;;  %v2896_v41 = vmul.f32 %v2799_v55, %v2799_v55  ;;  %v2897_v48 = vmul.f32 %v2800_v2, %v2800_v2  ;;  %v2898_v18 = vmul.f32 %v2801_v53, %v2801_v53 }
 0x4e1   :  { %v2959_v3 = vadd.f32 %v2958_v4, %v2896_v41 }
 0x4e3   :  { %v2960_v16 = vadd.f32 %v2959_v3, %v2897_v48 }
 0x4e4   :  { %v2603_v49 = vpop.f32.mrf.mxu0  ;;  %v2716_v21 = vpop.f32.mrf.mxu1 }
 0x4e5   :  { %v2802_v14 = vmul.f32 0.0009765625, %v2603_v49  ;;  %v2961_v44 = vadd.f32 %v2960_v16, %v2898_v18 }
 0x4e6   :  { %v2453_v32 = vpop.trf.xlu0 }
 0x4e7   :  { %4011 = vmatmul.msk.f32.gmra.mxu2 %vm2459_vm8, %v2453_v32  ;;  %4043 = vmatmul.msk.f32.gmra.mxu3 %vm2459_vm8, %v2453_v32  ;;  %v2899_v54 = vmul.f32 %v2802_v14, %v2802_v14  ;;  %v2803_v32 = vmul.f32 0.0009765625, %v2716_v21 }
 0x4e9   :  { %v2962_v24 = vadd.f32 %v2961_v44, %v2899_v54  ;;  %v2900_v29 = vmul.f32 %v2803_v32, %v2803_v32 }
 0x4eb   :  { %v2963_v30 = vadd.f32 %v2962_v24, %v2900_v29 }
 0x4ec   :  { %v2606_v19 = vpop.f32.mrf.mxu0  ;;  %v2719_v28 = vpop.f32.mrf.mxu1 }
 0x4ed   :  { %v2804_v22 = vmul.f32 0.0009765625, %v2606_v19  ;;  %v2805_v50 = vmul.f32 0.0009765625, %v2719_v28 }
 0x4ee   :  { %v2454_v33 = vpop.trf.xlu0 }
 0x4ef   :  { %4012 = vmatmul.msk.f32.gmra.mxu2 %vm2459_vm8, %v2454_v33  ;;  %4044 = vmatmul.msk.f32.gmra.mxu3 %vm2459_vm8, %v2454_v33  ;;  %v2901_v13 = vmul.f32 %v2804_v22, %v2804_v22  ;;  %v2902_v35 = vmul.f32 %v2805_v50, %v2805_v50 }
 0x4f1   :  { %v2964_v40 = vadd.f32 %v2963_v30, %v2901_v13 }
 0x4f3   :  { %v2965_v9 = vadd.f32 %v2964_v40, %v2902_v35 }
 0x4f4   :  { %v2609_v5 = vpop.f32.mrf.mxu0  ;;  %v2722_v12 = vpop.f32.mrf.mxu1 }
 0x4f5   :  { %v2806_v31 = vmul.f32 0.0009765625, %v2609_v5  ;;  %v2807_v37 = vmul.f32 0.0009765625, %v2722_v12 }
 0x4f6   :  { %v2455_v45 = vpop.trf.xlu0 }
 0x4f7   :  { %4013 = vmatmul.msk.f32.gmra.mxu2 %vm2459_vm8, %v2455_v45  ;;  %4045 = vmatmul.msk.f32.gmra.mxu3 %vm2459_vm8, %v2455_v45  ;;  %v2903_v26 = vmul.f32 %v2806_v31, %v2806_v31  ;;  %v2904_v46 = vmul.f32 %v2807_v37, %v2807_v37 }
 0x4f9   :  { %v2966_v45 = vadd.f32 %v2965_v9, %v2903_v26 }
 0x4fb   :  { %v2967_v57 = vadd.f32 %v2966_v45, %v2904_v46 }
 0x4fc   :  { %v2612_v23 = vpop.f32.mrf.mxu0  ;;  %v2725_v33 = vpop.f32.mrf.mxu1 }
 0x4fd   :  { %v2808_v34 = vmul.f32 0.0009765625, %v2612_v23  ;;  %v2809_v11 = vmul.f32 0.0009765625, %v2725_v33 }
 0x4fe   :  { %v2456_v17 = vpop.trf.xlu0 }
 0x4ff   :  { %4014 = vmatmul.msk.f32.gmra.mxu2 %vm2459_vm8, %v2456_v17  ;;  %4046 = vmatmul.msk.f32.gmra.mxu3 %vm2459_vm8, %v2456_v17  ;;  %v2905_v56 = vmul.f32 %v2808_v34, %v2808_v34  ;;  %v2906_v58 = vmul.f32 %v2809_v11, %v2809_v11 }
 0x501   :  { %v2968_v51 = vadd.f32 %v2967_v57, %v2905_v56 }
 0x503   :  { %v2969_v39 = vadd.f32 %v2968_v51, %v2906_v58 }
 0x504   :  { %v2615_v36 = vpop.f32.mrf.mxu0  ;;  %v2728_v1 = vpop.f32.mrf.mxu1 }
 0x505   :  { %v2810_v49 = vmul.f32 0.0009765625, %v2615_v36  ;;  %v2811_v21 = vmul.f32 0.0009765625, %v2728_v1 }
 0x506   :  { %v2457_v60 = vpop.trf.xlu0 }
 0x507   :  { %4015 = vmatmul.msk.f32.gmra.mxu2 %vm2459_vm8, %v2457_v60  ;;  %4047 = vmatmul.msk.f32.gmra.mxu3 %vm2459_vm8, %v2457_v60  ;;  %v2907_v10 = vmul.f32 %v2810_v49, %v2810_v49  ;;  %v2908_v59 = vmul.f32 %v2811_v21, %v2811_v21 }
 0x509   :  { %v2970_v43 = vadd.f32 %v2969_v39, %v2907_v10 }
 0x50b   :  { %v2971_v60 = vadd.f32 %v2970_v43, %v2908_v59 }
 0x50c   :  { %v2618_v17 = vpop.f32.mrf.mxu0  ;;  %v2731_v20 = vpop.f32.mrf.mxu1 }
 0x50d   :  { %v2812_v42 = vmul.f32 0.0009765625, %v2618_v17  ;;  %v2813_v61 = vmul.f32 0.0009765625, %v2731_v20 }
 0x50e   :  { %v2458_v7 = vpop.trf.xlu0 }
 0x50f   :  { %4016 = vmatmul.msk.f32.gmra.mxu2 %vm2459_vm8, %v2458_v7  ;;  %4048 = vmatmul.msk.f32.gmra.mxu3 %vm2459_vm8, %v2458_v7  ;;  %v2909_v6 = vmul.f32 %v2812_v42, %v2812_v42  ;;  %v2910_v28 = vmul.f32 %v2813_v61, %v2813_v61 }
 0x511   :  { %v2972_v63 = vadd.f32 %v2971_v60, %v2909_v6 }
 0x513   :  { %v2973_v4 = vadd.f32 %v2972_v63, %v2910_v28 }
 0x51a   :  { %v2621_v25 = vpop.f32.mrf.mxu2  ;;  %v2734_v27 = vpop.f32.mrf.mxu3 }
 0x51b   :  { %v2814_v62 = vmul.f32 0.0009765625, %v2621_v25  ;;  %v2815_v5 = vmul.f32 0.0009765625, %v2734_v27 }
 0x51d   :  { %v2911_v0 = vmul.f32 %v2814_v62, %v2814_v62  ;;  %v2912_v48 = vmul.f32 %v2815_v5, %v2815_v5 }
 0x51f   :  { %v2974_v41 = vadd.f32 %v2973_v4, %v2911_v0 }
 0x521   :  { %v2975_v53 = vadd.f32 %v2974_v41, %v2912_v48 }
 0x522   :  { %v2624_v8 = vpop.f32.mrf.mxu2  ;;  %v2737_v15 = vpop.f32.mrf.mxu3 }
 0x523   :  { %v2816_v7 = vmul.f32 0.0009765625, %v2624_v8  ;;  %v2817_v14 = vmul.f32 0.0009765625, %v2737_v15 }
 0x525   :  { %v2913_v3 = vmul.f32 %v2816_v7, %v2816_v7  ;;  %v2914_v44 = vmul.f32 %v2817_v14, %v2817_v14 }
 0x527   :  { %v2976_v54 = vadd.f32 %v2975_v53, %v2913_v3 }
 0x529   :  { %v2977_v22 = vadd.f32 %v2976_v54, %v2914_v44 }
 0x52a   :  { %v2627_v38 = vpop.f32.mrf.mxu2  ;;  %v2740_v47 = vpop.f32.mrf.mxu3 }
 0x52b   :  { %v2818_v16 = vmul.f32 0.0009765625, %v2627_v38  ;;  %v2819_v23 = vmul.f32 0.0009765625, %v2740_v47 }
 0x52d   :  { %v2915_v32 = vmul.f32 %v2818_v16, %v2818_v16  ;;  %v2916_v30 = vmul.f32 %v2819_v23, %v2819_v23 }
 0x52f   :  { %v2978_v25 = vadd.f32 %v2977_v22, %v2915_v32 }
 0x531   :  { %v2979_v50 = vadd.f32 %v2978_v25, %v2916_v30 }
 0x532   :  { %v2630_v19 = vpop.f32.mrf.mxu2  ;;  %v2743_v52 = vpop.f32.mrf.mxu3 }
 0x533   :  { %v2820_v24 = vmul.f32 0.0009765625, %v2630_v19  ;;  %v2821_v31 = vmul.f32 0.0009765625, %v2743_v52 }
 0x535   :  { %v2917_v27 = vmul.f32 %v2820_v24, %v2820_v24  ;;  %v2918_v35 = vmul.f32 %v2821_v31, %v2821_v31 }
 0x537   :  { %v2980_v40 = vadd.f32 %v2979_v50, %v2917_v27 }
 0x539   :  { %v2981_v15 = vadd.f32 %v2980_v40, %v2918_v35 }
 0x53a   :  { %v2633_v55 = vpop.f32.mrf.mxu2  ;;  %v2746_v2 = vpop.f32.mrf.mxu3 }
 0x53b   :  { %v2822_v33 = vmul.f32 0.0009765625, %v2633_v55  ;;  %v2823_v9 = vmul.f32 0.0009765625, %v2746_v2 }
 0x53d   :  { %v2919_v26 = vmul.f32 %v2822_v33, %v2822_v33  ;;  %v2920_v45 = vmul.f32 %v2823_v9, %v2823_v9 }
 0x53f   :  { %v2982_v34 = vadd.f32 %v2981_v15, %v2919_v26 }
 0x541   :  { %v2983_v56 = vadd.f32 %v2982_v34, %v2920_v45 }
 0x542   :  { %v2636_v12 = vpop.f32.mrf.mxu2  ;;  %v2749_v18 = vpop.f32.mrf.mxu3 }
 0x543   :  { %v2824_v37 = vmul.f32 0.0009765625, %v2636_v12  ;;  %v2825_v1 = vmul.f32 0.0009765625, %v2749_v18 }
 0x545   :  { %v2921_v46 = vmul.f32 %v2824_v37, %v2824_v37  ;;  %v2922_v47 = vmul.f32 %v2825_v1, %v2825_v1 }
 0x547   :  { %v2984_v38 = vadd.f32 %v2983_v56, %v2921_v46 }
 0x549   :  { %v2985_v17 = vadd.f32 %v2984_v38, %v2922_v47 }
 0x54a   :  { %v2639_v29 = vpop.f32.mrf.mxu2  ;;  %v2752_v13 = vpop.f32.mrf.mxu3 }
 0x54b   :  { %v2826_v57 = vmul.f32 0.0009765625, %v2639_v29  ;;  %v2827_v58 = vmul.f32 0.0009765625, %v2752_v13 }
 0x54d   :  { %v2923_v51 = vmul.f32 %v2826_v57, %v2826_v57  ;;  %v2924_v43 = vmul.f32 %v2827_v58, %v2827_v58 }
 0x54f   :  { %v2986_v39 = vadd.f32 %v2985_v17, %v2923_v51 }
 0x551   :  { %v2987_v19 = vadd.f32 %v2986_v39, %v2924_v43 }
 0x552   :  { %v2642_v36 = vpop.f32.mrf.mxu2  ;;  %v2755_v8 = vpop.f32.mrf.mxu3 }
 0x553   :  { %v2828_v10 = vmul.f32 0.0009765625, %v2642_v36  ;;  %v2829_v52 = vmul.f32 0.0009765625, %v2755_v8 }
 0x555   :  { %v2925_v20 = vmul.f32 %v2828_v10, %v2828_v10  ;;  %v2926_v60 = vmul.f32 %v2829_v52, %v2829_v52  ;;  %v3022_v52 = vpop.xlane.xlu2 %3021 }
 0x557   :  { %v2988_v6 = vadd.f32 %v2987_v19, %v2925_v20 }
 0x559   :  { %v2989_v28 = vadd.f32 %v2988_v6, %v2926_v60 }
 0x55a   :  { %v2645_v11 = vpop.f32.mrf.mxu2  ;;  %v2758_v49 = vpop.f32.mrf.mxu3 }
 0x55b   :  { %v2830_v59 = vmul.f32 0.0009765625, %v2645_v11  ;;  %v2831_v0 = vmul.f32 0.0009765625, %v2758_v49 }
 0x55d   :  { %v2927_v61 = vmul.f32 %v2830_v59, %v2830_v59  ;;  %v2928_v4 = vmul.f32 %v2831_v0, %v2831_v0  ;;  %v3023_v59 = vrot.slane %v3022_v52, 4 }
 0x55f   :  { %v2990_v2 = vadd.f32 %v2989_v28, %v2927_v61  ;;  %v3024_v6 = vadd.f32 %v3023_v59, %v3022_v52 }
 0x561   :  { %v2991_v7 = vadd.f32 %v2990_v2, %v2928_v4  ;;  %v3025_v60 = vrot.slane %v3024_v6, 2 }
 0x562   :  { %v2648_v21 = vpop.f32.mrf.mxu2  ;;  %v2761_v42 = vpop.f32.mrf.mxu3 }
 0x563   :  { %v2832_v55 = vmul.f32 0.0009765625, %v2648_v21  ;;  %v2833_v41 = vmul.f32 0.0009765625, %v2761_v42  ;;  %v3026_v28 = vadd.f32 %v3025_v60, %v3024_v6 }
 0x565   :  { %v2929_v5 = vmul.f32 %v2832_v55, %v2832_v55  ;;  %v2930_v16 = vmul.f32 %v2833_v41, %v2833_v41  ;;  %v3027_v2 = vrot.slane %v3026_v28, 1 }
 0x567   :  { %v2992_v14 = vadd.f32 %v2991_v7, %v2929_v5  ;;  %v3028_v7 = vadd.f32 %v3027_v2, %v3026_v28 }
 0x569   :  { %v2993_v18 = vadd.f32 %v2992_v14, %v2930_v16  ;;  %v2878_v14 = vstv %s4286_s7 }
 0x56a   :  { %v2651_v62 = vpop.f32.mrf.mxu2  ;;  %v2764_v63 = vpop.f32.mrf.mxu3 }
 0x56b   :  { %v2834_v48 = vmul.f32 0.0009765625, %v2651_v62  ;;  %v2835_v54 = vmul.f32 0.0009765625, %v2764_v63 }
 0x56d   :  { %v2931_v12 = vmul.f32 %v2834_v48, %v2834_v48  ;;  %v2932_v24 = vmul.f32 %v2835_v54, %v2835_v54 }
 0x56f   :  { %v2994_v32 = vadd.f32 %v2993_v18, %v2931_v12 }
 0x571   :  { %v2995_v29 = vadd.f32 %v2994_v32, %v2932_v24 }
 0x572   :  { %v2654_v3 = vpop.f32.mrf.mxu2  ;;  %v2767_v53 = vpop.f32.mrf.mxu3 }
 0x573   :  { %v2836_v44 = vmul.f32 0.0009765625, %v2654_v3  ;;  %v2837_v13 = vmul.f32 0.0009765625, %v2767_v53 }
 0x575   :  { %v2933_v25 = vmul.f32 %v2836_v44, %v2836_v44  ;;  %v2934_v50 = vmul.f32 %v2837_v13, %v2837_v13 }
 0x577   :  { %v2996_v27 = vadd.f32 %v2995_v29, %v2933_v25 }
 0x579   :  { %v2997_v35 = vadd.f32 %v2996_v27, %v2934_v50 }
 0x57a   :  { %v2657_v22 = vpop.f32.mrf.mxu2  ;;  %v2770_v23 = vpop.f32.mrf.mxu3 }
 0x57b   :  { %v2838_v30 = vmul.f32 0.0009765625, %v2657_v22  ;;  %v2839_v26 = vmul.f32 0.0009765625, %v2770_v23 }
 0x57d   :  { %v2935_v31 = vmul.f32 %v2838_v30, %v2838_v30  ;;  %v2936_v15 = vmul.f32 %v2839_v26, %v2839_v26 }
 0x57f   :  { %v2998_v8 = vadd.f32 %v2997_v35, %v2935_v31 }
 0x581   :  { %v2999_v37 = vadd.f32 %v2998_v8, %v2936_v15 }
 0x582   :  { %v2660_v33 = vpop.f32.mrf.mxu2  ;;  %v2773_v40 = vpop.f32.mrf.mxu3 }
 0x583   :  { %v2840_v36 = vmul.f32 0.0009765625, %v2660_v33  ;;  %v2841_v34 = vmul.f32 0.0009765625, %v2773_v40 }
 0x585   :  { %v2937_v9 = vmul.f32 %v2840_v36, %v2840_v36  ;;  %v2938_v57 = vmul.f32 %v2841_v34, %v2841_v34 }
 0x587   :  { %v3000_v56 = vadd.f32 %v2999_v37, %v2937_v9 }
 0x589   :  { %v3001_v49 = vadd.f32 %v3000_v56, %v2938_v57 }
 0x58a   :  { %v2663_v45 = vpop.f32.mrf.mxu2  ;;  %v2776_v46 = vpop.f32.mrf.mxu3 }
 0x58b   :  { %v2842_v1 = vmul.f32 0.0009765625, %v2663_v45  ;;  %v2843_v38 = vmul.f32 0.0009765625, %v2776_v46 }
 0x58d   :  { %v2939_v11 = vmul.f32 %v2842_v1, %v2842_v1  ;;  %v2940_v58 = vmul.f32 %v2843_v38, %v2843_v38 }
 0x58f   :  { %v3002_v47 = vadd.f32 %v3001_v49, %v2939_v11 }
 0x591   :  { %v3003_v21 = vadd.f32 %v3002_v47, %v2940_v58 }
 0x592   :  { %v2666_v51 = vpop.f32.mrf.mxu2  ;;  %v2779_v17 = vpop.f32.mrf.mxu3 }
 0x593   :  { %v2844_v10 = vmul.f32 0.0009765625, %v2666_v51  ;;  %v2845_v39 = vmul.f32 0.0009765625, %v2779_v17 }
 0x595   :  { %v2941_v42 = vmul.f32 %v2844_v10, %v2844_v10  ;;  %v2942_v20 = vmul.f32 %v2845_v39, %v2845_v39 }
 0x597   :  { %v3004_v43 = vadd.f32 %v3003_v21, %v2941_v42 }
 0x599   :  { %v3005_v19 = vadd.f32 %v3004_v43, %v2942_v20 }
 0x59b   :  { %3006 = vadd.xlane.f32.xlu1 %v3005_v19 }
 0x60e   :  { %v3007_v61 = vpop.xlane.xlu1 %3006 }
 0x60f   :  { %v3008_v62 = vrot.slane %v3007_v61, 4 }
 0x611   :  { %v3009_v63 = vadd.f32 %v3008_v62, %v3007_v61 }
 0x613   :  { %v3010_v0 = vrot.slane %v3009_v63, 2 }
 0x615   :  { %v3011_v55 = vadd.f32 %v3010_v0, %v3009_v63 }
 0x617   :  { %v3012_v4 = vrot.slane %v3011_v55, 1 }
 0x619   :  { %v3013_v5 = vadd.f32 %v3012_v4, %v3011_v55 }
 0x61b   :  { %4287 = vpush %v3013_v5 }
 0x61c   :  { %4289 = vpush %v3028_v7 }
 0x64c   :  { %s4288_s20 = spop %4287 }
 0x64d   :  { %v3015_v41 = vstv %s4288_s20  ;;  %s4290_s21 = spop %4289 }
 0x64e   :  { %v3030_v48 = vstv %s4290_s21 }
 0x64f   :  { %v3031_v3 = vsub.f32 %v3015_v41, %v3030_v48 }
 0x651   :  { %v3032_v53 = vmul.f32 0.0039, %v3031_v3 }
 0x653   :  { %v3033_v16 = vadd.f32 %v3032_v53, %v2878_v14 }
 0x655   :  { %v3034_v12 = vmul.f32 0.03125, %v3033_v16 }
 0x657   :  { %3036 = vst.msk [vmem:[#allocation13] sm:$0x1] %vm3035_vm5, %v3034_v12 }
 0x658   :  { %3047 = dma.vmem_to_hbm [thread:$0]  %s3043_s22, 16, %s3045_s4, [#allocation4]  }
 0x659   :  { %4506 = dma.done.wait [#allocation4], 16  }
 0x65a   :  { %4507 = vsyncadd [#allocation4], 4294967280 }
 0x65b   :  { %3052 = vsyncpa [#allocation3], 1 }
 0x65c   :  { %3053 = vsyncpa [#allocation6], 1 }
 0x65d   :  { %3054 = vsyncpa [#allocation9], 1 }
 0x65e   :  { %3055 = vsyncpa [#allocation12], 1 }
 0x65f   :  { %3056 = vsyncpa [#allocation4], 1 }

</bundles_post_ra>
